<compile_context>
chip_gen: v5e
topology: v5e:2x2
jax: 0.10.0
libtpu: 0.0.40
codegen_flags: <defaults>
</compile_context>

<pallas_src>
import jax
import jax.numpy as jnp
from jax import lax
from jax.experimental import pallas as pl
from jax.experimental.pallas import tpu as pltpu


# ----------------------------- chip dispatch -------------------------------- #

def _use_fused_dirs():
    """True -> one 256-wide block-diag recurrence push (v6e/v7x).
    False -> two 128-wide per-direction pushes (v2-v5, 128-wide MXUs)."""
    try:
        kind = jax.devices()[0].device_kind.lower()
    except Exception:
        return True
    return not any(v in kind for v in ("v2", "v3", "v4", "v5"))


# ----------------------------- Pallas kernel ------------------------------- #

def _make_fused_kernel(num_layers, T, Bp, H, fuse_dirs):
    """Fused bidirectional-LSTM + FC kernel for static shapes.

    Ref order: x, (w_ih, w_hh_bd, b) * num_layers, w_fc, b_fc, out, scratch...
      x:       (T, Bp, D)        time-major, batch padded to Bp
      w_ih:    (D_l, 8H)         [fwd 4H | bwd 4H] along N
      w_hh_bd: (2H, 8H)          blockdiag(w_hh_fwd, w_hh_bwd)
      b:       (1, 8H)           (b_ih + b_hh) per direction, concatenated
      w_fc:    (1, 2H)           PyTorch Linear layout (out_features, in_features)
      b_fc:    (1, 1)
      out:     (Bp, 1)
      scratch: seq buffers (T, Bp, 2H) f32 (ping-pong layer outputs, [fwd|bwd]
               along lanes) + gin buffer (T, Bp, 8H) f32.
    """
    H4 = 4 * H

    def kernel(*refs):
        n_w = 3 * num_layers
        x_ref = refs[0]
        layer_refs = [refs[1 + 3 * l: 4 + 3 * l] for l in range(num_layers)]
        w_fc_ref = refs[1 + n_w]
        b_fc_ref = refs[2 + n_w]
        out_ref = refs[3 + n_w]
        scr = refs[4 + n_w:]
        gin_scr = scr[-1]                 # (T, Bp, 8H)
        seq = scr[:-1]                    # 1 or 2 x (T, Bp, 2H), ping-pong

        def cell(g, c):
            # Full-vreg (Bp, 4H)=128-lane EUP passes, then static lane slices.
            sig = jax.nn.sigmoid(g)
            th = jnp.tanh(g)
            i_g = sig[:, 0:H]
            f_g = sig[:, H:2 * H]
            o_g = sig[:, 3 * H:4 * H]
            g_g = th[:, 2 * H:3 * H]
            c_new = f_g * c + i_g * g_g
            h_new = o_g * jnp.tanh(c_new)
            return h_new, c_new

        for l in range(num_layers):
            w_ih_ref, w_hh_ref, b_ref = layer_refs[l]
            cur = seq[l % 2]

            # ---- hoisted input projection: ONE matmul per layer ----
            if l == 0:
                lhs = x_ref[...].reshape(T * Bp, x_ref.shape[-1])
            else:
                # previous layer output is already [h_f | h_b] along K=2H
                lhs = seq[(l - 1) % 2][...].reshape(T * Bp, 2 * H)
            gin = jnp.dot(lhs, w_ih_ref[...],
                          preferred_element_type=jnp.float32) + b_ref[...]
            # Park gin in VMEM; reload per step (vld slot idle in recurrence,
            # keeps vreg pressure low across the unrolled loop).
            gin_scr[...] = gin.reshape(T, Bp, 8 * H)

            h_f = jnp.zeros((Bp, H), jnp.float32)
            c_f = jnp.zeros((Bp, H), jnp.float32)
            h_b = jnp.zeros((Bp, H), jnp.float32)
            c_b = jnp.zeros((Bp, H), jnp.float32)

            # T is small and static: fully unrolled recurrence; only the
            # h @ W_hh push remains on the serial critical path.
            if fuse_dirs:
                # v6e/v7x: single 256-wide block-diagonal push per step.
                w_bd = w_hh_ref[...]
                for t in range(T):
                    h_cat = jnp.concatenate([h_f, h_b], axis=-1)      # (Bp, 2H)
                    g_all = jnp.dot(h_cat, w_bd,
                                    preferred_element_type=jnp.float32)
                    g_f = g_all[:, 0:H4] + gin_scr[t, :, 0:H4]
                    g_b = g_all[:, H4:2 * H4] + gin_scr[T - 1 - t, :, H4:2 * H4]
                    h_f, c_f = cell(g_f, c_f)
                    h_b, c_b = cell(g_b, c_b)
                    cur[t, :, 0:H] = h_f                  # fwd out at t
                    cur[T - 1 - t, :, H:2 * H] = h_b      # bwd out at T-1-t
            else:
                # v5-class: two independent 128-wide pushes map 1:1 to the MXUs.
                w_hh_f = w_hh_ref[0:H, 0:H4]
                w_hh_b = w_hh_ref[H:2 * H, H4:2 * H4]
                for t in range(T):
                    g_f = gin_scr[t, :, 0:H4] + jnp.dot(
                        h_f, w_hh_f, preferred_element_type=jnp.float32)
                    g_b = gin_scr[T - 1 - t, :, H4:2 * H4] + jnp.dot(
                        h_b, w_hh_b, preferred_element_type=jnp.float32)
                    h_f, c_f = cell(g_f, c_f)
                    h_b, c_b = cell(g_b, c_b)
                    cur[t, :, 0:H] = h_f
                    cur[T - 1 - t, :, H:2 * H] = h_b

        # ---- FC epilogue: out = concat(h_f[T-1], h_b@pos T-1) @ W_fc^T + b ----
        # N=1 -> VPU multiply + lane reduction (no N=1 MXU matmul).
        last = seq[(num_layers - 1) % 2][T - 1]           # (Bp, 2H), already [f|b]
        w_fc = w_fc_ref[...]                              # (1, 2H)
        acc = jnp.sum(last * w_fc, axis=-1, keepdims=True) + b_fc_ref[...]
        out_ref[...] = acc.astype(out_ref.dtype)

    return kernel


# ------------------------------ JAX wrapper -------------------------------- #

def _forward_impl(x, packed_layers, fc_params):
    """x: (B, T, input_size), batch_first like the PyTorch module."""
    B, T, D = x.shape
    num_layers = len(packed_layers)
    H = packed_layers[0]["w_hh_bd"].shape[0] // 2

    # Pad batch to a sublane multiple (keeps the (T*Bp, D) reshape relayout-free).
    Bp = ((B + 7) // 8) * 8
    x_t = jnp.transpose(x, (1, 0, 2))                     # (T, B, D) time-major
    if Bp != B:
        x_t = jnp.pad(x_t, ((0, 0), (0, Bp - B), (0, 0)))

    w_fc, b_fc = fc_params
    inputs = [x_t]
    for layer in packed_layers:
        inputs += [layer["w_ih"], layer["w_hh_bd"], layer["b"]]
    inputs += [w_fc, b_fc]

    n_seq = 1 if num_layers == 1 else 2
    scratch = [pltpu.VMEM((T, Bp, 2 * H), jnp.float32) for _ in range(n_seq)]
    scratch.append(pltpu.VMEM((T, Bp, 8 * H), jnp.float32))

    # TODO(synk): at batch=2 there is nothing to shard onto v7x's second
    # TensorCore; with many independent sequences add a parallel grid axis.
    out_p = pl.pallas_call(
        _make_fused_kernel(num_layers, T, Bp, H, _use_fused_dirs()),
        out_shape=jax.ShapeDtypeStruct((Bp, 1), jnp.float32),
        in_specs=[pl.BlockSpec(memory_space=pltpu.MemorySpace.VMEM)] * len(inputs),
        out_specs=pl.BlockSpec(memory_space=pltpu.MemorySpace.VMEM),
        scratch_shapes=scratch,
    )(*inputs)
    return out_p[:B]


lstm_model_forward = jax.jit(_forward_impl)


# ------------------------------ parameters --------------------------------- #

def init_params(key, input_size, hidden_size, num_layers):
    """Deterministic init mimicking PyTorch's U(-1/sqrt(H), 1/sqrt(H)).
    Returns raw per-direction weights (also used by the pure-JAX reference)."""
    k = 1.0 / float(hidden_size) ** 0.5
    layers = []
    for layer_idx in range(num_layers):
        d_in = input_size if layer_idx == 0 else 2 * hidden_size
        w_ih_d, w_hh_d, b_d = [], [], []
        for _ in range(2):                       # fwd, bwd
            key, k0, k1, k2, k3 = jax.random.split(key, 5)
            w_ih = jax.random.uniform(k0, (d_in, 4 * hidden_size),
                                      minval=-k, maxval=k, dtype=jnp.float32)
            w_hh = jax.random.uniform(k1, (hidden_size, 4 * hidden_size),
                                      minval=-k, maxval=k, dtype=jnp.float32)
            b_ih = jax.random.uniform(k2, (4 * hidden_size,),
                                      minval=-k, maxval=k, dtype=jnp.float32)
            b_hh = jax.random.uniform(k3, (4 * hidden_size,),
                                      minval=-k, maxval=k, dtype=jnp.float32)
            w_ih_d.append(w_ih)
            w_hh_d.append(w_hh)
            b_d.append((b_ih + b_hh).reshape(1, -1))
        layers.append({
            "w_ih": jnp.stack(w_ih_d),           # (2, d_in, 4H)
            "w_hh": jnp.stack(w_hh_d),           # (2, H, 4H)
            "b":    jnp.stack(b_d),              # (2, 1, 4H)
        })

    kf = 1.0 / float(2 * hidden_size) ** 0.5
    key, k0, k1 = jax.random.split(key, 3)
    w_fc = jax.random.uniform(k0, (1, 2 * hidden_size),
                              minval=-kf, maxval=kf, dtype=jnp.float32)
    b_fc = jax.random.uniform(k1, (1, 1),
                              minval=-kf, maxval=kf, dtype=jnp.float32)
    return layers, (w_fc, b_fc)


def pack_params(lstm_params):
    """Pack raw per-direction weights into the kernel's fused layouts (once)."""
    packed = []
    for layer in lstm_params:
        w_ih, w_hh, b = layer["w_ih"], layer["w_hh"], layer["b"]
        H = w_hh.shape[1]
        w_ih_cat = jnp.concatenate([w_ih[0], w_ih[1]], axis=-1)     # (D_l, 8H)
        w_bd = jnp.zeros((2 * H, 8 * H), w_hh.dtype)
        w_bd = w_bd.at[:H, :4 * H].set(w_hh[0]).at[H:, 4 * H:].set(w_hh[1])
        b_cat = jnp.concatenate([b[0], b[1]], axis=-1)              # (1, 8H)
        packed.append({"w_ih": w_ih_cat, "w_hh_bd": w_bd, "b": b_cat})
    return packed


# Pure-JAX reference (same math, lax.scan) used as a sanity check.
def _lstm_ref(x, lstm_params, fc_params):
    def run_dir(seq, w_ih, w_hh, b):
        H = w_hh.shape[0]

        def step(carry, x_t):
            h, c = carry
            g = x_t @ w_ih + h @ w_hh + b
            i = jax.nn.sigmoid(g[:, :H])
            f = jax.nn.sigmoid(g[:, H:2 * H])
            gg = jnp.tanh(g[:, 2 * H:3 * H])
            o = jax.nn.sigmoid(g[:, 3 * H:])
            c = f * c + i * gg
            h = o * jnp.tanh(c)
            return (h, c), h

        B = seq.shape[1]
        init = (jnp.zeros((B, H), jnp.float32), jnp.zeros((B, H), jnp.float32))
        _, hs = lax.scan(step, init, seq)
        return hs

    x_t = jnp.transpose(x, (1, 0, 2))
    layer_in = x_t
    for layer in lstm_params:
        w_ih, w_hh, b = layer["w_ih"], layer["w_hh"], layer["b"]
        out_f = run_dir(layer_in, w_ih[0], w_hh[0], b[0])
        out_b = run_dir(layer_in[::-1], w_ih[1], w_hh[1], b[1])[::-1]
        layer_in = jnp.concatenate([out_f, out_b], axis=-1)
    w_fc, b_fc = fc_params
    return layer_in[-1] @ w_fc.T + b_fc


if __name__ == "__main__":
    # Shapes consistent with the module's forward:
    # x: (batch=2, seq=8, input_size=16), hidden=32, num_layers=2.
    batch, seq_len, input_size, hidden_size, num_layers = 2, 8, 16, 32, 2

    key = jax.random.PRNGKey(0)
    key, pk, xk = jax.random.split(key, 3)
    lstm_params, fc_params = init_params(pk, input_size, hidden_size, num_layers)
    packed_layers = pack_params(lstm_params)
    x = jax.random.normal(xk, (batch, seq_len, input_size), dtype=jnp.float32)

    out = jax.block_until_ready(lstm_model_forward(x, packed_layers, fc_params))
    assert out.shape == (batch, 1), out.shape

    ref = jax.block_until_ready(_lstm_ref(x, lstm_params, fc_params))
    assert jnp.max(jnp.abs(out - ref)) < 1e-3, "mismatch vs JAX reference"

    print("KERNEL_OK")
</pallas_src>

<mosaic_0001>
module attributes {stable_mosaic.version = 11 : i64} {
  func.func @kernel(%arg0: memref<8x8x16xf32, #tpu.memory_space<vmem>>, %arg1: memref<16x256xf32, #tpu.memory_space<vmem>>, %arg2: memref<64x256xf32, #tpu.memory_space<vmem>>, %arg3: memref<1x256xf32, #tpu.memory_space<vmem>>, %arg4: memref<64x256xf32, #tpu.memory_space<vmem>>, %arg5: memref<64x256xf32, #tpu.memory_space<vmem>>, %arg6: memref<1x256xf32, #tpu.memory_space<vmem>>, %arg7: memref<1x64xf32, #tpu.memory_space<vmem>>, %arg8: memref<1x1xf32, #tpu.memory_space<vmem>>, %arg9: memref<8x1xf32, #tpu.memory_space<vmem>>, %arg10: memref<8x8x64xf32, #tpu.memory_space<vmem>>, %arg11: memref<8x8x64xf32, #tpu.memory_space<vmem>>, %arg12: memref<8x8x256xf32, #tpu.memory_space<vmem>>) attributes {dimension_semantics = [], scalar_prefetch = 0 : i64, scratch_operands = 3 : i64, tpu.core_type = #tpu.core_type<tc>} {
    %c0 = arith.constant 0 : index
    %c0_0 = arith.constant 0 : index
    %c0_1 = arith.constant 0 : index
    %0 = vector.load %arg0[%c0, %c0_0, %c0_1] : memref<8x8x16xf32, #tpu.memory_space<vmem>>, vector<8x8x16xf32>
    %1 = vector.shape_cast %0 : vector<8x8x16xf32> to vector<64x16xf32>
    %c0_2 = arith.constant 0 : index
    %c0_3 = arith.constant 0 : index
    %2 = vector.load %arg1[%c0_2, %c0_3] : memref<16x256xf32, #tpu.memory_space<vmem>>, vector<16x256xf32>
    %cst = arith.constant dense<0.000000e+00> : vector<64x256xf32>
    %3 = tpu.matmul %1, %2, %cst {dimension_numbers = #tpu.dot_dimension_numbers<[1], [0], [0], [1], [0, 0, 1, 1], [], []>} : vector<64x16xf32>, vector<16x256xf32>, vector<64x256xf32> -> vector<64x256xf32>
    %c0_4 = arith.constant 0 : index
    %c0_5 = arith.constant 0 : index
    %4 = vector.load %arg3[%c0_4, %c0_5] : memref<1x256xf32, #tpu.memory_space<vmem>>, vector<1x256xf32>
    %5 = vector.broadcast %4 : vector<1x256xf32> to vector<64x256xf32>
    %6 = arith.addf %3, %5 : vector<64x256xf32>
    %7 = vector.shape_cast %6 : vector<64x256xf32> to vector<8x8x256xf32>
    %c0_6 = arith.constant 0 : index
    %c0_7 = arith.constant 0 : index
    %c0_8 = arith.constant 0 : index
    %8 = vector.load %arg12[%c0_6, %c0_7, %c0_8] : memref<8x8x256xf32, #tpu.memory_space<vmem>>, vector<8x8x256xf32>
    tpu.vector_store %arg12[%c0_6, %c0_7, %c0_8], %7 {strides = array<i32>} : memref<8x8x256xf32, #tpu.memory_space<vmem>>, vector<8x8x256xf32>,
    %cst_9 = arith.constant 0.000000e+00 : f32
    %9 = vector.broadcast %cst_9 : f32 to vector<8x32xf32>
    %cst_10 = arith.constant 0.000000e+00 : f32
    %10 = vector.broadcast %cst_10 : f32 to vector<8x32xf32>
    %cst_11 = arith.constant 0.000000e+00 : f32
    %11 = vector.broadcast %cst_11 : f32 to vector<8x32xf32>
    %cst_12 = arith.constant 0.000000e+00 : f32
    %12 = vector.broadcast %cst_12 : f32 to vector<8x32xf32>
    %c0_13 = arith.constant 0 : index
    %c0_14 = arith.constant 0 : index
    %13 = vector.load %arg2[%c0_13, %c0_14] : memref<64x256xf32, #tpu.memory_space<vmem>>, vector<64x256xf32>
    %14 = tpu.concatenate %9, %11 in 1 : vector<8x32xf32>, vector<8x32xf32> -> vector<8x64xf32>
    %cst_15 = arith.constant dense<0.000000e+00> : vector<8x256xf32>
    %15 = tpu.matmul %14, %13, %cst_15 {dimension_numbers = #tpu.dot_dimension_numbers<[1], [0], [0], [1], [0, 0, 1, 1], [], []>} : vector<8x64xf32>, vector<64x256xf32>, vector<8x256xf32> -> vector<8x256xf32>
    %16 = vector.extract_strided_slice %15 {offsets = [0, 0], sizes = [8, 128], strides = [1, 1]} : vector<8x256xf32> to vector<8x128xf32>
    %c0_16 = arith.constant 0 : index
    %c0_17 = arith.constant 0 : index
    %c0_18 = arith.constant 0 : index
    %17 = vector.load %arg12[%c0_16, %c0_17, %c0_18] : memref<8x8x256xf32, #tpu.memory_space<vmem>>, vector<1x8x128xf32>
    %18 = vector.shape_cast %17 : vector<1x8x128xf32> to vector<8x128xf32>
    %19 = arith.addf %16, %18 : vector<8x128xf32>
    %20 = vector.extract_strided_slice %15 {offsets = [0, 128], sizes = [8, 128], strides = [1, 1]} : vector<8x256xf32> to vector<8x128xf32>
    %c7 = arith.constant 7 : index
    %c0_19 = arith.constant 0 : index
    %c128 = arith.constant 128 : index
    %21 = vector.load %arg12[%c7, %c0_19, %c128] : memref<8x8x256xf32, #tpu.memory_space<vmem>>, vector<1x8x128xf32>
    %22 = vector.shape_cast %21 : vector<1x8x128xf32> to vector<8x128xf32>
    %23 = arith.addf %20, %22 : vector<8x128xf32>
    %24 = arith.negf %19 : vector<8x128xf32>
    %25 = math.exp %24 : vector<8x128xf32>
    %cst_20 = arith.constant 1.000000e+00 : f32
    %26 = vector.broadcast %cst_20 : f32 to vector<8x128xf32>
    %27 = arith.addf %26, %25 : vector<8x128xf32>
    %28 = arith.divf %26, %27 : vector<8x128xf32>
    %29 = math.tanh %19 : vector<8x128xf32>
    %30 = vector.extract_strided_slice %28 {offsets = [0, 0], sizes = [8, 32], strides = [1, 1]} : vector<8x128xf32> to vector<8x32xf32>
    %31 = vector.extract_strided_slice %28 {offsets = [0, 32], sizes = [8, 32], strides = [1, 1]} : vector<8x128xf32> to vector<8x32xf32>
    %32 = vector.extract_strided_slice %28 {offsets = [0, 96], sizes = [8, 32], strides = [1, 1]} : vector<8x128xf32> to vector<8x32xf32>
    %33 = vector.extract_strided_slice %29 {offsets = [0, 64], sizes = [8, 32], strides = [1, 1]} : vector<8x128xf32> to vector<8x32xf32>
    %34 = arith.mulf %31, %10 : vector<8x32xf32>
    %35 = arith.mulf %30, %33 : vector<8x32xf32>
    %36 = arith.addf %34, %35 : vector<8x32xf32>
    %37 = math.tanh %36 : vector<8x32xf32>
    %38 = arith.mulf %32, %37 : vector<8x32xf32>
    %39 = arith.negf %23 : vector<8x128xf32>
    %40 = math.exp %39 : vector<8x128xf32>
    %cst_21 = arith.constant 1.000000e+00 : f32
    %41 = vector.broadcast %cst_21 : f32 to vector<8x128xf32>
    %42 = arith.addf %41, %40 : vector<8x128xf32>
    %43 = arith.divf %41, %42 : vector<8x128xf32>
    %44 = math.tanh %23 : vector<8x128xf32>
    %45 = vector.extract_strided_slice %43 {offsets = [0, 0], sizes = [8, 32], strides = [1, 1]} : vector<8x128xf32> to vector<8x32xf32>
    %46 = vector.extract_strided_slice %43 {offsets = [0, 32], sizes = [8, 32], strides = [1, 1]} : vector<8x128xf32> to vector<8x32xf32>
    %47 = vector.extract_strided_slice %43 {offsets = [0, 96], sizes = [8, 32], strides = [1, 1]} : vector<8x128xf32> to vector<8x32xf32>
    %48 = vector.extract_strided_slice %44 {offsets = [0, 64], sizes = [8, 32], strides = [1, 1]} : vector<8x128xf32> to vector<8x32xf32>
    %49 = arith.mulf %46, %12 : vector<8x32xf32>
    %50 = arith.mulf %45, %48 : vector<8x32xf32>
    %51 = arith.addf %49, %50 : vector<8x32xf32>
    %52 = math.tanh %51 : vector<8x32xf32>
    %53 = arith.mulf %47, %52 : vector<8x32xf32>
    %c0_22 = arith.constant 0 : index
    %c0_23 = arith.constant 0 : index
    %c0_24 = arith.constant 0 : index
    %54 = vector.load %arg10[%c0_22, %c0_23, %c0_24] : memref<8x8x64xf32, #tpu.memory_space<vmem>>, vector<1x8x32xf32>
    %55 = vector.shape_cast %54 : vector<1x8x32xf32> to vector<8x32xf32>
    %56 = vector.shape_cast %38 : vector<8x32xf32> to vector<1x8x32xf32>
    tpu.vector_store %arg10[%c0_22, %c0_23, %c0_24], %56 {strides = array<i32>} : memref<8x8x64xf32, #tpu.memory_space<vmem>>, vector<1x8x32xf32>,
    %c7_25 = arith.constant 7 : index
    %c0_26 = arith.constant 0 : index
    %c32 = arith.constant 32 : index
    %57 = vector.load %arg10[%c7_25, %c0_26, %c32] : memref<8x8x64xf32, #tpu.memory_space<vmem>>, vector<1x8x32xf32>
    %58 = vector.shape_cast %57 : vector<1x8x32xf32> to vector<8x32xf32>
    %59 = vector.shape_cast %53 : vector<8x32xf32> to vector<1x8x32xf32>
    tpu.vector_store %arg10[%c7_25, %c0_26, %c32], %59 {strides = array<i32>} : memref<8x8x64xf32, #tpu.memory_space<vmem>>, vector<1x8x32xf32>,
    %60 = tpu.concatenate %38, %53 in 1 : vector<8x32xf32>, vector<8x32xf32> -> vector<8x64xf32>
    %cst_27 = arith.constant dense<0.000000e+00> : vector<8x256xf32>
    %61 = tpu.matmul %60, %13, %cst_27 {dimension_numbers = #tpu.dot_dimension_numbers<[1], [0], [0], [1], [0, 0, 1, 1], [], []>} : vector<8x64xf32>, vector<64x256xf32>, vector<8x256xf32> -> vector<8x256xf32>
    %62 = vector.extract_strided_slice %61 {offsets = [0, 0], sizes = [8, 128], strides = [1, 1]} : vector<8x256xf32> to vector<8x128xf32>
    %c1 = arith.constant 1 : index
    %c0_28 = arith.constant 0 : index
    %c0_29 = arith.constant 0 : index
    %63 = vector.load %arg12[%c1, %c0_28, %c0_29] : memref<8x8x256xf32, #tpu.memory_space<vmem>>, vector<1x8x128xf32>
    %64 = vector.shape_cast %63 : vector<1x8x128xf32> to vector<8x128xf32>
    %65 = arith.addf %62, %64 : vector<8x128xf32>
    %66 = vector.extract_strided_slice %61 {offsets = [0, 128], sizes = [8, 128], strides = [1, 1]} : vector<8x256xf32> to vector<8x128xf32>
    %c6 = arith.constant 6 : index
    %c0_30 = arith.constant 0 : index
    %c128_31 = arith.constant 128 : index
    %67 = vector.load %arg12[%c6, %c0_30, %c128_31] : memref<8x8x256xf32, #tpu.memory_space<vmem>>, vector<1x8x128xf32>
    %68 = vector.shape_cast %67 : vector<1x8x128xf32> to vector<8x128xf32>
    %69 = arith.addf %66, %68 : vector<8x128xf32>
    %70 = arith.negf %65 : vector<8x128xf32>
    %71 = math.exp %70 : vector<8x128xf32>
    %cst_32 = arith.constant 1.000000e+00 : f32
    %72 = vector.broadcast %cst_32 : f32 to vector<8x128xf32>
    %73 = arith.addf %72, %71 : vector<8x128xf32>
    %74 = arith.divf %72, %73 : vector<8x128xf32>
    %75 = math.tanh %65 : vector<8x128xf32>
    %76 = vector.extract_strided_slice %74 {offsets = [0, 0], sizes = [8, 32], strides = [1, 1]} : vector<8x128xf32> to vector<8x32xf32>
    %77 = vector.extract_strided_slice %74 {offsets = [0, 32], sizes = [8, 32], strides = [1, 1]} : vector<8x128xf32> to vector<8x32xf32>
    %78 = vector.extract_strided_slice %74 {offsets = [0, 96], sizes = [8, 32], strides = [1, 1]} : vector<8x128xf32> to vector<8x32xf32>
    %79 = vector.extract_strided_slice %75 {offsets = [0, 64], sizes = [8, 32], strides = [1, 1]} : vector<8x128xf32> to vector<8x32xf32>
    %80 = arith.mulf %77, %36 : vector<8x32xf32>
    %81 = arith.mulf %76, %79 : vector<8x32xf32>
    %82 = arith.addf %80, %81 : vector<8x32xf32>
    %83 = math.tanh %82 : vector<8x32xf32>
    %84 = arith.mulf %78, %83 : vector<8x32xf32>
    %85 = arith.negf %69 : vector<8x128xf32>
    %86 = math.exp %85 : vector<8x128xf32>
    %cst_33 = arith.constant 1.000000e+00 : f32
    %87 = vector.broadcast %cst_33 : f32 to vector<8x128xf32>
    %88 = arith.addf %87, %86 : vector<8x128xf32>
    %89 = arith.divf %87, %88 : vector<8x128xf32>
    %90 = math.tanh %69 : vector<8x128xf32>
    %91 = vector.extract_strided_slice %89 {offsets = [0, 0], sizes = [8, 32], strides = [1, 1]} : vector<8x128xf32> to vector<8x32xf32>
    %92 = vector.extract_strided_slice %89 {offsets = [0, 32], sizes = [8, 32], strides = [1, 1]} : vector<8x128xf32> to vector<8x32xf32>
    %93 = vector.extract_strided_slice %89 {offsets = [0, 96], sizes = [8, 32], strides = [1, 1]} : vector<8x128xf32> to vector<8x32xf32>
    %94 = vector.extract_strided_slice %90 {offsets = [0, 64], sizes = [8, 32], strides = [1, 1]} : vector<8x128xf32> to vector<8x32xf32>
    %95 = arith.mulf %92, %51 : vector<8x32xf32>
    %96 = arith.mulf %91, %94 : vector<8x32xf32>
    %97 = arith.addf %95, %96 : vector<8x32xf32>
    %98 = math.tanh %97 : vector<8x32xf32>
    %99 = arith.mulf %93, %98 : vector<8x32xf32>
    %c1_34 = arith.constant 1 : index
    %c0_35 = arith.constant 0 : index
    %c0_36 = arith.constant 0 : index
    %100 = vector.load %arg10[%c1_34, %c0_35, %c0_36] : memref<8x8x64xf32, #tpu.memory_space<vmem>>, vector<1x8x32xf32>
    %101 = vector.shape_cast %100 : vector<1x8x32xf32> to vector<8x32xf32>
    %102 = vector.shape_cast %84 : vector<8x32xf32> to vector<1x8x32xf32>
    tpu.vector_store %arg10[%c1_34, %c0_35, %c0_36], %102 {strides = array<i32>} : memref<8x8x64xf32, #tpu.memory_space<vmem>>, vector<1x8x32xf32>,
    %c6_37 = arith.constant 6 : index
    %c0_38 = arith.constant 0 : index
    %c32_39 = arith.constant 32 : index
    %103 = vector.load %arg10[%c6_37, %c0_38, %c32_39] : memref<8x8x64xf32, #tpu.memory_space<vmem>>, vector<1x8x32xf32>
    %104 = vector.shape_cast %103 : vector<1x8x32xf32> to vector<8x32xf32>
    %105 = vector.shape_cast %99 : vector<8x32xf32> to vector<1x8x32xf32>
    tpu.vector_store %arg10[%c6_37, %c0_38, %c32_39], %105 {strides = array<i32>} : memref<8x8x64xf32, #tpu.memory_space<vmem>>, vector<1x8x32xf32>,
    %106 = tpu.concatenate %84, %99 in 1 : vector<8x32xf32>, vector<8x32xf32> -> vector<8x64xf32>
    %cst_40 = arith.constant dense<0.000000e+00> : vector<8x256xf32>
    %107 = tpu.matmul %106, %13, %cst_40 {dimension_numbers = #tpu.dot_dimension_numbers<[1], [0], [0], [1], [0, 0, 1, 1], [], []>} : vector<8x64xf32>, vector<64x256xf32>, vector<8x256xf32> -> vector<8x256xf32>
    %108 = vector.extract_strided_slice %107 {offsets = [0, 0], sizes = [8, 128], strides = [1, 1]} : vector<8x256xf32> to vector<8x128xf32>
    %c2 = arith.constant 2 : index
    %c0_41 = arith.constant 0 : index
    %c0_42 = arith.constant 0 : index
    %109 = vector.load %arg12[%c2, %c0_41, %c0_42] : memref<8x8x256xf32, #tpu.memory_space<vmem>>, vector<1x8x128xf32>
    %110 = vector.shape_cast %109 : vector<1x8x128xf32> to vector<8x128xf32>
    %111 = arith.addf %108, %110 : vector<8x128xf32>
    %112 = vector.extract_strided_slice %107 {offsets = [0, 128], sizes = [8, 128], strides = [1, 1]} : vector<8x256xf32> to vector<8x128xf32>
    %c5 = arith.constant 5 : index
    %c0_43 = arith.constant 0 : index
    %c128_44 = arith.constant 128 : index
    %113 = vector.load %arg12[%c5, %c0_43, %c128_44] : memref<8x8x256xf32, #tpu.memory_space<vmem>>, vector<1x8x128xf32>
    %114 = vector.shape_cast %113 : vector<1x8x128xf32> to vector<8x128xf32>
    %115 = arith.addf %112, %114 : vector<8x128xf32>
    %116 = arith.negf %111 : vector<8x128xf32>
    %117 = math.exp %116 : vector<8x128xf32>
    %cst_45 = arith.constant 1.000000e+00 : f32
    %118 = vector.broadcast %cst_45 : f32 to vector<8x128xf32>
    %119 = arith.addf %118, %117 : vector<8x128xf32>
    %120 = arith.divf %118, %119 : vector<8x128xf32>
    %121 = math.tanh %111 : vector<8x128xf32>
    %122 = vector.extract_strided_slice %120 {offsets = [0, 0], sizes = [8, 32], strides = [1, 1]} : vector<8x128xf32> to vector<8x32xf32>
    %123 = vector.extract_strided_slice %120 {offsets = [0, 32], sizes = [8, 32], strides = [1, 1]} : vector<8x128xf32> to vector<8x32xf32>
    %124 = vector.extract_strided_slice %120 {offsets = [0, 96], sizes = [8, 32], strides = [1, 1]} : vector<8x128xf32> to vector<8x32xf32>
    %125 = vector.extract_strided_slice %121 {offsets = [0, 64], sizes = [8, 32], strides = [1, 1]} : vector<8x128xf32> to vector<8x32xf32>
    %126 = arith.mulf %123, %82 : vector<8x32xf32>
    %127 = arith.mulf %122, %125 : vector<8x32xf32>
    %128 = arith.addf %126, %127 : vector<8x32xf32>
    %129 = math.tanh %128 : vector<8x32xf32>
    %130 = arith.mulf %124, %129 : vector<8x32xf32>
    %131 = arith.negf %115 : vector<8x128xf32>
    %132 = math.exp %131 : vector<8x128xf32>
    %cst_46 = arith.constant 1.000000e+00 : f32
    %133 = vector.broadcast %cst_46 : f32 to vector<8x128xf32>
    %134 = arith.addf %133, %132 : vector<8x128xf32>
    %135 = arith.divf %133, %134 : vector<8x128xf32>
    %136 = math.tanh %115 : vector<8x128xf32>
    %137 = vector.extract_strided_slice %135 {offsets = [0, 0], sizes = [8, 32], strides = [1, 1]} : vector<8x128xf32> to vector<8x32xf32>
    %138 = vector.extract_strided_slice %135 {offsets = [0, 32], sizes = [8, 32], strides = [1, 1]} : vector<8x128xf32> to vector<8x32xf32>
    %139 = vector.extract_strided_slice %135 {offsets = [0, 96], sizes = [8, 32], strides = [1, 1]} : vector<8x128xf32> to vector<8x32xf32>
    %140 = vector.extract_strided_slice %136 {offsets = [0, 64], sizes = [8, 32], strides = [1, 1]} : vector<8x128xf32> to vector<8x32xf32>
    %141 = arith.mulf %138, %97 : vector<8x32xf32>
    %142 = arith.mulf %137, %140 : vector<8x32xf32>
    %143 = arith.addf %141, %142 : vector<8x32xf32>
    %144 = math.tanh %143 : vector<8x32xf32>
    %145 = arith.mulf %139, %144 : vector<8x32xf32>
    %c2_47 = arith.constant 2 : index
    %c0_48 = arith.constant 0 : index
    %c0_49 = arith.constant 0 : index
    %146 = vector.load %arg10[%c2_47, %c0_48, %c0_49] : memref<8x8x64xf32, #tpu.memory_space<vmem>>, vector<1x8x32xf32>
    %147 = vector.shape_cast %146 : vector<1x8x32xf32> to vector<8x32xf32>
    %148 = vector.shape_cast %130 : vector<8x32xf32> to vector<1x8x32xf32>
    tpu.vector_store %arg10[%c2_47, %c0_48, %c0_49], %148 {strides = array<i32>} : memref<8x8x64xf32, #tpu.memory_space<vmem>>, vector<1x8x32xf32>,
    %c5_50 = arith.constant 5 : index
    %c0_51 = arith.constant 0 : index
    %c32_52 = arith.constant 32 : index
    %149 = vector.load %arg10[%c5_50, %c0_51, %c32_52] : memref<8x8x64xf32, #tpu.memory_space<vmem>>, vector<1x8x32xf32>
    %150 = vector.shape_cast %149 : vector<1x8x32xf32> to vector<8x32xf32>
    %151 = vector.shape_cast %145 : vector<8x32xf32> to vector<1x8x32xf32>
    tpu.vector_store %arg10[%c5_50, %c0_51, %c32_52], %151 {strides = array<i32>} : memref<8x8x64xf32, #tpu.memory_space<vmem>>, vector<1x8x32xf32>,
    %152 = tpu.concatenate %130, %145 in 1 : vector<8x32xf32>, vector<8x32xf32> -> vector<8x64xf32>
    %cst_53 = arith.constant dense<0.000000e+00> : vector<8x256xf32>
    %153 = tpu.matmul %152, %13, %cst_53 {dimension_numbers = #tpu.dot_dimension_numbers<[1], [0], [0], [1], [0, 0, 1, 1], [], []>} : vector<8x64xf32>, vector<64x256xf32>, vector<8x256xf32> -> vector<8x256xf32>
    %154 = vector.extract_strided_slice %153 {offsets = [0, 0], sizes = [8, 128], strides = [1, 1]} : vector<8x256xf32> to vector<8x128xf32>
    %c3 = arith.constant 3 : index
    %c0_54 = arith.constant 0 : index
    %c0_55 = arith.constant 0 : index
    %155 = vector.load %arg12[%c3, %c0_54, %c0_55] : memref<8x8x256xf32, #tpu.memory_space<vmem>>, vector<1x8x128xf32>
    %156 = vector.shape_cast %155 : vector<1x8x128xf32> to vector<8x128xf32>
    %157 = arith.addf %154, %156 : vector<8x128xf32>
    %158 = vector.extract_strided_slice %153 {offsets = [0, 128], sizes = [8, 128], strides = [1, 1]} : vector<8x256xf32> to vector<8x128xf32>
    %c4 = arith.constant 4 : index
    %c0_56 = arith.constant 0 : index
    %c128_57 = arith.constant 128 : index
    %159 = vector.load %arg12[%c4, %c0_56, %c128_57] : memref<8x8x256xf32, #tpu.memory_space<vmem>>, vector<1x8x128xf32>
    %160 = vector.shape_cast %159 : vector<1x8x128xf32> to vector<8x128xf32>
    %161 = arith.addf %158, %160 : vector<8x128xf32>
    %162 = arith.negf %157 : vector<8x128xf32>
    %163 = math.exp %162 : vector<8x128xf32>
    %cst_58 = arith.constant 1.000000e+00 : f32
    %164 = vector.broadcast %cst_58 : f32 to vector<8x128xf32>
    %165 = arith.addf %164, %163 : vector<8x128xf32>
    %166 = arith.divf %164, %165 : vector<8x128xf32>
    %167 = math.tanh %157 : vector<8x128xf32>
    %168 = vector.extract_strided_slice %166 {offsets = [0, 0], sizes = [8, 32], strides = [1, 1]} : vector<8x128xf32> to vector<8x32xf32>
    %169 = vector.extract_strided_slice %166 {offsets = [0, 32], sizes = [8, 32], strides = [1, 1]} : vector<8x128xf32> to vector<8x32xf32>
    %170 = vector.extract_strided_slice %166 {offsets = [0, 96], sizes = [8, 32], strides = [1, 1]} : vector<8x128xf32> to vector<8x32xf32>
    %171 = vector.extract_strided_slice %167 {offsets = [0, 64], sizes = [8, 32], strides = [1, 1]} : vector<8x128xf32> to vector<8x32xf32>
    %172 = arith.mulf %169, %128 : vector<8x32xf32>
    %173 = arith.mulf %168, %171 : vector<8x32xf32>
    %174 = arith.addf %172, %173 : vector<8x32xf32>
    %175 = math.tanh %174 : vector<8x32xf32>
    %176 = arith.mulf %170, %175 : vector<8x32xf32>
    %177 = arith.negf %161 : vector<8x128xf32>
    %178 = math.exp %177 : vector<8x128xf32>
    %cst_59 = arith.constant 1.000000e+00 : f32
    %179 = vector.broadcast %cst_59 : f32 to vector<8x128xf32>
    %180 = arith.addf %179, %178 : vector<8x128xf32>
    %181 = arith.divf %179, %180 : vector<8x128xf32>
    %182 = math.tanh %161 : vector<8x128xf32>
    %183 = vector.extract_strided_slice %181 {offsets = [0, 0], sizes = [8, 32], strides = [1, 1]} : vector<8x128xf32> to vector<8x32xf32>
    %184 = vector.extract_strided_slice %181 {offsets = [0, 32], sizes = [8, 32], strides = [1, 1]} : vector<8x128xf32> to vector<8x32xf32>
    %185 = vector.extract_strided_slice %181 {offsets = [0, 96], sizes = [8, 32], strides = [1, 1]} : vector<8x128xf32> to vector<8x32xf32>
    %186 = vector.extract_strided_slice %182 {offsets = [0, 64], sizes = [8, 32], strides = [1, 1]} : vector<8x128xf32> to vector<8x32xf32>
    %187 = arith.mulf %184, %143 : vector<8x32xf32>
    %188 = arith.mulf %183, %186 : vector<8x32xf32>
    %189 = arith.addf %187, %188 : vector<8x32xf32>
    %190 = math.tanh %189 : vector<8x32xf32>
    %191 = arith.mulf %185, %190 : vector<8x32xf32>
    %c3_60 = arith.constant 3 : index
    %c0_61 = arith.constant 0 : index
    %c0_62 = arith.constant 0 : index
    %192 = vector.load %arg10[%c3_60, %c0_61, %c0_62] : memref<8x8x64xf32, #tpu.memory_space<vmem>>, vector<1x8x32xf32>
    %193 = vector.shape_cast %192 : vector<1x8x32xf32> to vector<8x32xf32>
    %194 = vector.shape_cast %176 : vector<8x32xf32> to vector<1x8x32xf32>
    tpu.vector_store %arg10[%c3_60, %c0_61, %c0_62], %194 {strides = array<i32>} : memref<8x8x64xf32, #tpu.memory_space<vmem>>, vector<1x8x32xf32>,
    %c4_63 = arith.constant 4 : index
    %c0_64 = arith.constant 0 : index
    %c32_65 = arith.constant 32 : index
    %195 = vector.load %arg10[%c4_63, %c0_64, %c32_65] : memref<8x8x64xf32, #tpu.memory_space<vmem>>, vector<1x8x32xf32>
    %196 = vector.shape_cast %195 : vector<1x8x32xf32> to vector<8x32xf32>
    %197 = vector.shape_cast %191 : vector<8x32xf32> to vector<1x8x32xf32>
    tpu.vector_store %arg10[%c4_63, %c0_64, %c32_65], %197 {strides = array<i32>} : memref<8x8x64xf32, #tpu.memory_space<vmem>>, vector<1x8x32xf32>,
    %198 = tpu.concatenate %176, %191 in 1 : vector<8x32xf32>, vector<8x32xf32> -> vector<8x64xf32>
    %cst_66 = arith.constant dense<0.000000e+00> : vector<8x256xf32>
    %199 = tpu.matmul %198, %13, %cst_66 {dimension_numbers = #tpu.dot_dimension_numbers<[1], [0], [0], [1], [0, 0, 1, 1], [], []>} : vector<8x64xf32>, vector<64x256xf32>, vector<8x256xf32> -> vector<8x256xf32>
    %200 = vector.extract_strided_slice %199 {offsets = [0, 0], sizes = [8, 128], strides = [1, 1]} : vector<8x256xf32> to vector<8x128xf32>
    %c4_67 = arith.constant 4 : index
    %c0_68 = arith.constant 0 : index
    %c0_69 = arith.constant 0 : index
    %201 = vector.load %arg12[%c4_67, %c0_68, %c0_69] : memref<8x8x256xf32, #tpu.memory_space<vmem>>, vector<1x8x128xf32>
    %202 = vector.shape_cast %201 : vector<1x8x128xf32> to vector<8x128xf32>
    %203 = arith.addf %200, %202 : vector<8x128xf32>
    %204 = vector.extract_strided_slice %199 {offsets = [0, 128], sizes = [8, 128], strides = [1, 1]} : vector<8x256xf32> to vector<8x128xf32>
    %c3_70 = arith.constant 3 : index
    %c0_71 = arith.constant 0 : index
    %c128_72 = arith.constant 128 : index
    %205 = vector.load %arg12[%c3_70, %c0_71, %c128_72] : memref<8x8x256xf32, #tpu.memory_space<vmem>>, vector<1x8x128xf32>
    %206 = vector.shape_cast %205 : vector<1x8x128xf32> to vector<8x128xf32>
    %207 = arith.addf %204, %206 : vector<8x128xf32>
    %208 = arith.negf %203 : vector<8x128xf32>
    %209 = math.exp %208 : vector<8x128xf32>
    %cst_73 = arith.constant 1.000000e+00 : f32
    %210 = vector.broadcast %cst_73 : f32 to vector<8x128xf32>
    %211 = arith.addf %210, %209 : vector<8x128xf32>
    %212 = arith.divf %210, %211 : vector<8x128xf32>
    %213 = math.tanh %203 : vector<8x128xf32>
    %214 = vector.extract_strided_slice %212 {offsets = [0, 0], sizes = [8, 32], strides = [1, 1]} : vector<8x128xf32> to vector<8x32xf32>
    %215 = vector.extract_strided_slice %212 {offsets = [0, 32], sizes = [8, 32], strides = [1, 1]} : vector<8x128xf32> to vector<8x32xf32>
    %216 = vector.extract_strided_slice %212 {offsets = [0, 96], sizes = [8, 32], strides = [1, 1]} : vector<8x128xf32> to vector<8x32xf32>
    %217 = vector.extract_strided_slice %213 {offsets = [0, 64], sizes = [8, 32], strides = [1, 1]} : vector<8x128xf32> to vector<8x32xf32>
    %218 = arith.mulf %215, %174 : vector<8x32xf32>
    %219 = arith.mulf %214, %217 : vector<8x32xf32>
    %220 = arith.addf %218, %219 : vector<8x32xf32>
    %221 = math.tanh %220 : vector<8x32xf32>
    %222 = arith.mulf %216, %221 : vector<8x32xf32>
    %223 = arith.negf %207 : vector<8x128xf32>
    %224 = math.exp %223 : vector<8x128xf32>
    %cst_74 = arith.constant 1.000000e+00 : f32
    %225 = vector.broadcast %cst_74 : f32 to vector<8x128xf32>
    %226 = arith.addf %225, %224 : vector<8x128xf32>
    %227 = arith.divf %225, %226 : vector<8x128xf32>
    %228 = math.tanh %207 : vector<8x128xf32>
    %229 = vector.extract_strided_slice %227 {offsets = [0, 0], sizes = [8, 32], strides = [1, 1]} : vector<8x128xf32> to vector<8x32xf32>
    %230 = vector.extract_strided_slice %227 {offsets = [0, 32], sizes = [8, 32], strides = [1, 1]} : vector<8x128xf32> to vector<8x32xf32>
    %231 = vector.extract_strided_slice %227 {offsets = [0, 96], sizes = [8, 32], strides = [1, 1]} : vector<8x128xf32> to vector<8x32xf32>
    %232 = vector.extract_strided_slice %228 {offsets = [0, 64], sizes = [8, 32], strides = [1, 1]} : vector<8x128xf32> to vector<8x32xf32>
    %233 = arith.mulf %230, %189 : vector<8x32xf32>
    %234 = arith.mulf %229, %232 : vector<8x32xf32>
    %235 = arith.addf %233, %234 : vector<8x32xf32>
    %236 = math.tanh %235 : vector<8x32xf32>
    %237 = arith.mulf %231, %236 : vector<8x32xf32>
    %c4_75 = arith.constant 4 : index
    %c0_76 = arith.constant 0 : index
    %c0_77 = arith.constant 0 : index
    %238 = vector.load %arg10[%c4_75, %c0_76, %c0_77] : memref<8x8x64xf32, #tpu.memory_space<vmem>>, vector<1x8x32xf32>
    %239 = vector.shape_cast %238 : vector<1x8x32xf32> to vector<8x32xf32>
    %240 = vector.shape_cast %222 : vector<8x32xf32> to vector<1x8x32xf32>
    tpu.vector_store %arg10[%c4_75, %c0_76, %c0_77], %240 {strides = array<i32>} : memref<8x8x64xf32, #tpu.memory_space<vmem>>, vector<1x8x32xf32>,
    %c3_78 = arith.constant 3 : index
    %c0_79 = arith.constant 0 : index
    %c32_80 = arith.constant 32 : index
    %241 = vector.load %arg10[%c3_78, %c0_79, %c32_80] : memref<8x8x64xf32, #tpu.memory_space<vmem>>, vector<1x8x32xf32>
    %242 = vector.shape_cast %241 : vector<1x8x32xf32> to vector<8x32xf32>
    %243 = vector.shape_cast %237 : vector<8x32xf32> to vector<1x8x32xf32>
    tpu.vector_store %arg10[%c3_78, %c0_79, %c32_80], %243 {strides = array<i32>} : memref<8x8x64xf32, #tpu.memory_space<vmem>>, vector<1x8x32xf32>,
    %244 = tpu.concatenate %222, %237 in 1 : vector<8x32xf32>, vector<8x32xf32> -> vector<8x64xf32>
    %cst_81 = arith.constant dense<0.000000e+00> : vector<8x256xf32>
    %245 = tpu.matmul %244, %13, %cst_81 {dimension_numbers = #tpu.dot_dimension_numbers<[1], [0], [0], [1], [0, 0, 1, 1], [], []>} : vector<8x64xf32>, vector<64x256xf32>, vector<8x256xf32> -> vector<8x256xf32>
    %246 = vector.extract_strided_slice %245 {offsets = [0, 0], sizes = [8, 128], strides = [1, 1]} : vector<8x256xf32> to vector<8x128xf32>
    %c5_82 = arith.constant 5 : index
    %c0_83 = arith.constant 0 : index
    %c0_84 = arith.constant 0 : index
    %247 = vector.load %arg12[%c5_82, %c0_83, %c0_84] : memref<8x8x256xf32, #tpu.memory_space<vmem>>, vector<1x8x128xf32>
    %248 = vector.shape_cast %247 : vector<1x8x128xf32> to vector<8x128xf32>
    %249 = arith.addf %246, %248 : vector<8x128xf32>
    %250 = vector.extract_strided_slice %245 {offsets = [0, 128], sizes = [8, 128], strides = [1, 1]} : vector<8x256xf32> to vector<8x128xf32>
    %c2_85 = arith.constant 2 : index
    %c0_86 = arith.constant 0 : index
    %c128_87 = arith.constant 128 : index
    %251 = vector.load %arg12[%c2_85, %c0_86, %c128_87] : memref<8x8x256xf32, #tpu.memory_space<vmem>>, vector<1x8x128xf32>
    %252 = vector.shape_cast %251 : vector<1x8x128xf32> to vector<8x128xf32>
    %253 = arith.addf %250, %252 : vector<8x128xf32>
    %254 = arith.negf %249 : vector<8x128xf32>
    %255 = math.exp %254 : vector<8x128xf32>
    %cst_88 = arith.constant 1.000000e+00 : f32
    %256 = vector.broadcast %cst_88 : f32 to vector<8x128xf32>
    %257 = arith.addf %256, %255 : vector<8x128xf32>
    %258 = arith.divf %256, %257 : vector<8x128xf32>
    %259 = math.tanh %249 : vector<8x128xf32>
    %260 = vector.extract_strided_slice %258 {offsets = [0, 0], sizes = [8, 32], strides = [1, 1]} : vector<8x128xf32> to vector<8x32xf32>
    %261 = vector.extract_strided_slice %258 {offsets = [0, 32], sizes = [8, 32], strides = [1, 1]} : vector<8x128xf32> to vector<8x32xf32>
    %262 = vector.extract_strided_slice %258 {offsets = [0, 96], sizes = [8, 32], strides = [1, 1]} : vector<8x128xf32> to vector<8x32xf32>
    %263 = vector.extract_strided_slice %259 {offsets = [0, 64], sizes = [8, 32], strides = [1, 1]} : vector<8x128xf32> to vector<8x32xf32>
    %264 = arith.mulf %261, %220 : vector<8x32xf32>
    %265 = arith.mulf %260, %263 : vector<8x32xf32>
    %266 = arith.addf %264, %265 : vector<8x32xf32>
    %267 = math.tanh %266 : vector<8x32xf32>
    %268 = arith.mulf %262, %267 : vector<8x32xf32>
    %269 = arith.negf %253 : vector<8x128xf32>
    %270 = math.exp %269 : vector<8x128xf32>
    %cst_89 = arith.constant 1.000000e+00 : f32
    %271 = vector.broadcast %cst_89 : f32 to vector<8x128xf32>
    %272 = arith.addf %271, %270 : vector<8x128xf32>
    %273 = arith.divf %271, %272 : vector<8x128xf32>
    %274 = math.tanh %253 : vector<8x128xf32>
    %275 = vector.extract_strided_slice %273 {offsets = [0, 0], sizes = [8, 32], strides = [1, 1]} : vector<8x128xf32> to vector<8x32xf32>
    %276 = vector.extract_strided_slice %273 {offsets = [0, 32], sizes = [8, 32], strides = [1, 1]} : vector<8x128xf32> to vector<8x32xf32>
    %277 = vector.extract_strided_slice %273 {offsets = [0, 96], sizes = [8, 32], strides = [1, 1]} : vector<8x128xf32> to vector<8x32xf32>
    %278 = vector.extract_strided_slice %274 {offsets = [0, 64], sizes = [8, 32], strides = [1, 1]} : vector<8x128xf32> to vector<8x32xf32>
    %279 = arith.mulf %276, %235 : vector<8x32xf32>
    %280 = arith.mulf %275, %278 : vector<8x32xf32>
    %281 = arith.addf %279, %280 : vector<8x32xf32>
    %282 = math.tanh %281 : vector<8x32xf32>
    %283 = arith.mulf %277, %282 : vector<8x32xf32>
    %c5_90 = arith.constant 5 : index
    %c0_91 = arith.constant 0 : index
    %c0_92 = arith.constant 0 : index
    %284 = vector.load %arg10[%c5_90, %c0_91, %c0_92] : memref<8x8x64xf32, #tpu.memory_space<vmem>>, vector<1x8x32xf32>
    %285 = vector.shape_cast %284 : vector<1x8x32xf32> to vector<8x32xf32>
    %286 = vector.shape_cast %268 : vector<8x32xf32> to vector<1x8x32xf32>
    tpu.vector_store %arg10[%c5_90, %c0_91, %c0_92], %286 {strides = array<i32>} : memref<8x8x64xf32, #tpu.memory_space<vmem>>, vector<1x8x32xf32>,
    %c2_93 = arith.constant 2 : index
    %c0_94 = arith.constant 0 : index
    %c32_95 = arith.constant 32 : index
    %287 = vector.load %arg10[%c2_93, %c0_94, %c32_95] : memref<8x8x64xf32, #tpu.memory_space<vmem>>, vector<1x8x32xf32>
    %288 = vector.shape_cast %287 : vector<1x8x32xf32> to vector<8x32xf32>
    %289 = vector.shape_cast %283 : vector<8x32xf32> to vector<1x8x32xf32>
    tpu.vector_store %arg10[%c2_93, %c0_94, %c32_95], %289 {strides = array<i32>} : memref<8x8x64xf32, #tpu.memory_space<vmem>>, vector<1x8x32xf32>,
    %290 = tpu.concatenate %268, %283 in 1 : vector<8x32xf32>, vector<8x32xf32> -> vector<8x64xf32>
    %cst_96 = arith.constant dense<0.000000e+00> : vector<8x256xf32>
    %291 = tpu.matmul %290, %13, %cst_96 {dimension_numbers = #tpu.dot_dimension_numbers<[1], [0], [0], [1], [0, 0, 1, 1], [], []>} : vector<8x64xf32>, vector<64x256xf32>, vector<8x256xf32> -> vector<8x256xf32>
    %292 = vector.extract_strided_slice %291 {offsets = [0, 0], sizes = [8, 128], strides = [1, 1]} : vector<8x256xf32> to vector<8x128xf32>
    %c6_97 = arith.constant 6 : index
    %c0_98 = arith.constant 0 : index
    %c0_99 = arith.constant 0 : index
    %293 = vector.load %arg12[%c6_97, %c0_98, %c0_99] : memref<8x8x256xf32, #tpu.memory_space<vmem>>, vector<1x8x128xf32>
    %294 = vector.shape_cast %293 : vector<1x8x128xf32> to vector<8x128xf32>
    %295 = arith.addf %292, %294 : vector<8x128xf32>
    %296 = vector.extract_strided_slice %291 {offsets = [0, 128], sizes = [8, 128], strides = [1, 1]} : vector<8x256xf32> to vector<8x128xf32>
    %c1_100 = arith.constant 1 : index
    %c0_101 = arith.constant 0 : index
    %c128_102 = arith.constant 128 : index
    %297 = vector.load %arg12[%c1_100, %c0_101, %c128_102] : memref<8x8x256xf32, #tpu.memory_space<vmem>>, vector<1x8x128xf32>
    %298 = vector.shape_cast %297 : vector<1x8x128xf32> to vector<8x128xf32>
    %299 = arith.addf %296, %298 : vector<8x128xf32>
    %300 = arith.negf %295 : vector<8x128xf32>
    %301 = math.exp %300 : vector<8x128xf32>
    %cst_103 = arith.constant 1.000000e+00 : f32
    %302 = vector.broadcast %cst_103 : f32 to vector<8x128xf32>
    %303 = arith.addf %302, %301 : vector<8x128xf32>
    %304 = arith.divf %302, %303 : vector<8x128xf32>
    %305 = math.tanh %295 : vector<8x128xf32>
    %306 = vector.extract_strided_slice %304 {offsets = [0, 0], sizes = [8, 32], strides = [1, 1]} : vector<8x128xf32> to vector<8x32xf32>
    %307 = vector.extract_strided_slice %304 {offsets = [0, 32], sizes = [8, 32], strides = [1, 1]} : vector<8x128xf32> to vector<8x32xf32>
    %308 = vector.extract_strided_slice %304 {offsets = [0, 96], sizes = [8, 32], strides = [1, 1]} : vector<8x128xf32> to vector<8x32xf32>
    %309 = vector.extract_strided_slice %305 {offsets = [0, 64], sizes = [8, 32], strides = [1, 1]} : vector<8x128xf32> to vector<8x32xf32>
    %310 = arith.mulf %307, %266 : vector<8x32xf32>
    %311 = arith.mulf %306, %309 : vector<8x32xf32>
    %312 = arith.addf %310, %311 : vector<8x32xf32>
    %313 = math.tanh %312 : vector<8x32xf32>
    %314 = arith.mulf %308, %313 : vector<8x32xf32>
    %315 = arith.negf %299 : vector<8x128xf32>
    %316 = math.exp %315 : vector<8x128xf32>
    %cst_104 = arith.constant 1.000000e+00 : f32
    %317 = vector.broadcast %cst_104 : f32 to vector<8x128xf32>
    %318 = arith.addf %317, %316 : vector<8x128xf32>
    %319 = arith.divf %317, %318 : vector<8x128xf32>
    %320 = math.tanh %299 : vector<8x128xf32>
    %321 = vector.extract_strided_slice %319 {offsets = [0, 0], sizes = [8, 32], strides = [1, 1]} : vector<8x128xf32> to vector<8x32xf32>
    %322 = vector.extract_strided_slice %319 {offsets = [0, 32], sizes = [8, 32], strides = [1, 1]} : vector<8x128xf32> to vector<8x32xf32>
    %323 = vector.extract_strided_slice %319 {offsets = [0, 96], sizes = [8, 32], strides = [1, 1]} : vector<8x128xf32> to vector<8x32xf32>
    %324 = vector.extract_strided_slice %320 {offsets = [0, 64], sizes = [8, 32], strides = [1, 1]} : vector<8x128xf32> to vector<8x32xf32>
    %325 = arith.mulf %322, %281 : vector<8x32xf32>
    %326 = arith.mulf %321, %324 : vector<8x32xf32>
    %327 = arith.addf %325, %326 : vector<8x32xf32>
    %328 = math.tanh %327 : vector<8x32xf32>
    %329 = arith.mulf %323, %328 : vector<8x32xf32>
    %c6_105 = arith.constant 6 : index
    %c0_106 = arith.constant 0 : index
    %c0_107 = arith.constant 0 : index
    %330 = vector.load %arg10[%c6_105, %c0_106, %c0_107] : memref<8x8x64xf32, #tpu.memory_space<vmem>>, vector<1x8x32xf32>
    %331 = vector.shape_cast %330 : vector<1x8x32xf32> to vector<8x32xf32>
    %332 = vector.shape_cast %314 : vector<8x32xf32> to vector<1x8x32xf32>
    tpu.vector_store %arg10[%c6_105, %c0_106, %c0_107], %332 {strides = array<i32>} : memref<8x8x64xf32, #tpu.memory_space<vmem>>, vector<1x8x32xf32>,
    %c1_108 = arith.constant 1 : index
    %c0_109 = arith.constant 0 : index
    %c32_110 = arith.constant 32 : index
    %333 = vector.load %arg10[%c1_108, %c0_109, %c32_110] : memref<8x8x64xf32, #tpu.memory_space<vmem>>, vector<1x8x32xf32>
    %334 = vector.shape_cast %333 : vector<1x8x32xf32> to vector<8x32xf32>
    %335 = vector.shape_cast %329 : vector<8x32xf32> to vector<1x8x32xf32>
    tpu.vector_store %arg10[%c1_108, %c0_109, %c32_110], %335 {strides = array<i32>} : memref<8x8x64xf32, #tpu.memory_space<vmem>>, vector<1x8x32xf32>,
    %336 = tpu.concatenate %314, %329 in 1 : vector<8x32xf32>, vector<8x32xf32> -> vector<8x64xf32>
    %cst_111 = arith.constant dense<0.000000e+00> : vector<8x256xf32>
    %337 = tpu.matmul %336, %13, %cst_111 {dimension_numbers = #tpu.dot_dimension_numbers<[1], [0], [0], [1], [0, 0, 1, 1], [], []>} : vector<8x64xf32>, vector<64x256xf32>, vector<8x256xf32> -> vector<8x256xf32>
    %338 = vector.extract_strided_slice %337 {offsets = [0, 0], sizes = [8, 128], strides = [1, 1]} : vector<8x256xf32> to vector<8x128xf32>
    %c7_112 = arith.constant 7 : index
    %c0_113 = arith.constant 0 : index
    %c0_114 = arith.constant 0 : index
    %339 = vector.load %arg12[%c7_112, %c0_113, %c0_114] : memref<8x8x256xf32, #tpu.memory_space<vmem>>, vector<1x8x128xf32>
    %340 = vector.shape_cast %339 : vector<1x8x128xf32> to vector<8x128xf32>
    %341 = arith.addf %338, %340 : vector<8x128xf32>
    %342 = vector.extract_strided_slice %337 {offsets = [0, 128], sizes = [8, 128], strides = [1, 1]} : vector<8x256xf32> to vector<8x128xf32>
    %c0_115 = arith.constant 0 : index
    %c0_116 = arith.constant 0 : index
    %c128_117 = arith.constant 128 : index
    %343 = vector.load %arg12[%c0_115, %c0_116, %c128_117] : memref<8x8x256xf32, #tpu.memory_space<vmem>>, vector<1x8x128xf32>
    %344 = vector.shape_cast %343 : vector<1x8x128xf32> to vector<8x128xf32>
    %345 = arith.addf %342, %344 : vector<8x128xf32>
    %346 = arith.negf %341 : vector<8x128xf32>
    %347 = math.exp %346 : vector<8x128xf32>
    %cst_118 = arith.constant 1.000000e+00 : f32
    %348 = vector.broadcast %cst_118 : f32 to vector<8x128xf32>
    %349 = arith.addf %348, %347 : vector<8x128xf32>
    %350 = arith.divf %348, %349 : vector<8x128xf32>
    %351 = math.tanh %341 : vector<8x128xf32>
    %352 = vector.extract_strided_slice %350 {offsets = [0, 0], sizes = [8, 32], strides = [1, 1]} : vector<8x128xf32> to vector<8x32xf32>
    %353 = vector.extract_strided_slice %350 {offsets = [0, 32], sizes = [8, 32], strides = [1, 1]} : vector<8x128xf32> to vector<8x32xf32>
    %354 = vector.extract_strided_slice %350 {offsets = [0, 96], sizes = [8, 32], strides = [1, 1]} : vector<8x128xf32> to vector<8x32xf32>
    %355 = vector.extract_strided_slice %351 {offsets = [0, 64], sizes = [8, 32], strides = [1, 1]} : vector<8x128xf32> to vector<8x32xf32>
    %356 = arith.mulf %353, %312 : vector<8x32xf32>
    %357 = arith.mulf %352, %355 : vector<8x32xf32>
    %358 = arith.addf %356, %357 : vector<8x32xf32>
    %359 = math.tanh %358 : vector<8x32xf32>
    %360 = arith.mulf %354, %359 : vector<8x32xf32>
    %361 = arith.negf %345 : vector<8x128xf32>
    %362 = math.exp %361 : vector<8x128xf32>
    %cst_119 = arith.constant 1.000000e+00 : f32
    %363 = vector.broadcast %cst_119 : f32 to vector<8x128xf32>
    %364 = arith.addf %363, %362 : vector<8x128xf32>
    %365 = arith.divf %363, %364 : vector<8x128xf32>
    %366 = math.tanh %345 : vector<8x128xf32>
    %367 = vector.extract_strided_slice %365 {offsets = [0, 0], sizes = [8, 32], strides = [1, 1]} : vector<8x128xf32> to vector<8x32xf32>
    %368 = vector.extract_strided_slice %365 {offsets = [0, 32], sizes = [8, 32], strides = [1, 1]} : vector<8x128xf32> to vector<8x32xf32>
    %369 = vector.extract_strided_slice %365 {offsets = [0, 96], sizes = [8, 32], strides = [1, 1]} : vector<8x128xf32> to vector<8x32xf32>
    %370 = vector.extract_strided_slice %366 {offsets = [0, 64], sizes = [8, 32], strides = [1, 1]} : vector<8x128xf32> to vector<8x32xf32>
    %371 = arith.mulf %368, %327 : vector<8x32xf32>
    %372 = arith.mulf %367, %370 : vector<8x32xf32>
    %373 = arith.addf %371, %372 : vector<8x32xf32>
    %374 = math.tanh %373 : vector<8x32xf32>
    %375 = arith.mulf %369, %374 : vector<8x32xf32>
    %c7_120 = arith.constant 7 : index
    %c0_121 = arith.constant 0 : index
    %c0_122 = arith.constant 0 : index
    %376 = vector.load %arg10[%c7_120, %c0_121, %c0_122] : memref<8x8x64xf32, #tpu.memory_space<vmem>>, vector<1x8x32xf32>
    %377 = vector.shape_cast %376 : vector<1x8x32xf32> to vector<8x32xf32>
    %378 = vector.shape_cast %360 : vector<8x32xf32> to vector<1x8x32xf32>
    tpu.vector_store %arg10[%c7_120, %c0_121, %c0_122], %378 {strides = array<i32>} : memref<8x8x64xf32, #tpu.memory_space<vmem>>, vector<1x8x32xf32>,
    %c0_123 = arith.constant 0 : index
    %c0_124 = arith.constant 0 : index
    %c32_125 = arith.constant 32 : index
    %379 = vector.load %arg10[%c0_123, %c0_124, %c32_125] : memref<8x8x64xf32, #tpu.memory_space<vmem>>, vector<1x8x32xf32>
    %380 = vector.shape_cast %379 : vector<1x8x32xf32> to vector<8x32xf32>
    %381 = vector.shape_cast %375 : vector<8x32xf32> to vector<1x8x32xf32>
    tpu.vector_store %arg10[%c0_123, %c0_124, %c32_125], %381 {strides = array<i32>} : memref<8x8x64xf32, #tpu.memory_space<vmem>>, vector<1x8x32xf32>,
    %c0_126 = arith.constant 0 : index
    %c0_127 = arith.constant 0 : index
    %c0_128 = arith.constant 0 : index
    %382 = vector.load %arg10[%c0_126, %c0_127, %c0_128] : memref<8x8x64xf32, #tpu.memory_space<vmem>>, vector<8x8x64xf32>
    %383 = vector.shape_cast %382 : vector<8x8x64xf32> to vector<64x64xf32>
    %c0_129 = arith.constant 0 : index
    %c0_130 = arith.constant 0 : index
    %384 = vector.load %arg4[%c0_129, %c0_130] : memref<64x256xf32, #tpu.memory_space<vmem>>, vector<64x256xf32>
    %cst_131 = arith.constant dense<0.000000e+00> : vector<64x256xf32>
    %385 = tpu.matmul %383, %384, %cst_131 {dimension_numbers = #tpu.dot_dimension_numbers<[1], [0], [0], [1], [0, 0, 1, 1], [], []>} : vector<64x64xf32>, vector<64x256xf32>, vector<64x256xf32> -> vector<64x256xf32>
    %c0_132 = arith.constant 0 : index
    %c0_133 = arith.constant 0 : index
    %386 = vector.load %arg6[%c0_132, %c0_133] : memref<1x256xf32, #tpu.memory_space<vmem>>, vector<1x256xf32>
    %387 = vector.broadcast %386 : vector<1x256xf32> to vector<64x256xf32>
    %388 = arith.addf %385, %387 : vector<64x256xf32>
    %389 = vector.shape_cast %388 : vector<64x256xf32> to vector<8x8x256xf32>
    %c0_134 = arith.constant 0 : index
    %c0_135 = arith.constant 0 : index
    %c0_136 = arith.constant 0 : index
    %390 = vector.load %arg12[%c0_134, %c0_135, %c0_136] : memref<8x8x256xf32, #tpu.memory_space<vmem>>, vector<8x8x256xf32>
    tpu.vector_store %arg12[%c0_134, %c0_135, %c0_136], %389 {strides = array<i32>} : memref<8x8x256xf32, #tpu.memory_space<vmem>>, vector<8x8x256xf32>,
    %cst_137 = arith.constant 0.000000e+00 : f32
    %391 = vector.broadcast %cst_137 : f32 to vector<8x32xf32>
    %cst_138 = arith.constant 0.000000e+00 : f32
    %392 = vector.broadcast %cst_138 : f32 to vector<8x32xf32>
    %cst_139 = arith.constant 0.000000e+00 : f32
    %393 = vector.broadcast %cst_139 : f32 to vector<8x32xf32>
    %cst_140 = arith.constant 0.000000e+00 : f32
    %394 = vector.broadcast %cst_140 : f32 to vector<8x32xf32>
    %c0_141 = arith.constant 0 : index
    %c0_142 = arith.constant 0 : index
    %395 = vector.load %arg5[%c0_141, %c0_142] : memref<64x256xf32, #tpu.memory_space<vmem>>, vector<64x256xf32>
    %396 = tpu.concatenate %391, %393 in 1 : vector<8x32xf32>, vector<8x32xf32> -> vector<8x64xf32>
    %cst_143 = arith.constant dense<0.000000e+00> : vector<8x256xf32>
    %397 = tpu.matmul %396, %395, %cst_143 {dimension_numbers = #tpu.dot_dimension_numbers<[1], [0], [0], [1], [0, 0, 1, 1], [], []>} : vector<8x64xf32>, vector<64x256xf32>, vector<8x256xf32> -> vector<8x256xf32>
    %398 = vector.extract_strided_slice %397 {offsets = [0, 0], sizes = [8, 128], strides = [1, 1]} : vector<8x256xf32> to vector<8x128xf32>
    %c0_144 = arith.constant 0 : index
    %c0_145 = arith.constant 0 : index
    %c0_146 = arith.constant 0 : index
    %399 = vector.load %arg12[%c0_144, %c0_145, %c0_146] : memref<8x8x256xf32, #tpu.memory_space<vmem>>, vector<1x8x128xf32>
    %400 = vector.shape_cast %399 : vector<1x8x128xf32> to vector<8x128xf32>
    %401 = arith.addf %398, %400 : vector<8x128xf32>
    %402 = vector.extract_strided_slice %397 {offsets = [0, 128], sizes = [8, 128], strides = [1, 1]} : vector<8x256xf32> to vector<8x128xf32>
    %c7_147 = arith.constant 7 : index
    %c0_148 = arith.constant 0 : index
    %c128_149 = arith.constant 128 : index
    %403 = vector.load %arg12[%c7_147, %c0_148, %c128_149] : memref<8x8x256xf32, #tpu.memory_space<vmem>>, vector<1x8x128xf32>
    %404 = vector.shape_cast %403 : vector<1x8x128xf32> to vector<8x128xf32>
    %405 = arith.addf %402, %404 : vector<8x128xf32>
    %406 = arith.negf %401 : vector<8x128xf32>
    %407 = math.exp %406 : vector<8x128xf32>
    %cst_150 = arith.constant 1.000000e+00 : f32
    %408 = vector.broadcast %cst_150 : f32 to vector<8x128xf32>
    %409 = arith.addf %408, %407 : vector<8x128xf32>
    %410 = arith.divf %408, %409 : vector<8x128xf32>
    %411 = math.tanh %401 : vector<8x128xf32>
    %412 = vector.extract_strided_slice %410 {offsets = [0, 0], sizes = [8, 32], strides = [1, 1]} : vector<8x128xf32> to vector<8x32xf32>
    %413 = vector.extract_strided_slice %410 {offsets = [0, 32], sizes = [8, 32], strides = [1, 1]} : vector<8x128xf32> to vector<8x32xf32>
    %414 = vector.extract_strided_slice %410 {offsets = [0, 96], sizes = [8, 32], strides = [1, 1]} : vector<8x128xf32> to vector<8x32xf32>
    %415 = vector.extract_strided_slice %411 {offsets = [0, 64], sizes = [8, 32], strides = [1, 1]} : vector<8x128xf32> to vector<8x32xf32>
    %416 = arith.mulf %413, %392 : vector<8x32xf32>
    %417 = arith.mulf %412, %415 : vector<8x32xf32>
    %418 = arith.addf %416, %417 : vector<8x32xf32>
    %419 = math.tanh %418 : vector<8x32xf32>
    %420 = arith.mulf %414, %419 : vector<8x32xf32>
    %421 = arith.negf %405 : vector<8x128xf32>
    %422 = math.exp %421 : vector<8x128xf32>
    %cst_151 = arith.constant 1.000000e+00 : f32
    %423 = vector.broadcast %cst_151 : f32 to vector<8x128xf32>
    %424 = arith.addf %423, %422 : vector<8x128xf32>
    %425 = arith.divf %423, %424 : vector<8x128xf32>
    %426 = math.tanh %405 : vector<8x128xf32>
    %427 = vector.extract_strided_slice %425 {offsets = [0, 0], sizes = [8, 32], strides = [1, 1]} : vector<8x128xf32> to vector<8x32xf32>
    %428 = vector.extract_strided_slice %425 {offsets = [0, 32], sizes = [8, 32], strides = [1, 1]} : vector<8x128xf32> to vector<8x32xf32>
    %429 = vector.extract_strided_slice %425 {offsets = [0, 96], sizes = [8, 32], strides = [1, 1]} : vector<8x128xf32> to vector<8x32xf32>
    %430 = vector.extract_strided_slice %426 {offsets = [0, 64], sizes = [8, 32], strides = [1, 1]} : vector<8x128xf32> to vector<8x32xf32>
    %431 = arith.mulf %428, %394 : vector<8x32xf32>
    %432 = arith.mulf %427, %430 : vector<8x32xf32>
    %433 = arith.addf %431, %432 : vector<8x32xf32>
    %434 = math.tanh %433 : vector<8x32xf32>
    %435 = arith.mulf %429, %434 : vector<8x32xf32>
    %c0_152 = arith.constant 0 : index
    %c0_153 = arith.constant 0 : index
    %c0_154 = arith.constant 0 : index
    %436 = vector.load %arg11[%c0_152, %c0_153, %c0_154] : memref<8x8x64xf32, #tpu.memory_space<vmem>>, vector<1x8x32xf32>
    %437 = vector.shape_cast %436 : vector<1x8x32xf32> to vector<8x32xf32>
    %438 = vector.shape_cast %420 : vector<8x32xf32> to vector<1x8x32xf32>
    tpu.vector_store %arg11[%c0_152, %c0_153, %c0_154], %438 {strides = array<i32>} : memref<8x8x64xf32, #tpu.memory_space<vmem>>, vector<1x8x32xf32>,
    %c7_155 = arith.constant 7 : index
    %c0_156 = arith.constant 0 : index
    %c32_157 = arith.constant 32 : index
    %439 = vector.load %arg11[%c7_155, %c0_156, %c32_157] : memref<8x8x64xf32, #tpu.memory_space<vmem>>, vector<1x8x32xf32>
    %440 = vector.shape_cast %439 : vector<1x8x32xf32> to vector<8x32xf32>
    %441 = vector.shape_cast %435 : vector<8x32xf32> to vector<1x8x32xf32>
    tpu.vector_store %arg11[%c7_155, %c0_156, %c32_157], %441 {strides = array<i32>} : memref<8x8x64xf32, #tpu.memory_space<vmem>>, vector<1x8x32xf32>,
    %442 = tpu.concatenate %420, %435 in 1 : vector<8x32xf32>, vector<8x32xf32> -> vector<8x64xf32>
    %cst_158 = arith.constant dense<0.000000e+00> : vector<8x256xf32>
    %443 = tpu.matmul %442, %395, %cst_158 {dimension_numbers = #tpu.dot_dimension_numbers<[1], [0], [0], [1], [0, 0, 1, 1], [], []>} : vector<8x64xf32>, vector<64x256xf32>, vector<8x256xf32> -> vector<8x256xf32>
    %444 = vector.extract_strided_slice %443 {offsets = [0, 0], sizes = [8, 128], strides = [1, 1]} : vector<8x256xf32> to vector<8x128xf32>
    %c1_159 = arith.constant 1 : index
    %c0_160 = arith.constant 0 : index
    %c0_161 = arith.constant 0 : index
    %445 = vector.load %arg12[%c1_159, %c0_160, %c0_161] : memref<8x8x256xf32, #tpu.memory_space<vmem>>, vector<1x8x128xf32>
    %446 = vector.shape_cast %445 : vector<1x8x128xf32> to vector<8x128xf32>
    %447 = arith.addf %444, %446 : vector<8x128xf32>
    %448 = vector.extract_strided_slice %443 {offsets = [0, 128], sizes = [8, 128], strides = [1, 1]} : vector<8x256xf32> to vector<8x128xf32>
    %c6_162 = arith.constant 6 : index
    %c0_163 = arith.constant 0 : index
    %c128_164 = arith.constant 128 : index
    %449 = vector.load %arg12[%c6_162, %c0_163, %c128_164] : memref<8x8x256xf32, #tpu.memory_space<vmem>>, vector<1x8x128xf32>
    %450 = vector.shape_cast %449 : vector<1x8x128xf32> to vector<8x128xf32>
    %451 = arith.addf %448, %450 : vector<8x128xf32>
    %452 = arith.negf %447 : vector<8x128xf32>
    %453 = math.exp %452 : vector<8x128xf32>
    %cst_165 = arith.constant 1.000000e+00 : f32
    %454 = vector.broadcast %cst_165 : f32 to vector<8x128xf32>
    %455 = arith.addf %454, %453 : vector<8x128xf32>
    %456 = arith.divf %454, %455 : vector<8x128xf32>
    %457 = math.tanh %447 : vector<8x128xf32>
    %458 = vector.extract_strided_slice %456 {offsets = [0, 0], sizes = [8, 32], strides = [1, 1]} : vector<8x128xf32> to vector<8x32xf32>
    %459 = vector.extract_strided_slice %456 {offsets = [0, 32], sizes = [8, 32], strides = [1, 1]} : vector<8x128xf32> to vector<8x32xf32>
    %460 = vector.extract_strided_slice %456 {offsets = [0, 96], sizes = [8, 32], strides = [1, 1]} : vector<8x128xf32> to vector<8x32xf32>
    %461 = vector.extract_strided_slice %457 {offsets = [0, 64], sizes = [8, 32], strides = [1, 1]} : vector<8x128xf32> to vector<8x32xf32>
    %462 = arith.mulf %459, %418 : vector<8x32xf32>
    %463 = arith.mulf %458, %461 : vector<8x32xf32>
    %464 = arith.addf %462, %463 : vector<8x32xf32>
    %465 = math.tanh %464 : vector<8x32xf32>
    %466 = arith.mulf %460, %465 : vector<8x32xf32>
    %467 = arith.negf %451 : vector<8x128xf32>
    %468 = math.exp %467 : vector<8x128xf32>
    %cst_166 = arith.constant 1.000000e+00 : f32
    %469 = vector.broadcast %cst_166 : f32 to vector<8x128xf32>
    %470 = arith.addf %469, %468 : vector<8x128xf32>
    %471 = arith.divf %469, %470 : vector<8x128xf32>
    %472 = math.tanh %451 : vector<8x128xf32>
    %473 = vector.extract_strided_slice %471 {offsets = [0, 0], sizes = [8, 32], strides = [1, 1]} : vector<8x128xf32> to vector<8x32xf32>
    %474 = vector.extract_strided_slice %471 {offsets = [0, 32], sizes = [8, 32], strides = [1, 1]} : vector<8x128xf32> to vector<8x32xf32>
    %475 = vector.extract_strided_slice %471 {offsets = [0, 96], sizes = [8, 32], strides = [1, 1]} : vector<8x128xf32> to vector<8x32xf32>
    %476 = vector.extract_strided_slice %472 {offsets = [0, 64], sizes = [8, 32], strides = [1, 1]} : vector<8x128xf32> to vector<8x32xf32>
    %477 = arith.mulf %474, %433 : vector<8x32xf32>
    %478 = arith.mulf %473, %476 : vector<8x32xf32>
    %479 = arith.addf %477, %478 : vector<8x32xf32>
    %480 = math.tanh %479 : vector<8x32xf32>
    %481 = arith.mulf %475, %480 : vector<8x32xf32>
    %c1_167 = arith.constant 1 : index
    %c0_168 = arith.constant 0 : index
    %c0_169 = arith.constant 0 : index
    %482 = vector.load %arg11[%c1_167, %c0_168, %c0_169] : memref<8x8x64xf32, #tpu.memory_space<vmem>>, vector<1x8x32xf32>
    %483 = vector.shape_cast %482 : vector<1x8x32xf32> to vector<8x32xf32>
    %484 = vector.shape_cast %466 : vector<8x32xf32> to vector<1x8x32xf32>
    tpu.vector_store %arg11[%c1_167, %c0_168, %c0_169], %484 {strides = array<i32>} : memref<8x8x64xf32, #tpu.memory_space<vmem>>, vector<1x8x32xf32>,
    %c6_170 = arith.constant 6 : index
    %c0_171 = arith.constant 0 : index
    %c32_172 = arith.constant 32 : index
    %485 = vector.load %arg11[%c6_170, %c0_171, %c32_172] : memref<8x8x64xf32, #tpu.memory_space<vmem>>, vector<1x8x32xf32>
    %486 = vector.shape_cast %485 : vector<1x8x32xf32> to vector<8x32xf32>
    %487 = vector.shape_cast %481 : vector<8x32xf32> to vector<1x8x32xf32>
    tpu.vector_store %arg11[%c6_170, %c0_171, %c32_172], %487 {strides = array<i32>} : memref<8x8x64xf32, #tpu.memory_space<vmem>>, vector<1x8x32xf32>,
    %488 = tpu.concatenate %466, %481 in 1 : vector<8x32xf32>, vector<8x32xf32> -> vector<8x64xf32>
    %cst_173 = arith.constant dense<0.000000e+00> : vector<8x256xf32>
    %489 = tpu.matmul %488, %395, %cst_173 {dimension_numbers = #tpu.dot_dimension_numbers<[1], [0], [0], [1], [0, 0, 1, 1], [], []>} : vector<8x64xf32>, vector<64x256xf32>, vector<8x256xf32> -> vector<8x256xf32>
    %490 = vector.extract_strided_slice %489 {offsets = [0, 0], sizes = [8, 128], strides = [1, 1]} : vector<8x256xf32> to vector<8x128xf32>
    %c2_174 = arith.constant 2 : index
    %c0_175 = arith.constant 0 : index
    %c0_176 = arith.constant 0 : index
    %491 = vector.load %arg12[%c2_174, %c0_175, %c0_176] : memref<8x8x256xf32, #tpu.memory_space<vmem>>, vector<1x8x128xf32>
    %492 = vector.shape_cast %491 : vector<1x8x128xf32> to vector<8x128xf32>
    %493 = arith.addf %490, %492 : vector<8x128xf32>
    %494 = vector.extract_strided_slice %489 {offsets = [0, 128], sizes = [8, 128], strides = [1, 1]} : vector<8x256xf32> to vector<8x128xf32>
    %c5_177 = arith.constant 5 : index
    %c0_178 = arith.constant 0 : index
    %c128_179 = arith.constant 128 : index
    %495 = vector.load %arg12[%c5_177, %c0_178, %c128_179] : memref<8x8x256xf32, #tpu.memory_space<vmem>>, vector<1x8x128xf32>
    %496 = vector.shape_cast %495 : vector<1x8x128xf32> to vector<8x128xf32>
    %497 = arith.addf %494, %496 : vector<8x128xf32>
    %498 = arith.negf %493 : vector<8x128xf32>
    %499 = math.exp %498 : vector<8x128xf32>
    %cst_180 = arith.constant 1.000000e+00 : f32
    %500 = vector.broadcast %cst_180 : f32 to vector<8x128xf32>
    %501 = arith.addf %500, %499 : vector<8x128xf32>
    %502 = arith.divf %500, %501 : vector<8x128xf32>
    %503 = math.tanh %493 : vector<8x128xf32>
    %504 = vector.extract_strided_slice %502 {offsets = [0, 0], sizes = [8, 32], strides = [1, 1]} : vector<8x128xf32> to vector<8x32xf32>
    %505 = vector.extract_strided_slice %502 {offsets = [0, 32], sizes = [8, 32], strides = [1, 1]} : vector<8x128xf32> to vector<8x32xf32>
    %506 = vector.extract_strided_slice %502 {offsets = [0, 96], sizes = [8, 32], strides = [1, 1]} : vector<8x128xf32> to vector<8x32xf32>
    %507 = vector.extract_strided_slice %503 {offsets = [0, 64], sizes = [8, 32], strides = [1, 1]} : vector<8x128xf32> to vector<8x32xf32>
    %508 = arith.mulf %505, %464 : vector<8x32xf32>
    %509 = arith.mulf %504, %507 : vector<8x32xf32>
    %510 = arith.addf %508, %509 : vector<8x32xf32>
    %511 = math.tanh %510 : vector<8x32xf32>
    %512 = arith.mulf %506, %511 : vector<8x32xf32>
    %513 = arith.negf %497 : vector<8x128xf32>
    %514 = math.exp %513 : vector<8x128xf32>
    %cst_181 = arith.constant 1.000000e+00 : f32
    %515 = vector.broadcast %cst_181 : f32 to vector<8x128xf32>
    %516 = arith.addf %515, %514 : vector<8x128xf32>
    %517 = arith.divf %515, %516 : vector<8x128xf32>
    %518 = math.tanh %497 : vector<8x128xf32>
    %519 = vector.extract_strided_slice %517 {offsets = [0, 0], sizes = [8, 32], strides = [1, 1]} : vector<8x128xf32> to vector<8x32xf32>
    %520 = vector.extract_strided_slice %517 {offsets = [0, 32], sizes = [8, 32], strides = [1, 1]} : vector<8x128xf32> to vector<8x32xf32>
    %521 = vector.extract_strided_slice %517 {offsets = [0, 96], sizes = [8, 32], strides = [1, 1]} : vector<8x128xf32> to vector<8x32xf32>
    %522 = vector.extract_strided_slice %518 {offsets = [0, 64], sizes = [8, 32], strides = [1, 1]} : vector<8x128xf32> to vector<8x32xf32>
    %523 = arith.mulf %520, %479 : vector<8x32xf32>
    %524 = arith.mulf %519, %522 : vector<8x32xf32>
    %525 = arith.addf %523, %524 : vector<8x32xf32>
    %526 = math.tanh %525 : vector<8x32xf32>
    %527 = arith.mulf %521, %526 : vector<8x32xf32>
    %c2_182 = arith.constant 2 : index
    %c0_183 = arith.constant 0 : index
    %c0_184 = arith.constant 0 : index
    %528 = vector.load %arg11[%c2_182, %c0_183, %c0_184] : memref<8x8x64xf32, #tpu.memory_space<vmem>>, vector<1x8x32xf32>
    %529 = vector.shape_cast %528 : vector<1x8x32xf32> to vector<8x32xf32>
    %530 = vector.shape_cast %512 : vector<8x32xf32> to vector<1x8x32xf32>
    tpu.vector_store %arg11[%c2_182, %c0_183, %c0_184], %530 {strides = array<i32>} : memref<8x8x64xf32, #tpu.memory_space<vmem>>, vector<1x8x32xf32>,
    %c5_185 = arith.constant 5 : index
    %c0_186 = arith.constant 0 : index
    %c32_187 = arith.constant 32 : index
    %531 = vector.load %arg11[%c5_185, %c0_186, %c32_187] : memref<8x8x64xf32, #tpu.memory_space<vmem>>, vector<1x8x32xf32>
    %532 = vector.shape_cast %531 : vector<1x8x32xf32> to vector<8x32xf32>
    %533 = vector.shape_cast %527 : vector<8x32xf32> to vector<1x8x32xf32>
    tpu.vector_store %arg11[%c5_185, %c0_186, %c32_187], %533 {strides = array<i32>} : memref<8x8x64xf32, #tpu.memory_space<vmem>>, vector<1x8x32xf32>,
    %534 = tpu.concatenate %512, %527 in 1 : vector<8x32xf32>, vector<8x32xf32> -> vector<8x64xf32>
    %cst_188 = arith.constant dense<0.000000e+00> : vector<8x256xf32>
    %535 = tpu.matmul %534, %395, %cst_188 {dimension_numbers = #tpu.dot_dimension_numbers<[1], [0], [0], [1], [0, 0, 1, 1], [], []>} : vector<8x64xf32>, vector<64x256xf32>, vector<8x256xf32> -> vector<8x256xf32>
    %536 = vector.extract_strided_slice %535 {offsets = [0, 0], sizes = [8, 128], strides = [1, 1]} : vector<8x256xf32> to vector<8x128xf32>
    %c3_189 = arith.constant 3 : index
    %c0_190 = arith.constant 0 : index
    %c0_191 = arith.constant 0 : index
    %537 = vector.load %arg12[%c3_189, %c0_190, %c0_191] : memref<8x8x256xf32, #tpu.memory_space<vmem>>, vector<1x8x128xf32>
    %538 = vector.shape_cast %537 : vector<1x8x128xf32> to vector<8x128xf32>
    %539 = arith.addf %536, %538 : vector<8x128xf32>
    %540 = vector.extract_strided_slice %535 {offsets = [0, 128], sizes = [8, 128], strides = [1, 1]} : vector<8x256xf32> to vector<8x128xf32>
    %c4_192 = arith.constant 4 : index
    %c0_193 = arith.constant 0 : index
    %c128_194 = arith.constant 128 : index
    %541 = vector.load %arg12[%c4_192, %c0_193, %c128_194] : memref<8x8x256xf32, #tpu.memory_space<vmem>>, vector<1x8x128xf32>
    %542 = vector.shape_cast %541 : vector<1x8x128xf32> to vector<8x128xf32>
    %543 = arith.addf %540, %542 : vector<8x128xf32>
    %544 = arith.negf %539 : vector<8x128xf32>
    %545 = math.exp %544 : vector<8x128xf32>
    %cst_195 = arith.constant 1.000000e+00 : f32
    %546 = vector.broadcast %cst_195 : f32 to vector<8x128xf32>
    %547 = arith.addf %546, %545 : vector<8x128xf32>
    %548 = arith.divf %546, %547 : vector<8x128xf32>
    %549 = math.tanh %539 : vector<8x128xf32>
    %550 = vector.extract_strided_slice %548 {offsets = [0, 0], sizes = [8, 32], strides = [1, 1]} : vector<8x128xf32> to vector<8x32xf32>
    %551 = vector.extract_strided_slice %548 {offsets = [0, 32], sizes = [8, 32], strides = [1, 1]} : vector<8x128xf32> to vector<8x32xf32>
    %552 = vector.extract_strided_slice %548 {offsets = [0, 96], sizes = [8, 32], strides = [1, 1]} : vector<8x128xf32> to vector<8x32xf32>
    %553 = vector.extract_strided_slice %549 {offsets = [0, 64], sizes = [8, 32], strides = [1, 1]} : vector<8x128xf32> to vector<8x32xf32>
    %554 = arith.mulf %551, %510 : vector<8x32xf32>
    %555 = arith.mulf %550, %553 : vector<8x32xf32>
    %556 = arith.addf %554, %555 : vector<8x32xf32>
    %557 = math.tanh %556 : vector<8x32xf32>
    %558 = arith.mulf %552, %557 : vector<8x32xf32>
    %559 = arith.negf %543 : vector<8x128xf32>
    %560 = math.exp %559 : vector<8x128xf32>
    %cst_196 = arith.constant 1.000000e+00 : f32
    %561 = vector.broadcast %cst_196 : f32 to vector<8x128xf32>
    %562 = arith.addf %561, %560 : vector<8x128xf32>
    %563 = arith.divf %561, %562 : vector<8x128xf32>
    %564 = math.tanh %543 : vector<8x128xf32>
    %565 = vector.extract_strided_slice %563 {offsets = [0, 0], sizes = [8, 32], strides = [1, 1]} : vector<8x128xf32> to vector<8x32xf32>
    %566 = vector.extract_strided_slice %563 {offsets = [0, 32], sizes = [8, 32], strides = [1, 1]} : vector<8x128xf32> to vector<8x32xf32>
    %567 = vector.extract_strided_slice %563 {offsets = [0, 96], sizes = [8, 32], strides = [1, 1]} : vector<8x128xf32> to vector<8x32xf32>
    %568 = vector.extract_strided_slice %564 {offsets = [0, 64], sizes = [8, 32], strides = [1, 1]} : vector<8x128xf32> to vector<8x32xf32>
    %569 = arith.mulf %566, %525 : vector<8x32xf32>
    %570 = arith.mulf %565, %568 : vector<8x32xf32>
    %571 = arith.addf %569, %570 : vector<8x32xf32>
    %572 = math.tanh %571 : vector<8x32xf32>
    %573 = arith.mulf %567, %572 : vector<8x32xf32>
    %c3_197 = arith.constant 3 : index
    %c0_198 = arith.constant 0 : index
    %c0_199 = arith.constant 0 : index
    %574 = vector.load %arg11[%c3_197, %c0_198, %c0_199] : memref<8x8x64xf32, #tpu.memory_space<vmem>>, vector<1x8x32xf32>
    %575 = vector.shape_cast %574 : vector<1x8x32xf32> to vector<8x32xf32>
    %576 = vector.shape_cast %558 : vector<8x32xf32> to vector<1x8x32xf32>
    tpu.vector_store %arg11[%c3_197, %c0_198, %c0_199], %576 {strides = array<i32>} : memref<8x8x64xf32, #tpu.memory_space<vmem>>, vector<1x8x32xf32>,
    %c4_200 = arith.constant 4 : index
    %c0_201 = arith.constant 0 : index
    %c32_202 = arith.constant 32 : index
    %577 = vector.load %arg11[%c4_200, %c0_201, %c32_202] : memref<8x8x64xf32, #tpu.memory_space<vmem>>, vector<1x8x32xf32>
    %578 = vector.shape_cast %577 : vector<1x8x32xf32> to vector<8x32xf32>
    %579 = vector.shape_cast %573 : vector<8x32xf32> to vector<1x8x32xf32>
    tpu.vector_store %arg11[%c4_200, %c0_201, %c32_202], %579 {strides = array<i32>} : memref<8x8x64xf32, #tpu.memory_space<vmem>>, vector<1x8x32xf32>,
    %580 = tpu.concatenate %558, %573 in 1 : vector<8x32xf32>, vector<8x32xf32> -> vector<8x64xf32>
    %cst_203 = arith.constant dense<0.000000e+00> : vector<8x256xf32>
    %581 = tpu.matmul %580, %395, %cst_203 {dimension_numbers = #tpu.dot_dimension_numbers<[1], [0], [0], [1], [0, 0, 1, 1], [], []>} : vector<8x64xf32>, vector<64x256xf32>, vector<8x256xf32> -> vector<8x256xf32>
    %582 = vector.extract_strided_slice %581 {offsets = [0, 0], sizes = [8, 128], strides = [1, 1]} : vector<8x256xf32> to vector<8x128xf32>
    %c4_204 = arith.constant 4 : index
    %c0_205 = arith.constant 0 : index
    %c0_206 = arith.constant 0 : index
    %583 = vector.load %arg12[%c4_204, %c0_205, %c0_206] : memref<8x8x256xf32, #tpu.memory_space<vmem>>, vector<1x8x128xf32>
    %584 = vector.shape_cast %583 : vector<1x8x128xf32> to vector<8x128xf32>
    %585 = arith.addf %582, %584 : vector<8x128xf32>
    %586 = vector.extract_strided_slice %581 {offsets = [0, 128], sizes = [8, 128], strides = [1, 1]} : vector<8x256xf32> to vector<8x128xf32>
    %c3_207 = arith.constant 3 : index
    %c0_208 = arith.constant 0 : index
    %c128_209 = arith.constant 128 : index
    %587 = vector.load %arg12[%c3_207, %c0_208, %c128_209] : memref<8x8x256xf32, #tpu.memory_space<vmem>>, vector<1x8x128xf32>
    %588 = vector.shape_cast %587 : vector<1x8x128xf32> to vector<8x128xf32>
    %589 = arith.addf %586, %588 : vector<8x128xf32>
    %590 = arith.negf %585 : vector<8x128xf32>
    %591 = math.exp %590 : vector<8x128xf32>
    %cst_210 = arith.constant 1.000000e+00 : f32
    %592 = vector.broadcast %cst_210 : f32 to vector<8x128xf32>
    %593 = arith.addf %592, %591 : vector<8x128xf32>
    %594 = arith.divf %592, %593 : vector<8x128xf32>
    %595 = math.tanh %585 : vector<8x128xf32>
    %596 = vector.extract_strided_slice %594 {offsets = [0, 0], sizes = [8, 32], strides = [1, 1]} : vector<8x128xf32> to vector<8x32xf32>
    %597 = vector.extract_strided_slice %594 {offsets = [0, 32], sizes = [8, 32], strides = [1, 1]} : vector<8x128xf32> to vector<8x32xf32>
    %598 = vector.extract_strided_slice %594 {offsets = [0, 96], sizes = [8, 32], strides = [1, 1]} : vector<8x128xf32> to vector<8x32xf32>
    %599 = vector.extract_strided_slice %595 {offsets = [0, 64], sizes = [8, 32], strides = [1, 1]} : vector<8x128xf32> to vector<8x32xf32>
    %600 = arith.mulf %597, %556 : vector<8x32xf32>
    %601 = arith.mulf %596, %599 : vector<8x32xf32>
    %602 = arith.addf %600, %601 : vector<8x32xf32>
    %603 = math.tanh %602 : vector<8x32xf32>
    %604 = arith.mulf %598, %603 : vector<8x32xf32>
    %605 = arith.negf %589 : vector<8x128xf32>
    %606 = math.exp %605 : vector<8x128xf32>
    %cst_211 = arith.constant 1.000000e+00 : f32
    %607 = vector.broadcast %cst_211 : f32 to vector<8x128xf32>
    %608 = arith.addf %607, %606 : vector<8x128xf32>
    %609 = arith.divf %607, %608 : vector<8x128xf32>
    %610 = math.tanh %589 : vector<8x128xf32>
    %611 = vector.extract_strided_slice %609 {offsets = [0, 0], sizes = [8, 32], strides = [1, 1]} : vector<8x128xf32> to vector<8x32xf32>
    %612 = vector.extract_strided_slice %609 {offsets = [0, 32], sizes = [8, 32], strides = [1, 1]} : vector<8x128xf32> to vector<8x32xf32>
    %613 = vector.extract_strided_slice %609 {offsets = [0, 96], sizes = [8, 32], strides = [1, 1]} : vector<8x128xf32> to vector<8x32xf32>
    %614 = vector.extract_strided_slice %610 {offsets = [0, 64], sizes = [8, 32], strides = [1, 1]} : vector<8x128xf32> to vector<8x32xf32>
    %615 = arith.mulf %612, %571 : vector<8x32xf32>
    %616 = arith.mulf %611, %614 : vector<8x32xf32>
    %617 = arith.addf %615, %616 : vector<8x32xf32>
    %618 = math.tanh %617 : vector<8x32xf32>
    %619 = arith.mulf %613, %618 : vector<8x32xf32>
    %c4_212 = arith.constant 4 : index
    %c0_213 = arith.constant 0 : index
    %c0_214 = arith.constant 0 : index
    %620 = vector.load %arg11[%c4_212, %c0_213, %c0_214] : memref<8x8x64xf32, #tpu.memory_space<vmem>>, vector<1x8x32xf32>
    %621 = vector.shape_cast %620 : vector<1x8x32xf32> to vector<8x32xf32>
    %622 = vector.shape_cast %604 : vector<8x32xf32> to vector<1x8x32xf32>
    tpu.vector_store %arg11[%c4_212, %c0_213, %c0_214], %622 {strides = array<i32>} : memref<8x8x64xf32, #tpu.memory_space<vmem>>, vector<1x8x32xf32>,
    %c3_215 = arith.constant 3 : index
    %c0_216 = arith.constant 0 : index
    %c32_217 = arith.constant 32 : index
    %623 = vector.load %arg11[%c3_215, %c0_216, %c32_217] : memref<8x8x64xf32, #tpu.memory_space<vmem>>, vector<1x8x32xf32>
    %624 = vector.shape_cast %623 : vector<1x8x32xf32> to vector<8x32xf32>
    %625 = vector.shape_cast %619 : vector<8x32xf32> to vector<1x8x32xf32>
    tpu.vector_store %arg11[%c3_215, %c0_216, %c32_217], %625 {strides = array<i32>} : memref<8x8x64xf32, #tpu.memory_space<vmem>>, vector<1x8x32xf32>,
    %626 = tpu.concatenate %604, %619 in 1 : vector<8x32xf32>, vector<8x32xf32> -> vector<8x64xf32>
    %cst_218 = arith.constant dense<0.000000e+00> : vector<8x256xf32>
    %627 = tpu.matmul %626, %395, %cst_218 {dimension_numbers = #tpu.dot_dimension_numbers<[1], [0], [0], [1], [0, 0, 1, 1], [], []>} : vector<8x64xf32>, vector<64x256xf32>, vector<8x256xf32> -> vector<8x256xf32>
    %628 = vector.extract_strided_slice %627 {offsets = [0, 0], sizes = [8, 128], strides = [1, 1]} : vector<8x256xf32> to vector<8x128xf32>
    %c5_219 = arith.constant 5 : index
    %c0_220 = arith.constant 0 : index
    %c0_221 = arith.constant 0 : index
    %629 = vector.load %arg12[%c5_219, %c0_220, %c0_221] : memref<8x8x256xf32, #tpu.memory_space<vmem>>, vector<1x8x128xf32>
    %630 = vector.shape_cast %629 : vector<1x8x128xf32> to vector<8x128xf32>
    %631 = arith.addf %628, %630 : vector<8x128xf32>
    %632 = vector.extract_strided_slice %627 {offsets = [0, 128], sizes = [8, 128], strides = [1, 1]} : vector<8x256xf32> to vector<8x128xf32>
    %c2_222 = arith.constant 2 : index
    %c0_223 = arith.constant 0 : index
    %c128_224 = arith.constant 128 : index
    %633 = vector.load %arg12[%c2_222, %c0_223, %c128_224] : memref<8x8x256xf32, #tpu.memory_space<vmem>>, vector<1x8x128xf32>
    %634 = vector.shape_cast %633 : vector<1x8x128xf32> to vector<8x128xf32>
    %635 = arith.addf %632, %634 : vector<8x128xf32>
    %636 = arith.negf %631 : vector<8x128xf32>
    %637 = math.exp %636 : vector<8x128xf32>
    %cst_225 = arith.constant 1.000000e+00 : f32
    %638 = vector.broadcast %cst_225 : f32 to vector<8x128xf32>
    %639 = arith.addf %638, %637 : vector<8x128xf32>
    %640 = arith.divf %638, %639 : vector<8x128xf32>
    %641 = math.tanh %631 : vector<8x128xf32>
    %642 = vector.extract_strided_slice %640 {offsets = [0, 0], sizes = [8, 32], strides = [1, 1]} : vector<8x128xf32> to vector<8x32xf32>
    %643 = vector.extract_strided_slice %640 {offsets = [0, 32], sizes = [8, 32], strides = [1, 1]} : vector<8x128xf32> to vector<8x32xf32>
    %644 = vector.extract_strided_slice %640 {offsets = [0, 96], sizes = [8, 32], strides = [1, 1]} : vector<8x128xf32> to vector<8x32xf32>
    %645 = vector.extract_strided_slice %641 {offsets = [0, 64], sizes = [8, 32], strides = [1, 1]} : vector<8x128xf32> to vector<8x32xf32>
    %646 = arith.mulf %643, %602 : vector<8x32xf32>
    %647 = arith.mulf %642, %645 : vector<8x32xf32>
    %648 = arith.addf %646, %647 : vector<8x32xf32>
    %649 = math.tanh %648 : vector<8x32xf32>
    %650 = arith.mulf %644, %649 : vector<8x32xf32>
    %651 = arith.negf %635 : vector<8x128xf32>
    %652 = math.exp %651 : vector<8x128xf32>
    %cst_226 = arith.constant 1.000000e+00 : f32
    %653 = vector.broadcast %cst_226 : f32 to vector<8x128xf32>
    %654 = arith.addf %653, %652 : vector<8x128xf32>
    %655 = arith.divf %653, %654 : vector<8x128xf32>
    %656 = math.tanh %635 : vector<8x128xf32>
    %657 = vector.extract_strided_slice %655 {offsets = [0, 0], sizes = [8, 32], strides = [1, 1]} : vector<8x128xf32> to vector<8x32xf32>
    %658 = vector.extract_strided_slice %655 {offsets = [0, 32], sizes = [8, 32], strides = [1, 1]} : vector<8x128xf32> to vector<8x32xf32>
    %659 = vector.extract_strided_slice %655 {offsets = [0, 96], sizes = [8, 32], strides = [1, 1]} : vector<8x128xf32> to vector<8x32xf32>
    %660 = vector.extract_strided_slice %656 {offsets = [0, 64], sizes = [8, 32], strides = [1, 1]} : vector<8x128xf32> to vector<8x32xf32>
    %661 = arith.mulf %658, %617 : vector<8x32xf32>
    %662 = arith.mulf %657, %660 : vector<8x32xf32>
    %663 = arith.addf %661, %662 : vector<8x32xf32>
    %664 = math.tanh %663 : vector<8x32xf32>
    %665 = arith.mulf %659, %664 : vector<8x32xf32>
    %c5_227 = arith.constant 5 : index
    %c0_228 = arith.constant 0 : index
    %c0_229 = arith.constant 0 : index
    %666 = vector.load %arg11[%c5_227, %c0_228, %c0_229] : memref<8x8x64xf32, #tpu.memory_space<vmem>>, vector<1x8x32xf32>
    %667 = vector.shape_cast %666 : vector<1x8x32xf32> to vector<8x32xf32>
    %668 = vector.shape_cast %650 : vector<8x32xf32> to vector<1x8x32xf32>
    tpu.vector_store %arg11[%c5_227, %c0_228, %c0_229], %668 {strides = array<i32>} : memref<8x8x64xf32, #tpu.memory_space<vmem>>, vector<1x8x32xf32>,
    %c2_230 = arith.constant 2 : index
    %c0_231 = arith.constant 0 : index
    %c32_232 = arith.constant 32 : index
    %669 = vector.load %arg11[%c2_230, %c0_231, %c32_232] : memref<8x8x64xf32, #tpu.memory_space<vmem>>, vector<1x8x32xf32>
    %670 = vector.shape_cast %669 : vector<1x8x32xf32> to vector<8x32xf32>
    %671 = vector.shape_cast %665 : vector<8x32xf32> to vector<1x8x32xf32>
    tpu.vector_store %arg11[%c2_230, %c0_231, %c32_232], %671 {strides = array<i32>} : memref<8x8x64xf32, #tpu.memory_space<vmem>>, vector<1x8x32xf32>,
    %672 = tpu.concatenate %650, %665 in 1 : vector<8x32xf32>, vector<8x32xf32> -> vector<8x64xf32>
    %cst_233 = arith.constant dense<0.000000e+00> : vector<8x256xf32>
    %673 = tpu.matmul %672, %395, %cst_233 {dimension_numbers = #tpu.dot_dimension_numbers<[1], [0], [0], [1], [0, 0, 1, 1], [], []>} : vector<8x64xf32>, vector<64x256xf32>, vector<8x256xf32> -> vector<8x256xf32>
    %674 = vector.extract_strided_slice %673 {offsets = [0, 0], sizes = [8, 128], strides = [1, 1]} : vector<8x256xf32> to vector<8x128xf32>
    %c6_234 = arith.constant 6 : index
    %c0_235 = arith.constant 0 : index
    %c0_236 = arith.constant 0 : index
    %675 = vector.load %arg12[%c6_234, %c0_235, %c0_236] : memref<8x8x256xf32, #tpu.memory_space<vmem>>, vector<1x8x128xf32>
    %676 = vector.shape_cast %675 : vector<1x8x128xf32> to vector<8x128xf32>
    %677 = arith.addf %674, %676 : vector<8x128xf32>
    %678 = vector.extract_strided_slice %673 {offsets = [0, 128], sizes = [8, 128], strides = [1, 1]} : vector<8x256xf32> to vector<8x128xf32>
    %c1_237 = arith.constant 1 : index
    %c0_238 = arith.constant 0 : index
    %c128_239 = arith.constant 128 : index
    %679 = vector.load %arg12[%c1_237, %c0_238, %c128_239] : memref<8x8x256xf32, #tpu.memory_space<vmem>>, vector<1x8x128xf32>
    %680 = vector.shape_cast %679 : vector<1x8x128xf32> to vector<8x128xf32>
    %681 = arith.addf %678, %680 : vector<8x128xf32>
    %682 = arith.negf %677 : vector<8x128xf32>
    %683 = math.exp %682 : vector<8x128xf32>
    %cst_240 = arith.constant 1.000000e+00 : f32
    %684 = vector.broadcast %cst_240 : f32 to vector<8x128xf32>
    %685 = arith.addf %684, %683 : vector<8x128xf32>
    %686 = arith.divf %684, %685 : vector<8x128xf32>
    %687 = math.tanh %677 : vector<8x128xf32>
    %688 = vector.extract_strided_slice %686 {offsets = [0, 0], sizes = [8, 32], strides = [1, 1]} : vector<8x128xf32> to vector<8x32xf32>
    %689 = vector.extract_strided_slice %686 {offsets = [0, 32], sizes = [8, 32], strides = [1, 1]} : vector<8x128xf32> to vector<8x32xf32>
    %690 = vector.extract_strided_slice %686 {offsets = [0, 96], sizes = [8, 32], strides = [1, 1]} : vector<8x128xf32> to vector<8x32xf32>
    %691 = vector.extract_strided_slice %687 {offsets = [0, 64], sizes = [8, 32], strides = [1, 1]} : vector<8x128xf32> to vector<8x32xf32>
    %692 = arith.mulf %689, %648 : vector<8x32xf32>
    %693 = arith.mulf %688, %691 : vector<8x32xf32>
    %694 = arith.addf %692, %693 : vector<8x32xf32>
    %695 = math.tanh %694 : vector<8x32xf32>
    %696 = arith.mulf %690, %695 : vector<8x32xf32>
    %697 = arith.negf %681 : vector<8x128xf32>
    %698 = math.exp %697 : vector<8x128xf32>
    %cst_241 = arith.constant 1.000000e+00 : f32
    %699 = vector.broadcast %cst_241 : f32 to vector<8x128xf32>
    %700 = arith.addf %699, %698 : vector<8x128xf32>
    %701 = arith.divf %699, %700 : vector<8x128xf32>
    %702 = math.tanh %681 : vector<8x128xf32>
    %703 = vector.extract_strided_slice %701 {offsets = [0, 0], sizes = [8, 32], strides = [1, 1]} : vector<8x128xf32> to vector<8x32xf32>
    %704 = vector.extract_strided_slice %701 {offsets = [0, 32], sizes = [8, 32], strides = [1, 1]} : vector<8x128xf32> to vector<8x32xf32>
    %705 = vector.extract_strided_slice %701 {offsets = [0, 96], sizes = [8, 32], strides = [1, 1]} : vector<8x128xf32> to vector<8x32xf32>
    %706 = vector.extract_strided_slice %702 {offsets = [0, 64], sizes = [8, 32], strides = [1, 1]} : vector<8x128xf32> to vector<8x32xf32>
    %707 = arith.mulf %704, %663 : vector<8x32xf32>
    %708 = arith.mulf %703, %706 : vector<8x32xf32>
    %709 = arith.addf %707, %708 : vector<8x32xf32>
    %710 = math.tanh %709 : vector<8x32xf32>
    %711 = arith.mulf %705, %710 : vector<8x32xf32>
    %c6_242 = arith.constant 6 : index
    %c0_243 = arith.constant 0 : index
    %c0_244 = arith.constant 0 : index
    %712 = vector.load %arg11[%c6_242, %c0_243, %c0_244] : memref<8x8x64xf32, #tpu.memory_space<vmem>>, vector<1x8x32xf32>
    %713 = vector.shape_cast %712 : vector<1x8x32xf32> to vector<8x32xf32>
    %714 = vector.shape_cast %696 : vector<8x32xf32> to vector<1x8x32xf32>
    tpu.vector_store %arg11[%c6_242, %c0_243, %c0_244], %714 {strides = array<i32>} : memref<8x8x64xf32, #tpu.memory_space<vmem>>, vector<1x8x32xf32>,
    %c1_245 = arith.constant 1 : index
    %c0_246 = arith.constant 0 : index
    %c32_247 = arith.constant 32 : index
    %715 = vector.load %arg11[%c1_245, %c0_246, %c32_247] : memref<8x8x64xf32, #tpu.memory_space<vmem>>, vector<1x8x32xf32>
    %716 = vector.shape_cast %715 : vector<1x8x32xf32> to vector<8x32xf32>
    %717 = vector.shape_cast %711 : vector<8x32xf32> to vector<1x8x32xf32>
    tpu.vector_store %arg11[%c1_245, %c0_246, %c32_247], %717 {strides = array<i32>} : memref<8x8x64xf32, #tpu.memory_space<vmem>>, vector<1x8x32xf32>,
    %718 = tpu.concatenate %696, %711 in 1 : vector<8x32xf32>, vector<8x32xf32> -> vector<8x64xf32>
    %cst_248 = arith.constant dense<0.000000e+00> : vector<8x256xf32>
    %719 = tpu.matmul %718, %395, %cst_248 {dimension_numbers = #tpu.dot_dimension_numbers<[1], [0], [0], [1], [0, 0, 1, 1], [], []>} : vector<8x64xf32>, vector<64x256xf32>, vector<8x256xf32> -> vector<8x256xf32>
    %720 = vector.extract_strided_slice %719 {offsets = [0, 0], sizes = [8, 128], strides = [1, 1]} : vector<8x256xf32> to vector<8x128xf32>
    %c7_249 = arith.constant 7 : index
    %c0_250 = arith.constant 0 : index
    %c0_251 = arith.constant 0 : index
    %721 = vector.load %arg12[%c7_249, %c0_250, %c0_251] : memref<8x8x256xf32, #tpu.memory_space<vmem>>, vector<1x8x128xf32>
    %722 = vector.shape_cast %721 : vector<1x8x128xf32> to vector<8x128xf32>
    %723 = arith.addf %720, %722 : vector<8x128xf32>
    %724 = vector.extract_strided_slice %719 {offsets = [0, 128], sizes = [8, 128], strides = [1, 1]} : vector<8x256xf32> to vector<8x128xf32>
    %c0_252 = arith.constant 0 : index
    %c0_253 = arith.constant 0 : index
    %c128_254 = arith.constant 128 : index
    %725 = vector.load %arg12[%c0_252, %c0_253, %c128_254] : memref<8x8x256xf32, #tpu.memory_space<vmem>>, vector<1x8x128xf32>
    %726 = vector.shape_cast %725 : vector<1x8x128xf32> to vector<8x128xf32>
    %727 = arith.addf %724, %726 : vector<8x128xf32>
    %728 = arith.negf %723 : vector<8x128xf32>
    %729 = math.exp %728 : vector<8x128xf32>
    %cst_255 = arith.constant 1.000000e+00 : f32
    %730 = vector.broadcast %cst_255 : f32 to vector<8x128xf32>
    %731 = arith.addf %730, %729 : vector<8x128xf32>
    %732 = arith.divf %730, %731 : vector<8x128xf32>
    %733 = math.tanh %723 : vector<8x128xf32>
    %734 = vector.extract_strided_slice %732 {offsets = [0, 0], sizes = [8, 32], strides = [1, 1]} : vector<8x128xf32> to vector<8x32xf32>
    %735 = vector.extract_strided_slice %732 {offsets = [0, 32], sizes = [8, 32], strides = [1, 1]} : vector<8x128xf32> to vector<8x32xf32>
    %736 = vector.extract_strided_slice %732 {offsets = [0, 96], sizes = [8, 32], strides = [1, 1]} : vector<8x128xf32> to vector<8x32xf32>
    %737 = vector.extract_strided_slice %733 {offsets = [0, 64], sizes = [8, 32], strides = [1, 1]} : vector<8x128xf32> to vector<8x32xf32>
    %738 = arith.mulf %735, %694 : vector<8x32xf32>
    %739 = arith.mulf %734, %737 : vector<8x32xf32>
    %740 = arith.addf %738, %739 : vector<8x32xf32>
    %741 = math.tanh %740 : vector<8x32xf32>
    %742 = arith.mulf %736, %741 : vector<8x32xf32>
    %743 = arith.negf %727 : vector<8x128xf32>
    %744 = math.exp %743 : vector<8x128xf32>
    %cst_256 = arith.constant 1.000000e+00 : f32
    %745 = vector.broadcast %cst_256 : f32 to vector<8x128xf32>
    %746 = arith.addf %745, %744 : vector<8x128xf32>
    %747 = arith.divf %745, %746 : vector<8x128xf32>
    %748 = math.tanh %727 : vector<8x128xf32>
    %749 = vector.extract_strided_slice %747 {offsets = [0, 0], sizes = [8, 32], strides = [1, 1]} : vector<8x128xf32> to vector<8x32xf32>
    %750 = vector.extract_strided_slice %747 {offsets = [0, 32], sizes = [8, 32], strides = [1, 1]} : vector<8x128xf32> to vector<8x32xf32>
    %751 = vector.extract_strided_slice %747 {offsets = [0, 96], sizes = [8, 32], strides = [1, 1]} : vector<8x128xf32> to vector<8x32xf32>
    %752 = vector.extract_strided_slice %748 {offsets = [0, 64], sizes = [8, 32], strides = [1, 1]} : vector<8x128xf32> to vector<8x32xf32>
    %753 = arith.mulf %750, %709 : vector<8x32xf32>
    %754 = arith.mulf %749, %752 : vector<8x32xf32>
    %755 = arith.addf %753, %754 : vector<8x32xf32>
    %756 = math.tanh %755 : vector<8x32xf32>
    %757 = arith.mulf %751, %756 : vector<8x32xf32>
    %c7_257 = arith.constant 7 : index
    %c0_258 = arith.constant 0 : index
    %c0_259 = arith.constant 0 : index
    %758 = vector.load %arg11[%c7_257, %c0_258, %c0_259] : memref<8x8x64xf32, #tpu.memory_space<vmem>>, vector<1x8x32xf32>
    %759 = vector.shape_cast %758 : vector<1x8x32xf32> to vector<8x32xf32>
    %760 = vector.shape_cast %742 : vector<8x32xf32> to vector<1x8x32xf32>
    tpu.vector_store %arg11[%c7_257, %c0_258, %c0_259], %760 {strides = array<i32>} : memref<8x8x64xf32, #tpu.memory_space<vmem>>, vector<1x8x32xf32>,
    %c0_260 = arith.constant 0 : index
    %c0_261 = arith.constant 0 : index
    %c32_262 = arith.constant 32 : index
    %761 = vector.load %arg11[%c0_260, %c0_261, %c32_262] : memref<8x8x64xf32, #tpu.memory_space<vmem>>, vector<1x8x32xf32>
    %762 = vector.shape_cast %761 : vector<1x8x32xf32> to vector<8x32xf32>
    %763 = vector.shape_cast %757 : vector<8x32xf32> to vector<1x8x32xf32>
    tpu.vector_store %arg11[%c0_260, %c0_261, %c32_262], %763 {strides = array<i32>} : memref<8x8x64xf32, #tpu.memory_space<vmem>>, vector<1x8x32xf32>,
    %c7_263 = arith.constant 7 : index
    %c0_264 = arith.constant 0 : index
    %c0_265 = arith.constant 0 : index
    %764 = vector.load %arg11[%c7_263, %c0_264, %c0_265] : memref<8x8x64xf32, #tpu.memory_space<vmem>>, vector<1x8x64xf32>
    %765 = vector.shape_cast %764 : vector<1x8x64xf32> to vector<8x64xf32>
    %c0_266 = arith.constant 0 : index
    %c0_267 = arith.constant 0 : index
    %766 = vector.load %arg7[%c0_266, %c0_267] : memref<1x64xf32, #tpu.memory_space<vmem>>, vector<1x64xf32>
    %767 = vector.broadcast %766 : vector<1x64xf32> to vector<8x64xf32>
    %768 = arith.mulf %765, %767 : vector<8x64xf32>
    %cst_268 = arith.constant dense<0.000000e+00> : vector<8xf32>
    %769 = vector.multi_reduction <add>, %768, %cst_268 [1] : vector<8x64xf32> to vector<8xf32>
    %770 = vector.shape_cast %769 : vector<8xf32> to vector<8x1xf32>
    %c0_269 = arith.constant 0 : index
    %c0_270 = arith.constant 0 : index
    %771 = vector.load %arg8[%c0_269, %c0_270] : memref<1x1xf32, #tpu.memory_space<vmem>>, vector<1x1xf32>
    %772 = vector.broadcast %771 : vector<1x1xf32> to vector<8x1xf32>
    %773 = arith.addf %770, %772 : vector<8x1xf32>
    %c0_271 = arith.constant 0 : index
    %c0_272 = arith.constant 0 : index
    %774 = vector.load %arg9[%c0_271, %c0_272] : memref<8x1xf32, #tpu.memory_space<vmem>>, vector<8x1xf32>
    tpu.vector_store %arg9[%c0_271, %c0_272], %773 {strides = array<i32>} : memref<8x1xf32, #tpu.memory_space<vmem>>, vector<8x1xf32>,
    return
  }
}

</mosaic_0001>

<bundles_post_ra>
// kernel: _forward_impl.1
= control target key start
LH: loop header
LB: loop body
LE: loop exit
PB: predicated region body
PF: predicated region fallthrough
CT: control target
= control target key end

     0   :  { %s3860_s0 = inlined_call_operand.vmem [shape: f32[8,8,16], index: 0, kind: input, shape index: {}]   ;;  %s3861_s1 = inlined_call_operand.vmem [shape: f32[16,256], index: 1, kind: input, shape index: {}]   ;;  %s3862_s2 = inlined_call_operand.hbm [shape: f32[64,256], index: 2, kind: input, shape index: {}]   ;;  %s3863_s3 = inlined_call_operand.vmem [shape: f32[1,256], index: 3, kind: input, shape index: {}]   ;;  %s3864_s4 = inlined_call_operand.hbm [shape: f32[64,256], index: 4, kind: input, shape index: {}]   ;;  %s3865_s5 = inlined_call_operand.hbm [shape: f32[64,256], index: 5, kind: input, shape index: {}]   ;;  %s3866_s6 = inlined_call_operand.vmem [shape: f32[1,256], index: 6, kind: input, shape index: {}]   ;;  %s3867_s7 = inlined_call_operand.vmem [shape: f32[1,64], index: 7, kind: input, shape index: {}]   ;;  %s3868_s8 = inlined_call_operand.<no memory space> [shape: f32[1,1], index: 8, kind: input, shape index: {}]   ;;  %s3869_s9 = inlined_call_operand.vmem [shape: f32[8,1], index: 9, kind: output, shape index: {}]  }
   0x1   :  { %v14_v0 = vstv %s3868_s8 }
   0x2   :  { %15 = vst [vmem:[#allocation5] sm:$0x1] %v14_v0 }
   0x3   :  { %16 = vsyncpa [#allocation7], 0 }
   0x4   :  { %17 = vsyncpa [#allocation9], 0  ;;  %s41_s13 = sshll.u32 %s3864_s4, 4  ;;  %s2993_s14 = smov [#allocation8]   ;;  %s42_s13 = int_to_ptr.hbm [resolvable:$true] %s41_s13 }
   0x5   :  { %s43_s15 = sshll.u32 %s2993_s14, 4  ;;  %s26_s18 = sshll.u32 %s3862_s2, 4  ;;  %s44_s15 = int_to_ptr.vmem [resolvable:$true] %s43_s15  ;;  %s27_s18 = int_to_ptr.hbm [resolvable:$true] %s26_s18 }
   0x6   :  { %s2994_s19 = smov 256   ;;  %s2995_s20 = smov 16  }
   0x7   :  { %49 = dma.hbm_to_vmem [thread:$0]  %s42_s13, 2048, %s44_s15, [#allocation9], %s2994_s19, %s2994_s19, %s2995_s20  }
   0x8   :  { %s2996_s8 = smov [#allocation6]   ;;  %s54_s24 = sshll.u32 %s3865_s5, 4  ;;  %s55_s24 = int_to_ptr.hbm [resolvable:$true] %s54_s24 }
   0x9   :  { %s28_s21 = sshll.u32 %s2996_s8, 4  ;;  %s2997_s4 = smov [#allocation10]   ;;  %s29_s21 = int_to_ptr.vmem [resolvable:$true] %s28_s21 }
   0xa   :  { %34 = dma.hbm_to_vmem [thread:$0]  %s27_s18, 2048, %s29_s21, [#allocation7], %s2994_s19, %s2994_s19, %s2995_s20  }
   0xb   :  { %s56_s25 = sshll.u32 %s2997_s4, 4  ;;  %s57_s25 = int_to_ptr.vmem [resolvable:$true] %s56_s25 }
   0xc   :  { %62 = dma.hbm_to_vmem [thread:$0]  %s55_s24, 2048, %s57_s25, [#allocation9], %s2994_s19, %s2994_s19, %s2995_s20  }
   0xd   :  { %2989 = dma.done.wait [#allocation7], 2048  }
   0xe   :  { %2990 = vsyncadd [#allocation7], 4294965248 }
   0xf   :  { %2991 = dma.done.wait [#allocation9], 4096  }
  0x10   :  { %2992 = vsyncadd [#allocation9], 4294963200  ;;  %v92_v1 = vld [vmem:[%s3861_s1 + $0x18] sm:$0xff]  ;;  %v90_v3 = vld [vmem:[%s3861_s1 + $0x8] sm:$0xff]  ;;  %vm99_vm0 = vcmask 130048   ;;  %v2998_v20 = vmov 0.0  }
  0x11   :  { %v3066_v2 = vld [vmem:[#allocation6 + $0x70] sm:$0xff]  ;;  %179 = vmatpush.msra.mxu1 %v92_v1  ;;  %v3072_v4 = vld [vmem:[#allocation6 + $0x60] sm:$0xff]  ;;  %v3090_v10 = vld [vmem:[#allocation6 + $0x78] sm:$0xff]  ;;  %vm365_vm9 = vcmask 261120   ;;  %vm372_vm10 = vcmask 523520   ;;  %vm238_vm11 = vcmask 523264  }
  0x12   :  { %250 = vmatpush.msra.mxu2 %v3066_v2  ;;  %v81_v5 = vld [vmem:[%s3860_s0] sm:$0xff]  ;;  %v3077_v6 = vld [vmem:[#allocation6 + $0x50] sm:$0xff]  ;;  %270 = vmatpush.msra.mxu3 %v3090_v10  ;;  %v3095_v12 = vld [vmem:[#allocation6 + $0x68] sm:$0xff] }
  0x13   :  { %180 = vmatpush.msra.mxu1 %v90_v3  ;;  %v3081_v7 = vld [vmem:[#allocation6 + $0x40] sm:$0xff]  ;;  %v91_v8 = vld [vmem:[%s3861_s1 + $0x10] sm:$0xff]  ;;  %v3115_v17 = vld [vmem:[#allocation6 + $0x58] sm:$0xff] }
  0x14   :  { %251 = vmatpush.msra.mxu2 %v3072_v4  ;;  %2567 = vmatmul.msk.f32.vlgmr.msra.gmra.mxu1 %vm99_vm0, %v81_v5  ;;  %v89_v9 = vld [vmem:[%s3861_s1] sm:$0xff]  ;;  %v3092_v11 = vld [vmem:[#allocation6 + $0x30] sm:$0xff]  ;;  %v82_v14 = vld [vmem:[%s3860_s0 + $0x8] sm:$0xff] }
  0x15   :  { %138 = vmatpush.msra.mxu0 %v91_v8  ;;  %814 = vmatpush.msrb.mxu1 %v3090_v10  ;;  %v3099_v13 = vld [vmem:[#allocation6 + $0x20] sm:$0xff]  ;;  %v3108_v15 = vld [vmem:[#allocation6 + $0x10] sm:$0xff]  ;;  %v3117_v18 = vld [vmem:[#allocation6 + $0x48] sm:$0xff] }
  0x16   :  { %252 = vmatpush.msra.mxu2 %v3077_v6  ;;  %271 = vmatpush.msra.mxu3 %v3095_v12  ;;  %v3113_v16 = vld [vmem:[#allocation6] sm:$0xff]  ;;  %v3122_v19 = vld [vmem:[#allocation6 + $0x38] sm:$0xff]  ;;  %v3129_v21 = vld [vmem:[#allocation6 + $0x28] sm:$0xff] }
  0x17   :  { %139 = vmatpush.msra.mxu0 %v89_v9  ;;  %815 = vmatpush.msrb.mxu1 %v3095_v12  ;;  %v83_v22 = vld [vmem:[%s3860_s0 + $0x10] sm:$0xff]  ;;  %v3142_v23 = vld [vmem:[#allocation6 + $0x18] sm:$0xff]  ;;  %v86_v27 = vld [vmem:[%s3860_s0 + $0x28] sm:$0xff] }
  0x18   :  { %253 = vmatpush.msra.mxu2 %v3081_v7  ;;  %2559 = vmatmul.msk.f32.vlgmr.msra.gmra.mxu0 %vm99_vm0, %v81_v5  ;;  %v3144_v24 = vld [vmem:[#allocation6 + $0x8] sm:$0xff]  ;;  %v84_v25 = vld [vmem:[%s3860_s0 + $0x18] sm:$0xff]  ;;  %v85_v26 = vld [vmem:[%s3860_s0 + $0x20] sm:$0xff] }
  0x19   :  { %794 = vmatpush.msrb.mxu0 %v3066_v2  ;;  %272 = vmatpush.msra.mxu3 %v3115_v17  ;;  %v87_v28 = vld [vmem:[%s3860_s0 + $0x30] sm:$0xff]  ;;  %v88_v29 = vld [vmem:[%s3860_s0 + $0x38] sm:$0xff]  ;;  %v93_v30 = vld [vmem:[%s3863_s3] sm:$0x3]  ;;  %s2999_s0 = smov 64   ;;  %s3000_s3 = smov 32  }
  0x1a   :  { %254 = vmatpush.msra.mxu2 %v3092_v11  ;;  %816 = vmatpush.msrb.mxu1 %v3115_v17  ;;  %v96_v31 = vperm.slane %v93_v30, 1  ;;  %v3236_v36 = vperm.slane %v93_v30, 0 }
  0x1b   :  { %795 = vmatpush.msrb.mxu0 %v3072_v4  ;;  %273 = vmatpush.msra.mxu3 %v3117_v18 }
  0x1c   :  { %255 = vmatpush.msra.mxu2 %v3099_v13  ;;  %2568 = vmatmul.msk.f32.gmra.mxu1 %vm99_vm0, %v82_v14 }
  0x1d   :  { %796 = vmatpush.msrb.mxu0 %v3077_v6  ;;  %274 = vmatpush.msra.mxu3 %v3122_v19 }
  0x1e   :  { %256 = vmatpush.msra.mxu2 %v3108_v15  ;;  %817 = vmatpush.msrb.mxu1 %v3117_v18 }
  0x1f   :  { %797 = vmatpush.msrb.mxu0 %v3081_v7  ;;  %275 = vmatpush.msra.mxu3 %v3129_v21 }
  0x20   :  { %257 = vmatpush.msra.mxu2 %v3113_v16  ;;  %2560 = vmatmul.msk.f32.gmra.mxu0 %vm99_vm0, %v82_v14 }
  0x21   :  { %258 = vmatmul.f32.vlgmr.msra.gmra.mxu2 %v2998_v20  ;;  %798 = vmatpush.msrb.mxu0 %v3092_v11 }
  0x22   :  { %386 = vmatpush.msrb.mxu2 %v3066_v2  ;;  %276 = vmatpush.msra.mxu3 %v3142_v23 }
  0x23   :  { %818 = vmatpush.msrb.mxu1 %v3122_v19  ;;  %799 = vmatpush.msrb.mxu0 %v3099_v13 }
  0x24   :  { %387 = vmatpush.msrb.mxu2 %v3072_v4  ;;  %2569 = vmatmul.msk.f32.gmra.mxu1 %vm99_vm0, %v83_v22 }
  0x25   :  { %277 = vmatpush.msra.mxu3 %v3144_v24  ;;  %819 = vmatpush.msrb.mxu1 %v3129_v21 }
  0x26   :  { %388 = vmatpush.msrb.mxu2 %v3077_v6  ;;  %278 = vmatmul.f32.vlgmr.msra.gmra.mxu3 %v2998_v20 }
  0x27   :  { %406 = vmatpush.msrb.mxu3 %v3090_v10  ;;  %800 = vmatpush.msrb.mxu0 %v3108_v15 }
  0x28   :  { %389 = vmatpush.msrb.mxu2 %v3081_v7  ;;  %2561 = vmatmul.msk.f32.gmra.mxu0 %vm99_vm0, %v83_v22 }
  0x29   :  { %407 = vmatpush.msrb.mxu3 %v3095_v12  ;;  %801 = vmatpush.msrb.mxu0 %v3113_v16 }
  0x2a   :  { %390 = vmatpush.msrb.mxu2 %v3092_v11  ;;  %820 = vmatpush.msrb.mxu1 %v3142_v23 }
  0x2b   :  { %408 = vmatpush.msrb.mxu3 %v3115_v17  ;;  %1058 = vmatpush.msra.mxu0 %v3066_v2 }
  0x2c   :  { %391 = vmatpush.msrb.mxu2 %v3099_v13  ;;  %2570 = vmatmul.msk.f32.gmra.mxu1 %vm99_vm0, %v84_v25 }
  0x2d   :  { %409 = vmatpush.msrb.mxu3 %v3117_v18  ;;  %821 = vmatpush.msrb.mxu1 %v3144_v24 }
  0x2e   :  { %392 = vmatpush.msrb.mxu2 %v3108_v15  ;;  %1059 = vmatpush.msra.mxu0 %v3072_v4 }
  0x2f   :  { %410 = vmatpush.msrb.mxu3 %v3122_v19  ;;  %1078 = vmatpush.msra.mxu1 %v3090_v10 }
  0x30   :  { %393 = vmatpush.msrb.mxu2 %v3113_v16  ;;  %2562 = vmatmul.msk.f32.gmra.mxu0 %vm99_vm0, %v84_v25 }
  0x31   :  { %411 = vmatpush.msrb.mxu3 %v3129_v21  ;;  %1079 = vmatpush.msra.mxu1 %v3095_v12 }
  0x32   :  { %522 = vmatpush.msra.mxu2 %v3066_v2  ;;  %1060 = vmatpush.msra.mxu0 %v3077_v6 }
  0x33   :  { %412 = vmatpush.msrb.mxu3 %v3142_v23  ;;  %1080 = vmatpush.msra.mxu1 %v3115_v17 }
  0x34   :  { %523 = vmatpush.msra.mxu2 %v3072_v4  ;;  %2571 = vmatmul.msk.f32.gmra.mxu1 %vm99_vm0, %v85_v26 }
  0x35   :  { %413 = vmatpush.msrb.mxu3 %v3144_v24  ;;  %1081 = vmatpush.msra.mxu1 %v3117_v18 }
  0x36   :  { %524 = vmatpush.msra.mxu2 %v3077_v6  ;;  %1061 = vmatpush.msra.mxu0 %v3081_v7 }
  0x37   :  { %542 = vmatpush.msra.mxu3 %v3090_v10  ;;  %1082 = vmatpush.msra.mxu1 %v3122_v19 }
  0x38   :  { %525 = vmatpush.msra.mxu2 %v3081_v7  ;;  %2563 = vmatmul.msk.f32.gmra.mxu0 %vm99_vm0, %v85_v26 }
  0x39   :  { %543 = vmatpush.msra.mxu3 %v3095_v12  ;;  %1062 = vmatpush.msra.mxu0 %v3092_v11 }
  0x3a   :  { %526 = vmatpush.msra.mxu2 %v3092_v11  ;;  %1083 = vmatpush.msra.mxu1 %v3129_v21 }
  0x3b   :  { %544 = vmatpush.msra.mxu3 %v3115_v17  ;;  %1063 = vmatpush.msra.mxu0 %v3099_v13 }
  0x3c   :  { %527 = vmatpush.msra.mxu2 %v3099_v13  ;;  %2572 = vmatmul.msk.f32.gmra.mxu1 %vm99_vm0, %v86_v27 }
  0x3d   :  { %545 = vmatpush.msra.mxu3 %v3117_v18  ;;  %1084 = vmatpush.msra.mxu1 %v3142_v23 }
  0x3e   :  { %528 = vmatpush.msra.mxu2 %v3108_v15  ;;  %1064 = vmatpush.msra.mxu0 %v3108_v15 }
  0x3f   :  { %546 = vmatpush.msra.mxu3 %v3122_v19  ;;  %1085 = vmatpush.msra.mxu1 %v3144_v24 }
  0x40   :  { %529 = vmatpush.msra.mxu2 %v3113_v16  ;;  %2564 = vmatmul.msk.f32.gmra.mxu0 %vm99_vm0, %v86_v27 }
  0x41   :  { %547 = vmatpush.msra.mxu3 %v3129_v21  ;;  %1065 = vmatpush.msra.mxu0 %v3113_v16 }
  0x43   :  { %548 = vmatpush.msra.mxu3 %v3142_v23 }
  0x44   :  { %2573 = vmatmul.msk.f32.gmra.mxu1 %vm99_vm0, %v87_v28 }
  0x45   :  { %549 = vmatpush.msra.mxu3 %v3144_v24 }
  0x48   :  { %2565 = vmatmul.msk.f32.gmra.mxu0 %vm99_vm0, %v87_v28 }
  0x4c   :  { %2574 = vmatmul.msk.f32.gmra.mxu1 %vm99_vm0, %v88_v29 }
  0x50   :  { %2566 = vmatmul.msk.f32.gmra.mxu0 %vm99_vm0, %v88_v29 }
  0x91   :  { %v182_v32 = vpop.f32.mrf.mxu1 }
  0x92   :  { %v3232_v33 = vadd.f32 %v182_v32, %v96_v31 }
  0x95   :  { %v141_v37 = vpop.f32.mrf.mxu0 }
  0x96   :  { %v142_v38 = vadd.f32 %v141_v37, %v3236_v36 }
  0x99   :  { %v185_v34 = vpop.f32.mrf.mxu1 }
  0x9a   :  { %v3234_v35 = vadd.f32 %v185_v34, %v96_v31 }
  0xa1   :  { %v188_v39 = vpop.f32.mrf.mxu1 }
  0xa2   :  { %v3239_v40 = vadd.f32 %v188_v39, %v96_v31 }
  0xa4   :  { %v259_v41 = vpop.f32.mrf.mxu2 }
  0xa5   :  { %v283_v42 = vadd.f32 %v259_v41, %v142_v38 }
  0xa7   :  { %2661 = vtanh.f32 %v283_v42  ;;  %v2575_v57 = vmul.f32 -1.442695, %v283_v42 }
  0xa9   :  { %v191_v43 = vpop.f32.mrf.mxu1  ;;  %v279_v53 = vpop.f32.mrf.mxu3 }
  0xaa   :  { %v3241_v44 = vadd.f32 %v191_v43, %v96_v31 }
  0xad   :  { %v2662_v45 = vpop.eup %2661 }
  0xae   :  { %309 = vrot.lane.b32.xlu0 %v2662_v45, %s2999_s0 }
  0xb1   :  { %v194_v46 = vpop.f32.mrf.mxu1 }
  0xb2   :  { %v3244_v47 = vadd.f32 %v194_v46, %v96_v31 }
  0xb9   :  { %v197_v48 = vpop.f32.mrf.mxu1 }
  0xba   :  { %v3246_v49 = vadd.f32 %v197_v48, %v96_v31 }
  0xc1   :  { %v200_v50 = vpop.f32.mrf.mxu1 }
  0xc2   :  { %v3248_v51 = vadd.f32 %v200_v50, %v96_v31 }
  0xc9   :  { %v203_v52 = vpop.f32.mrf.mxu1 }
  0xca   :  { %v204_v54 = vadd.f32 %v203_v52, %v96_v31 }
  0xcc   :  { %v286_v55 = vadd.f32 %v279_v53, %v204_v54 }
  0xce   :  { %2663 = vtanh.f32 %v286_v55  ;;  %v2576_v5 = vmul.f32 -1.442695, %v286_v55 }
  0xcf   :  { %2665 = vpow2.f32 %v2575_v57 }
  0xd4   :  { %v2664_v56 = vpop.eup %2663 }
  0xd5   :  { %346 = vrot.lane.b32.xlu0 %v2664_v56, %s2999_s0  ;;  %v2666_v58 = vpop.eup %2665 }
  0xd6   :  { %v290_v59 = vadd.f32 1.0, %v2666_v58 }
  0xd8   :  { %2667 = vrcp.f32 %v290_v59  ;;  %vm296_vm1 = vweird.f32 %v290_v59  ;;  %v302_v0 = vand.u32 2147483648, %v290_v59  ;;  %v300_v3 = vand.u32 2147483647, %v290_v59 }
  0xd9   :  { %2669 = vpow2.f32 %v2576_v5 }
  0xda   :  { %v303_v8 = vor.u32 1.1754944e-38, %v302_v0  ;;  %vm301_vm4 = vcmp.eq.f32.partialorder %v300_v3, 8.507059e+37 }
  0xde   :  { %v2668_v60 = vpop.eup %2667 }
  0xdf   :  { %v292_v61 = vmul.f32 %v2668_v60, %v290_v59  ;;  %vm297_vm2 = vweird.f32 %v2668_v60  ;;  %v2670_v26 = vpop.eup %2669 }
  0xe0   :  { %vm298_vm3 = vmor %vm296_vm1, %vm297_vm2  ;;  %v327_v27 = vadd.f32 1.0, %v2670_v26 }
  0xe1   :  { %v293_v62 = vsub.f32 1.0, %v292_v61 }
  0xe2   :  { %2671 = vrcp.f32 %v327_v27  ;;  %v339_v34 = vand.u32 2147483648, %v327_v27  ;;  %vm333_vm6 = vweird.f32 %v327_v27  ;;  %v337_v37 = vand.u32 2147483647, %v327_v27 }
  0xe3   :  { %v294_v63 = vmul.f32 %v2668_v60, %v293_v62 }
  0xe4   :  { %v340_v39 = vor.u32 1.1754944e-38, %v339_v34  ;;  %vm338_vm8 = vcmp.eq.f32.partialorder %v337_v37, 8.507059e+37 }
  0xe5   :  { %v295_v1 = vadd.f32 %v2668_v60, %v294_v63  ;;  %v144_v63 = vpop.f32.mrf.mxu0 }
  0xe6   :  { %v145_v0 = vadd.f32 %v144_v63, %v3236_v36 }
  0xe7   :  { %v299_v9 = vsel %vm298_vm3, %v2668_v60, %v295_v1 }
  0xe8   :  { %v304_v22 = vsel %vm301_vm4, %v303_v8, %v299_v9  ;;  %v2672_v28 = vpop.eup %2671 }
  0xe9   :  { %v329_v29 = vmul.f32 %v2672_v28, %v327_v27  ;;  %vm334_vm5 = vweird.f32 %v2672_v28  ;;  %v307_v45 = vmul.f32 0.0, %v304_v22 }
  0xea   :  { %vm335_vm7 = vmor %vm333_vm6, %vm334_vm5 }
  0xeb   :  { %v330_v30 = vsub.f32 1.0, %v329_v29 }
  0xed   :  { %v331_v31 = vmul.f32 %v2672_v28, %v330_v30 }
  0xef   :  { %v332_v32 = vadd.f32 %v2672_v28, %v331_v31 }
  0xf1   :  { %v336_v38 = vsel %vm335_vm7, %v2672_v28, %v332_v32 }
  0xf2   :  { %v341_v41 = vsel %vm338_vm8, %v340_v39, %v336_v38 }
  0xf3   :  { %v344_v52 = vmul.f32 0.0, %v341_v41 }
 0x120   :  { %v310_v14 = vpop.permute.xlu0 %309 }
 0x121   :  { %v312_v25 = vmul.f32 %v310_v14, %v304_v22 }
 0x123   :  { %314 = vrot.lane.b32.xlu1 %v312_v25, %s3000_s3 }
 0x147   :  { %v347_v42 = vpop.permute.xlu0 %346 }
 0x148   :  { %v349_v43 = vmul.f32 %v347_v42, %v341_v41 }
 0x14a   :  { %351 = vrot.lane.b32.xlu1 %v349_v43, %s3000_s3 }
 0x195   :  { %v315_v46 = vpop.permute.xlu1 %314 }
 0x196   :  { %v3253_v48 = vadd.f32 %v315_v46, %v307_v45 }
 0x198   :  { %2673 = vtanh.f32 %v3253_v48 }
 0x19e   :  { %v2674_v50 = vpop.eup %2673 }
 0x19f   :  { %320 = vrot.lane.b32.xlu2 %v2674_v50, %s2999_s0 }
 0x1bc   :  { %v352_v53 = vpop.permute.xlu1 %351 }
 0x1bd   :  { %v3257_v54 = vadd.f32 %v352_v53, %v344_v52 }
 0x1bf   :  { %2675 = vtanh.f32 %v3257_v54 }
 0x1c5   :  { %v2676_v55 = vpop.eup %2675 }
 0x1c6   :  { %357 = vrot.lane.b32.xlu2 %v2676_v55, %s2999_s0 }
 0x1f9   :  { %v321_v56 = vpop.permute.xlu2 %320 }
 0x1fa   :  { %v323_v57 = vmul.f32 %v321_v56, %v304_v22 }
 0x1fc   :  { %362 = vrot.lane.b32.xlu0 %v323_v57, %s3000_s3 }
 0x220   :  { %v358_v58 = vpop.permute.xlu2 %357 }
 0x221   :  { %v360_v59 = vmul.f32 %v358_v58, %v341_v41 }
 0x223   :  { %368 = vrot.lane.b32.xlu1 %v360_v59, %s2999_s0 }
 0x26e   :  { %v363_v60 = vpop.permute.xlu0 %362 }
 0x26f   :  { %366 = vst.msk [vmem:[#allocation2] sm:$0xff] %vm365_vm9, %v363_v60 }
 0x295   :  { %v369_v61 = vpop.permute.xlu1 %368 }
 0x296   :  { %373 = vst.msk [vmem:[#allocation2 + $0x38] sm:$0xff] %vm372_vm10, %v369_v61  ;;  %v374_v62 = vsel %vm365_vm9, %v363_v60, %v369_v61 }
 0x297   :  { %2577 = vmatmul.msk.f32.vlgmr.msrb.gmra.mxu2 %vm238_vm11, %v374_v62  ;;  %2578 = vmatmul.msk.f32.vlgmr.msrb.gmra.mxu3 %vm238_vm11, %v374_v62 }
 0x298   :  { %658 = vmatpush.msrb.mxu2 %v3066_v2  ;;  %678 = vmatpush.msrb.mxu3 %v3090_v10 }
 0x29a   :  { %659 = vmatpush.msrb.mxu2 %v3072_v4  ;;  %679 = vmatpush.msrb.mxu3 %v3095_v12 }
 0x29c   :  { %660 = vmatpush.msrb.mxu2 %v3077_v6  ;;  %680 = vmatpush.msrb.mxu3 %v3115_v17 }
 0x29e   :  { %661 = vmatpush.msrb.mxu2 %v3081_v7  ;;  %681 = vmatpush.msrb.mxu3 %v3117_v18 }
 0x2a0   :  { %662 = vmatpush.msrb.mxu2 %v3092_v11  ;;  %682 = vmatpush.msrb.mxu3 %v3122_v19 }
 0x2a2   :  { %663 = vmatpush.msrb.mxu2 %v3099_v13  ;;  %683 = vmatpush.msrb.mxu3 %v3129_v21 }
 0x2a4   :  { %664 = vmatpush.msrb.mxu2 %v3108_v15  ;;  %684 = vmatpush.msrb.mxu3 %v3142_v23 }
 0x2a6   :  { %665 = vmatpush.msrb.mxu2 %v3113_v16  ;;  %685 = vmatpush.msrb.mxu3 %v3144_v24 }
 0x31a   :  { %v395_v1 = vpop.f32.mrf.mxu2  ;;  %v415_v3 = vpop.f32.mrf.mxu3 }
 0x31b   :  { %v420_v5 = vadd.f32 %v395_v1, %v145_v0  ;;  %v423_v8 = vadd.f32 %v415_v3, %v3248_v51 }
 0x31d   :  { %2677 = vtanh.f32 %v420_v5  ;;  %v2579_v22 = vmul.f32 -1.442695, %v420_v5  ;;  %v2580_v28 = vmul.f32 -1.442695, %v423_v8 }
 0x31e   :  { %2679 = vtanh.f32 %v423_v8 }
 0x31f   :  { %2681 = vpow2.f32 %v2579_v22 }
 0x323   :  { %v2678_v9 = vpop.eup %2677 }
 0x324   :  { %v2680_v14 = vpop.eup %2679  ;;  %446 = vrot.lane.b32.xlu2 %v2678_v9, %s2999_s0 }
 0x325   :  { %483 = vrot.lane.b32.xlu0 %v2680_v14, %s2999_s0  ;;  %v2682_v25 = vpop.eup %2681 }
 0x326   :  { %v427_v26 = vadd.f32 1.0, %v2682_v25 }
 0x328   :  { %2683 = vrcp.f32 %v427_v26  ;;  %v439_v37 = vand.u32 2147483648, %v427_v26  ;;  %vm433_vm13 = vweird.f32 %v427_v26  ;;  %v437_v38 = vand.u32 2147483647, %v427_v26 }
 0x329   :  { %2685 = vpow2.f32 %v2580_v28 }
 0x32a   :  { %v440_v41 = vor.u32 1.1754944e-38, %v439_v37  ;;  %vm438_vm15 = vcmp.eq.f32.partialorder %v437_v38, 8.507059e+37 }
 0x32e   :  { %v2684_v27 = vpop.eup %2683 }
 0x32f   :  { %v429_v29 = vmul.f32 %v2684_v27, %v427_v26  ;;  %v2686_v51 = vpop.eup %2685  ;;  %vm434_vm12 = vweird.f32 %v2684_v27 }
 0x330   :  { %v464_v32 = vadd.f32 1.0, %v2686_v51  ;;  %vm435_vm14 = vmor %vm433_vm13, %vm434_vm12 }
 0x331   :  { %v430_v30 = vsub.f32 1.0, %v429_v29  ;;  %v147_v29 = vpop.f32.mrf.mxu0 }
 0x332   :  { %2687 = vrcp.f32 %v464_v32  ;;  %v476_v56 = vand.u32 2147483648, %v464_v32  ;;  %vm470_vm1 = vweird.f32 %v464_v32  ;;  %v474_v57 = vand.u32 2147483647, %v464_v32 }
 0x333   :  { %v431_v31 = vmul.f32 %v2684_v27, %v430_v30  ;;  %v148_v30 = vadd.f32 %v147_v29, %v3236_v36 }
 0x334   :  { %v477_v59 = vor.u32 1.1754944e-38, %v476_v56  ;;  %vm475_vm3 = vcmp.eq.f32.partialorder %v474_v57, 8.507059e+37 }
 0x335   :  { %v432_v34 = vadd.f32 %v2684_v27, %v431_v31 }
 0x337   :  { %v436_v39 = vsel %vm435_vm14, %v2684_v27, %v432_v34 }
 0x338   :  { %v441_v43 = vsel %vm438_vm15, %v440_v41, %v436_v39  ;;  %v2688_v46 = vpop.eup %2687 }
 0x339   :  { %v466_v50 = vmul.f32 %v2688_v46, %v464_v32  ;;  %vm471_vm0 = vweird.f32 %v2688_v46  ;;  %v444_v63 = vmul.f32 %v441_v43, %v3253_v48 }
 0x33a   :  { %vm472_vm2 = vmor %vm470_vm1, %vm471_vm0 }
 0x33b   :  { %v467_v52 = vsub.f32 1.0, %v466_v50 }
 0x33d   :  { %v468_v53 = vmul.f32 %v2688_v46, %v467_v52 }
 0x33f   :  { %v469_v55 = vadd.f32 %v2688_v46, %v468_v53 }
 0x341   :  { %v473_v58 = vsel %vm472_vm2, %v2688_v46, %v469_v55 }
 0x342   :  { %v478_v61 = vsel %vm475_vm3, %v477_v59, %v473_v58 }
 0x343   :  { %v481_v0 = vmul.f32 %v478_v61, %v3257_v54 }
 0x37e   :  { %v447_v42 = vpop.permute.xlu2 %446 }
 0x37f   :  { %v449_v45 = vmul.f32 %v447_v42, %v441_v43 }
 0x381   :  { %451 = vrot.lane.b32.xlu1 %v449_v45, %s3000_s3 }
 0x397   :  { %v484_v60 = vpop.permute.xlu0 %483 }
 0x398   :  { %v486_v62 = vmul.f32 %v484_v60, %v478_v61 }
 0x39a   :  { %488 = vrot.lane.b32.xlu2 %v486_v62, %s3000_s3 }
 0x3f3   :  { %v452_v1 = vpop.permute.xlu1 %451 }
 0x3f4   :  { %v489_v3 = vpop.permute.xlu2 %488  ;;  %v3292_v5 = vadd.f32 %v452_v1, %v444_v63 }
 0x3f5   :  { %v3294_v8 = vadd.f32 %v489_v3, %v481_v0 }
 0x3f6   :  { %2689 = vtanh.f32 %v3292_v5 }
 0x3f7   :  { %2691 = vtanh.f32 %v3294_v8 }
 0x3fc   :  { %v2690_v9 = vpop.eup %2689 }
 0x3fd   :  { %v2692_v14 = vpop.eup %2691  ;;  %457 = vrot.lane.b32.xlu0 %v2690_v9, %s2999_s0 }
 0x3fe   :  { %494 = vrot.lane.b32.xlu1 %v2692_v14, %s2999_s0 }
 0x46f   :  { %v458_v22 = vpop.permute.xlu0 %457 }
 0x470   :  { %v495_v48 = vpop.permute.xlu1 %494  ;;  %v460_v25 = vmul.f32 %v458_v22, %v441_v43 }
 0x471   :  { %v497_v54 = vmul.f32 %v495_v48, %v478_v61 }
 0x472   :  { %499 = vrot.lane.b32.xlu2 %v460_v25, %s3000_s3 }
 0x473   :  { %505 = vrot.lane.b32.xlu0 %v497_v54, %s2999_s0 }
 0x4cc   :  { %v500_v26 = vpop.permute.xlu2 %499 }
 0x4cd   :  { %503 = vst.msk [vmem:[#allocation2 + $0x8] sm:$0xff] %vm365_vm9, %v500_v26 }
 0x4e5   :  { %v506_v27 = vpop.permute.xlu0 %505 }
 0x4e6   :  { %509 = vst.msk [vmem:[#allocation2 + $0x30] sm:$0xff] %vm372_vm10, %v506_v27  ;;  %v510_v28 = vsel %vm365_vm9, %v500_v26, %v506_v27 }
 0x4e7   :  { %2581 = vmatmul.msk.f32.vlgmr.msra.gmra.mxu2 %vm238_vm11, %v510_v28  ;;  %2582 = vmatmul.msk.f32.vlgmr.msra.gmra.mxu3 %vm238_vm11, %v510_v28 }
 0x4e8   :  { %926 = vmatpush.msra.mxu2 %v3066_v2  ;;  %946 = vmatpush.msra.mxu3 %v3090_v10 }
 0x4ea   :  { %927 = vmatpush.msra.mxu2 %v3072_v4  ;;  %947 = vmatpush.msra.mxu3 %v3095_v12 }
 0x4ec   :  { %928 = vmatpush.msra.mxu2 %v3077_v6  ;;  %948 = vmatpush.msra.mxu3 %v3115_v17 }
 0x4ee   :  { %929 = vmatpush.msra.mxu2 %v3081_v7  ;;  %949 = vmatpush.msra.mxu3 %v3117_v18 }
 0x4f0   :  { %930 = vmatpush.msra.mxu2 %v3092_v11  ;;  %950 = vmatpush.msra.mxu3 %v3122_v19 }
 0x4f2   :  { %931 = vmatpush.msra.mxu2 %v3099_v13  ;;  %951 = vmatpush.msra.mxu3 %v3129_v21 }
 0x4f4   :  { %932 = vmatpush.msra.mxu2 %v3108_v15  ;;  %952 = vmatpush.msra.mxu3 %v3142_v23 }
 0x4f6   :  { %933 = vmatpush.msra.mxu2 %v3113_v16  ;;  %953 = vmatpush.msra.mxu3 %v3144_v24 }
 0x56a   :  { %v531_v31 = vpop.f32.mrf.mxu2  ;;  %v551_v51 = vpop.f32.mrf.mxu3 }
 0x56b   :  { %v556_v32 = vadd.f32 %v531_v31, %v148_v30  ;;  %v559_v34 = vadd.f32 %v551_v51, %v3246_v49 }
 0x56d   :  { %2693 = vtanh.f32 %v556_v32  ;;  %v2584_v39 = vmul.f32 -1.442695, %v559_v34  ;;  %v2583_v45 = vmul.f32 -1.442695, %v556_v32 }
 0x56e   :  { %2695 = vtanh.f32 %v559_v34 }
 0x56f   :  { %2697 = vpow2.f32 %v2584_v39 }
 0x573   :  { %v2694_v37 = vpop.eup %2693 }
 0x574   :  { %v2696_v38 = vpop.eup %2695  ;;  %582 = vrot.lane.b32.xlu1 %v2694_v37, %s2999_s0 }
 0x575   :  { %619 = vrot.lane.b32.xlu2 %v2696_v38, %s2999_s0  ;;  %v2698_v41 = vpop.eup %2697 }
 0x576   :  { %v600_v42 = vadd.f32 1.0, %v2698_v41 }
 0x578   :  { %2699 = vrcp.f32 %v600_v42  ;;  %v612_v56 = vand.u32 2147483648, %v600_v42  ;;  %vm606_vm5 = vweird.f32 %v600_v42  ;;  %v610_v57 = vand.u32 2147483647, %v600_v42 }
 0x579   :  { %2701 = vpow2.f32 %v2583_v45 }
 0x57a   :  { %v613_v59 = vor.u32 1.1754944e-38, %v612_v56  ;;  %vm611_vm7 = vcmp.eq.f32.partialorder %v610_v57, 8.507059e+37 }
 0x57e   :  { %v2700_v43 = vpop.eup %2699 }
 0x57f   :  { %v602_v46 = vmul.f32 %v2700_v43, %v600_v42  ;;  %v2702_v52 = vpop.eup %2701  ;;  %vm607_vm4 = vweird.f32 %v2700_v43 }
 0x580   :  { %v563_v53 = vadd.f32 1.0, %v2702_v52  ;;  %vm608_vm6 = vmor %vm606_vm5, %vm607_vm4 }
 0x581   :  { %v603_v50 = vsub.f32 1.0, %v602_v46 }
 0x582   :  { %2703 = vrcp.f32 %v563_v53  ;;  %v575_v14 = vand.u32 2147483648, %v563_v53  ;;  %vm569_vm12 = vweird.f32 %v563_v53  ;;  %v573_v22 = vand.u32 2147483647, %v563_v53 }
 0x583   :  { %v604_v49 = vmul.f32 %v2700_v43, %v603_v50 }
 0x584   :  { %v576_v25 = vor.u32 1.1754944e-38, %v575_v14  ;;  %vm574_vm14 = vcmp.eq.f32.partialorder %v573_v22, 8.507059e+37 }
 0x585   :  { %v605_v55 = vadd.f32 %v2700_v43, %v604_v49 }
 0x587   :  { %v609_v58 = vsel %vm608_vm6, %v2700_v43, %v605_v55 }
 0x588   :  { %v614_v61 = vsel %vm611_vm7, %v613_v59, %v609_v58  ;;  %v2704_v62 = vpop.eup %2703 }
 0x589   :  { %v565_v0 = vmul.f32 %v2704_v62, %v563_v53  ;;  %vm570_vm8 = vweird.f32 %v2704_v62  ;;  %v617_v28 = vmul.f32 %v614_v61, %v3294_v8 }
 0x58a   :  { %vm571_vm13 = vmor %vm569_vm12, %vm570_vm8 }
 0x58b   :  { %v566_v1 = vsub.f32 1.0, %v565_v0 }
 0x58d   :  { %v567_v3 = vmul.f32 %v2704_v62, %v566_v1 }
 0x58f   :  { %v568_v9 = vadd.f32 %v2704_v62, %v567_v3 }
 0x591   :  { %v572_v48 = vsel %vm571_vm13, %v2704_v62, %v568_v9 }
 0x592   :  { %v577_v26 = vsel %vm574_vm14, %v576_v25, %v572_v48 }
 0x593   :  { %v580_v51 = vmul.f32 %v577_v26, %v3292_v5 }
 0x5cf   :  { %v620_v60 = vpop.permute.xlu2 %619 }
 0x5d0   :  { %v622_v63 = vmul.f32 %v620_v60, %v614_v61 }
 0x5d2   :  { %624 = vrot.lane.b32.xlu1 %v622_v63, %s3000_s3 }
 0x5e6   :  { %v583_v54 = vpop.permute.xlu1 %582 }
 0x5e7   :  { %v585_v27 = vmul.f32 %v583_v54, %v577_v26 }
 0x5e9   :  { %587 = vrot.lane.b32.xlu0 %v585_v27, %s3000_s3 }
 0x644   :  { %v625_v29 = vpop.permute.xlu1 %624 }
 0x645   :  { %v3330_v30 = vadd.f32 %v625_v29, %v617_v28 }
 0x647   :  { %2705 = vtanh.f32 %v3330_v30 }
 0x64d   :  { %v2706_v31 = vpop.eup %2705 }
 0x64e   :  { %630 = vrot.lane.b32.xlu0 %v2706_v31, %s2999_s0 }
 0x65b   :  { %v588_v32 = vpop.permute.xlu0 %587 }
 0x65c   :  { %v3335_v34 = vadd.f32 %v588_v32, %v580_v51 }
 0x65e   :  { %2707 = vtanh.f32 %v3335_v34 }
 0x664   :  { %v2708_v37 = vpop.eup %2707 }
 0x665   :  { %593 = vrot.lane.b32.xlu2 %v2708_v37, %s2999_s0 }
 0x6bf   :  { %v594_v38 = vpop.permute.xlu2 %593 }
 0x6c0   :  { %v631_v8 = vpop.permute.xlu0 %630  ;;  %v596_v39 = vmul.f32 %v594_v38, %v577_v26 }
 0x6c1   :  { %v633_v41 = vmul.f32 %v631_v8, %v614_v61 }
 0x6c2   :  { %635 = vrot.lane.b32.xlu1 %v596_v39, %s3000_s3 }
 0x6c3   :  { %641 = vrot.lane.b32.xlu2 %v633_v41, %s2999_s0 }
 0x71d   :  { %v642_v42 = vpop.permute.xlu2 %641 }
 0x71e   :  { %645 = vst.msk [vmem:[#allocation2 + $0x28] sm:$0xff] %vm372_vm10, %v642_v42 }
 0x734   :  { %v636_v5 = vpop.permute.xlu1 %635 }
 0x735   :  { %639 = vst.msk [vmem:[#allocation2 + $0x10] sm:$0xff] %vm365_vm9, %v636_v5  ;;  %v646_v43 = vsel %vm365_vm9, %v636_v5, %v642_v42 }
 0x736   :  { %2585 = vmatmul.msk.f32.vlgmr.msrb.gmra.mxu2 %vm238_vm11, %v646_v43  ;;  %2586 = vmatmul.msk.f32.vlgmr.msrb.gmra.mxu3 %vm238_vm11, %v646_v43 }
 0x737   :  { %1190 = vmatpush.msrb.mxu2 %v3066_v2  ;;  %1210 = vmatpush.msrb.mxu3 %v3090_v10  ;;  %v150_v2 = vpop.f32.mrf.mxu0 }
 0x739   :  { %1191 = vmatpush.msrb.mxu2 %v3072_v4  ;;  %1211 = vmatpush.msrb.mxu3 %v3095_v12  ;;  %v151_v4 = vadd.f32 %v150_v2, %v3236_v36 }
 0x73b   :  { %1192 = vmatpush.msrb.mxu2 %v3077_v6  ;;  %1212 = vmatpush.msrb.mxu3 %v3115_v17 }
 0x73d   :  { %1193 = vmatpush.msrb.mxu2 %v3081_v7  ;;  %1213 = vmatpush.msrb.mxu3 %v3117_v18 }
 0x73f   :  { %1194 = vmatpush.msrb.mxu2 %v3092_v11  ;;  %1214 = vmatpush.msrb.mxu3 %v3122_v19  ;;  %v153_v39 = vpop.f32.mrf.mxu0 }
 0x740   :  { %v154_v43 = vadd.f32 %v153_v39, %v3236_v36 }
 0x741   :  { %1195 = vmatpush.msrb.mxu2 %v3099_v13  ;;  %1215 = vmatpush.msrb.mxu3 %v3129_v21 }
 0x743   :  { %1196 = vmatpush.msrb.mxu2 %v3108_v15  ;;  %1216 = vmatpush.msrb.mxu3 %v3142_v23 }
 0x745   :  { %1197 = vmatpush.msrb.mxu2 %v3113_v16  ;;  %1217 = vmatpush.msrb.mxu3 %v3144_v24 }
 0x747   :  { %v3385_v41 = vpop.f32.mrf.mxu0 }
 0x74f   :  { %v3387_v42 = vpop.f32.mrf.mxu0 }
 0x757   :  { %v3389_v5 = vpop.f32.mrf.mxu0 }
 0x7b9   :  { %v667_v6 = vpop.f32.mrf.mxu2  ;;  %v687_v7 = vpop.f32.mrf.mxu3 }
 0x7ba   :  { %v692_v10 = vadd.f32 %v667_v6, %v151_v4  ;;  %v695_v11 = vadd.f32 %v687_v7, %v3244_v47 }
 0x7bc   :  { %2709 = vtanh.f32 %v692_v10  ;;  %v2587_v15 = vmul.f32 -1.442695, %v692_v10  ;;  %v2588_v16 = vmul.f32 -1.442695, %v695_v11 }
 0x7bd   :  { %2711 = vtanh.f32 %v695_v11 }
 0x7be   :  { %2713 = vpow2.f32 %v2587_v15 }
 0x7bf   :  { %2715 = vpow2.f32 %v2588_v16 }
 0x7c2   :  { %v2710_v12 = vpop.eup %2709 }
 0x7c3   :  { %v2712_v13 = vpop.eup %2711  ;;  %718 = vrot.lane.b32.xlu0 %v2710_v12, %s2999_s0 }
 0x7c4   :  { %755 = vrot.lane.b32.xlu1 %v2712_v13, %s2999_s0  ;;  %v2714_v17 = vpop.eup %2713 }
 0x7c5   :  { %v2716_v18 = vpop.eup %2715  ;;  %v699_v19 = vadd.f32 1.0, %v2714_v17 }
 0x7c6   :  { %v736_v21 = vadd.f32 1.0, %v2716_v18 }
 0x7c7   :  { %2717 = vrcp.f32 %v699_v19  ;;  %v711_v56 = vand.u32 2147483648, %v699_v19  ;;  %vm705_vm1 = vweird.f32 %v699_v19  ;;  %v709_v58 = vand.u32 2147483647, %v699_v19 }
 0x7c8   :  { %2719 = vrcp.f32 %v736_v21  ;;  %v748_v57 = vand.u32 2147483648, %v736_v21  ;;  %vm742_vm2 = vweird.f32 %v736_v21  ;;  %v746_v59 = vand.u32 2147483647, %v736_v21 }
 0x7c9   :  { %v712_v62 = vor.u32 1.1754944e-38, %v711_v56  ;;  %vm710_vm5 = vcmp.eq.f32.partialorder %v709_v58, 8.507059e+37 }
 0x7ca   :  { %v749_v63 = vor.u32 1.1754944e-38, %v748_v57  ;;  %vm747_vm6 = vcmp.eq.f32.partialorder %v746_v59, 8.507059e+37 }
 0x7cd   :  { %v2718_v23 = vpop.eup %2717 }
 0x7ce   :  { %v2720_v24 = vpop.eup %2719  ;;  %v701_v47 = vmul.f32 %v2718_v23, %v699_v19  ;;  %vm706_vm15 = vweird.f32 %v2718_v23 }
 0x7cf   :  { %v738_v45 = vmul.f32 %v2720_v24, %v736_v21  ;;  %vm743_vm0 = vweird.f32 %v2720_v24  ;;  %vm707_vm3 = vmor %vm705_vm1, %vm706_vm15 }
 0x7d0   :  { %v702_v46 = vsub.f32 1.0, %v701_v47  ;;  %vm744_vm4 = vmor %vm742_vm2, %vm743_vm0 }
 0x7d1   :  { %v739_v50 = vsub.f32 1.0, %v738_v45 }
 0x7d2   :  { %v703_v52 = vmul.f32 %v2718_v23, %v702_v46 }
 0x7d3   :  { %v740_v49 = vmul.f32 %v2720_v24, %v739_v50 }
 0x7d4   :  { %v704_v53 = vadd.f32 %v2718_v23, %v703_v52 }
 0x7d5   :  { %v741_v55 = vadd.f32 %v2720_v24, %v740_v49 }
 0x7d6   :  { %v708_v60 = vsel %vm707_vm3, %v2718_v23, %v704_v53 }
 0x7d7   :  { %v745_v61 = vsel %vm744_vm4, %v2720_v24, %v741_v55  ;;  %v713_v1 = vsel %vm710_vm5, %v712_v62, %v708_v60 }
 0x7d8   :  { %v750_v9 = vsel %vm747_vm6, %v749_v63, %v745_v61  ;;  %v716_v48 = vmul.f32 %v713_v1, %v3335_v34 }
 0x7d9   :  { %v753_v27 = vmul.f32 %v750_v9, %v3330_v30 }
 0x835   :  { %v719_v0 = vpop.permute.xlu0 %718 }
 0x836   :  { %v756_v3 = vpop.permute.xlu1 %755  ;;  %v721_v14 = vmul.f32 %v719_v0, %v713_v1 }
 0x837   :  { %v758_v22 = vmul.f32 %v756_v3, %v750_v9 }
 0x838   :  { %723 = vrot.lane.b32.xlu2 %v721_v14, %s3000_s3 }
 0x839   :  { %760 = vrot.lane.b32.xlu0 %v758_v22, %s3000_s3 }
 0x892   :  { %v724_v25 = vpop.permute.xlu2 %723 }
 0x893   :  { %v3369_v54 = vadd.f32 %v724_v25, %v716_v48 }
 0x895   :  { %2721 = vtanh.f32 %v3369_v54 }
 0x89b   :  { %v2722_v26 = vpop.eup %2721 }
 0x89c   :  { %729 = vrot.lane.b32.xlu1 %v2722_v26, %s2999_s0 }
 0x8ab   :  { %v761_v28 = vpop.permute.xlu0 %760 }
 0x8ac   :  { %v3374_v29 = vadd.f32 %v761_v28, %v753_v27 }
 0x8ae   :  { %2723 = vtanh.f32 %v3374_v29 }
 0x8b4   :  { %v2724_v31 = vpop.eup %2723 }
 0x8b5   :  { %766 = vrot.lane.b32.xlu2 %v2724_v31, %s2999_s0 }
 0x90e   :  { %v730_v51 = vpop.permute.xlu1 %729 }
 0x90f   :  { %v767_v32 = vpop.permute.xlu2 %766  ;;  %v732_v34 = vmul.f32 %v730_v51, %v713_v1 }
 0x910   :  { %v769_v37 = vmul.f32 %v767_v32, %v750_v9 }
 0x911   :  { %771 = vrot.lane.b32.xlu0 %v732_v34, %s3000_s3 }
 0x912   :  { %777 = vrot.lane.b32.xlu1 %v769_v37, %s2999_s0 }
 0x983   :  { %v772_v38 = vpop.permute.xlu0 %771 }
 0x984   :  { %775 = vst.msk [vmem:[#allocation2 + $0x18] sm:$0xff] %vm365_vm9, %v772_v38  ;;  %v778_v30 = vpop.permute.xlu1 %777 }
 0x985   :  { %781 = vst.msk [vmem:[#allocation2 + $0x20] sm:$0xff] %vm372_vm10, %v778_v30  ;;  %v782_v8 = vsel %vm365_vm9, %v772_v38, %v778_v30  ;;  %v157_v38 = vadd.f32 %v3385_v41, %v3236_v36 }
 0x986   :  { %2589 = vmatmul.msk.f32.vlgmr.msrb.gmra.mxu0 %vm238_vm11, %v782_v8  ;;  %2590 = vmatmul.msk.f32.vlgmr.msrb.gmra.mxu1 %vm238_vm11, %v782_v8 }
 0xa03   :  { %v803_v2 = vpop.f32.mrf.mxu0  ;;  %v823_v4 = vpop.f32.mrf.mxu1 }
 0xa04   :  { %v827_v6 = vadd.f32 %v803_v2, %v154_v43  ;;  %v829_v7 = vadd.f32 %v823_v4, %v3241_v44 }
 0xa06   :  { %2725 = vtanh.f32 %v827_v6  ;;  %v2591_v12 = vmul.f32 -1.442695, %v827_v6  ;;  %v2592_v17 = vmul.f32 -1.442695, %v829_v7 }
 0xa07   :  { %2727 = vtanh.f32 %v829_v7 }
 0xa08   :  { %2729 = vpow2.f32 %v2591_v12 }
 0xa0c   :  { %v2726_v10 = vpop.eup %2725 }
 0xa0d   :  { %v2728_v11 = vpop.eup %2727  ;;  %852 = vrot.lane.b32.xlu2 %v2726_v10, %s2999_s0 }
 0xa0e   :  { %889 = vrot.lane.b32.xlu0 %v2728_v11, %s2999_s0  ;;  %v2730_v13 = vpop.eup %2729 }
 0xa0f   :  { %v833_v15 = vadd.f32 1.0, %v2730_v13 }
 0xa11   :  { %2731 = vrcp.f32 %v833_v15  ;;  %v845_v47 = vand.u32 2147483648, %v833_v15  ;;  %vm839_vm8 = vweird.f32 %v833_v15  ;;  %v843_v45 = vand.u32 2147483647, %v833_v15 }
 0xa12   :  { %2733 = vpow2.f32 %v2592_v17 }
 0xa13   :  { %v846_v50 = vor.u32 1.1754944e-38, %v845_v47  ;;  %vm844_vm13 = vcmp.eq.f32.partialorder %v843_v45, 8.507059e+37 }
 0xa17   :  { %v2732_v16 = vpop.eup %2731 }
 0xa18   :  { %v835_v18 = vmul.f32 %v2732_v16, %v833_v15  ;;  %v2734_v44 = vpop.eup %2733  ;;  %vm840_vm7 = vweird.f32 %v2732_v16 }
 0xa19   :  { %v870_v23 = vadd.f32 1.0, %v2734_v44  ;;  %vm841_vm12 = vmor %vm839_vm8, %vm840_vm7 }
 0xa1a   :  { %v836_v19 = vsub.f32 1.0, %v835_v18 }
 0xa1b   :  { %2735 = vrcp.f32 %v870_v23  ;;  %v882_v60 = vand.u32 2147483648, %v870_v23  ;;  %vm876_vm15 = vweird.f32 %v870_v23  ;;  %v880_v61 = vand.u32 2147483647, %v870_v23 }
 0xa1c   :  { %v837_v21 = vmul.f32 %v2732_v16, %v836_v19 }
 0xa1d   :  { %v883_v63 = vor.u32 1.1754944e-38, %v882_v60  ;;  %vm881_vm1 = vcmp.eq.f32.partialorder %v880_v61, 8.507059e+37 }
 0xa1e   :  { %v838_v24 = vadd.f32 %v2732_v16, %v837_v21 }
 0xa20   :  { %v842_v46 = vsel %vm841_vm12, %v2732_v16, %v838_v24 }
 0xa21   :  { %v847_v49 = vsel %vm844_vm13, %v846_v50, %v842_v46  ;;  %v2736_v55 = vpop.eup %2735 }
 0xa22   :  { %v872_v56 = vmul.f32 %v2736_v55, %v870_v23  ;;  %vm877_vm14 = vweird.f32 %v2736_v55  ;;  %v850_v9 = vmul.f32 %v847_v49, %v3369_v54 }
 0xa23   :  { %vm878_vm0 = vmor %vm876_vm15, %vm877_vm14 }
 0xa24   :  { %v873_v57 = vsub.f32 1.0, %v872_v56 }
 0xa26   :  { %v874_v58 = vmul.f32 %v2736_v55, %v873_v57 }
 0xa28   :  { %v875_v59 = vadd.f32 %v2736_v55, %v874_v58 }
 0xa2a   :  { %v879_v62 = vsel %vm878_vm0, %v2736_v55, %v875_v59 }
 0xa2b   :  { %v884_v1 = vsel %vm881_vm1, %v883_v63, %v879_v62 }
 0xa2c   :  { %v887_v14 = vmul.f32 %v884_v1, %v3374_v29 }
 0xa67   :  { %v853_v52 = vpop.permute.xlu2 %852 }
 0xa68   :  { %v855_v53 = vmul.f32 %v853_v52, %v847_v49 }
 0xa6a   :  { %857 = vrot.lane.b32.xlu1 %v855_v53, %s3000_s3 }
 0xa80   :  { %v890_v0 = vpop.permute.xlu0 %889 }
 0xa81   :  { %v892_v3 = vmul.f32 %v890_v0, %v884_v1 }
 0xa83   :  { %894 = vrot.lane.b32.xlu2 %v892_v3, %s3000_s3 }
 0xadc   :  { %v858_v22 = vpop.permute.xlu1 %857 }
 0xadd   :  { %v895_v48 = vpop.permute.xlu2 %894  ;;  %v3399_v25 = vadd.f32 %v858_v22, %v850_v9 }
 0xade   :  { %v3401_v26 = vadd.f32 %v895_v48, %v887_v14 }
 0xadf   :  { %2737 = vtanh.f32 %v3399_v25 }
 0xae0   :  { %2739 = vtanh.f32 %v3401_v26 }
 0xae5   :  { %v2738_v27 = vpop.eup %2737 }
 0xae6   :  { %v2740_v28 = vpop.eup %2739  ;;  %863 = vrot.lane.b32.xlu0 %v2738_v27, %s2999_s0 }
 0xae7   :  { %900 = vrot.lane.b32.xlu1 %v2740_v28, %s2999_s0 }
 0xb58   :  { %v864_v31 = vpop.permute.xlu0 %863 }
 0xb59   :  { %v901_v54 = vpop.permute.xlu1 %900  ;;  %v866_v51 = vmul.f32 %v864_v31, %v847_v49 }
 0xb5a   :  { %v903_v29 = vmul.f32 %v901_v54, %v884_v1  ;;  %v160_v54 = vadd.f32 %v3387_v42, %v3236_v36 }
 0xb5b   :  { %905 = vrot.lane.b32.xlu2 %v866_v51, %s3000_s3 }
 0xb5c   :  { %910 = vrot.lane.b32.xlu0 %v903_v29, %s2999_s0 }
 0xbb5   :  { %v906_v32 = vpop.permute.xlu2 %905 }
 0xbb6   :  { %908 = vst.msk [vmem:[#allocation2 + $0x20] sm:$0xff] %vm365_vm9, %v906_v32 }
 0xbce   :  { %v911_v34 = vpop.permute.xlu0 %910 }
 0xbcf   :  { %913 = vst.msk [vmem:[#allocation2 + $0x18] sm:$0xff] %vm372_vm10, %v911_v34  ;;  %v914_v37 = vsel %vm365_vm9, %v906_v32, %v911_v34 }
 0xbd0   :  { %2593 = vmatmul.msk.f32.vlgmr.msra.gmra.mxu2 %vm238_vm11, %v914_v37  ;;  %2594 = vmatmul.msk.f32.vlgmr.msra.gmra.mxu3 %vm238_vm11, %v914_v37 }
 0xc53   :  { %v935_v30 = vpop.f32.mrf.mxu2  ;;  %v955_v8 = vpop.f32.mrf.mxu3 }
 0xc54   :  { %v959_v39 = vadd.f32 %v935_v30, %v157_v38  ;;  %v961_v43 = vadd.f32 %v955_v8, %v3239_v40 }
 0xc56   :  { %2741 = vtanh.f32 %v959_v39  ;;  %v2596_v6 = vmul.f32 -1.442695, %v961_v43  ;;  %v2595_v41 = vmul.f32 -1.442695, %v959_v39 }
 0xc57   :  { %2743 = vtanh.f32 %v961_v43 }
 0xc58   :  { %2745 = vpow2.f32 %v2596_v6 }
 0xc5c   :  { %v2742_v2 = vpop.eup %2741 }
 0xc5d   :  { %v2744_v4 = vpop.eup %2743  ;;  %984 = vrot.lane.b32.xlu1 %v2742_v2, %s2999_s0 }
 0xc5e   :  { %1021 = vrot.lane.b32.xlu2 %v2744_v4, %s2999_s0  ;;  %v2746_v7 = vpop.eup %2745 }
 0xc5f   :  { %v1002_v10 = vadd.f32 1.0, %v2746_v7 }
 0xc61   :  { %2747 = vrcp.f32 %v1002_v10  ;;  %v1014_v18 = vand.u32 2147483648, %v1002_v10  ;;  %vm1008_vm3 = vweird.f32 %v1002_v10  ;;  %v1012_v19 = vand.u32 2147483647, %v1002_v10 }
 0xc62   :  { %2749 = vpow2.f32 %v2595_v41 }
 0xc63   :  { %v1015_v44 = vor.u32 1.1754944e-38, %v1014_v18  ;;  %vm1013_vm5 = vcmp.eq.f32.partialorder %v1012_v19, 8.507059e+37 }
 0xc67   :  { %v2748_v11 = vpop.eup %2747 }
 0xc68   :  { %v1004_v12 = vmul.f32 %v2748_v11, %v1002_v10  ;;  %v2750_v15 = vpop.eup %2749  ;;  %vm1009_vm2 = vweird.f32 %v2748_v11 }
 0xc69   :  { %v965_v16 = vadd.f32 1.0, %v2750_v15  ;;  %vm1010_vm4 = vmor %vm1008_vm3, %vm1009_vm2 }
 0xc6a   :  { %v1005_v13 = vsub.f32 1.0, %v1004_v12 }
 0xc6b   :  { %2751 = vrcp.f32 %v965_v16  ;;  %v977_v53 = vand.u32 2147483648, %v965_v16  ;;  %vm971_vm7 = vweird.f32 %v965_v16  ;;  %v975_v55 = vand.u32 2147483647, %v965_v16 }
 0xc6c   :  { %v1006_v40 = vmul.f32 %v2748_v11, %v1005_v13 }
 0xc6d   :  { %v978_v57 = vor.u32 1.1754944e-38, %v977_v53  ;;  %vm976_vm12 = vcmp.eq.f32.partialorder %v975_v55, 8.507059e+37 }
 0xc6e   :  { %v1007_v17 = vadd.f32 %v2748_v11, %v1006_v40 }
 0xc70   :  { %v1011_v21 = vsel %vm1010_vm4, %v2748_v11, %v1007_v17 }
 0xc71   :  { %v1016_v24 = vsel %vm1013_vm5, %v1015_v44, %v1011_v21  ;;  %v2752_v47 = vpop.eup %2751 }
 0xc72   :  { %v967_v46 = vmul.f32 %v2752_v47, %v965_v16  ;;  %vm972_vm6 = vweird.f32 %v2752_v47  ;;  %v1019_v61 = vmul.f32 %v1016_v24, %v3401_v26 }
 0xc73   :  { %vm973_vm8 = vmor %vm971_vm7, %vm972_vm6 }
 0xc74   :  { %v968_v50 = vsub.f32 1.0, %v967_v46 }
 0xc76   :  { %v969_v52 = vmul.f32 %v2752_v47, %v968_v50 }
 0xc78   :  { %v970_v49 = vadd.f32 %v2752_v47, %v969_v52 }
 0xc7a   :  { %v974_v56 = vsel %vm973_vm8, %v2752_v47, %v970_v49 }
 0xc7b   :  { %v979_v59 = vsel %vm976_vm12, %v978_v57, %v974_v56 }
 0xc7c   :  { %v982_v1 = vmul.f32 %v979_v59, %v3399_v25 }
 0xcb8   :  { %v1022_v23 = vpop.permute.xlu2 %1021 }
 0xcb9   :  { %v1024_v45 = vmul.f32 %v1022_v23, %v1016_v24 }
 0xcbb   :  { %1026 = vrot.lane.b32.xlu1 %v1024_v45, %s3000_s3 }
 0xccf   :  { %v985_v58 = vpop.permute.xlu1 %984 }
 0xcd0   :  { %v987_v60 = vmul.f32 %v985_v58, %v979_v59 }
 0xcd2   :  { %989 = vrot.lane.b32.xlu0 %v987_v60, %s3000_s3 }
 0xd2d   :  { %v1027_v62 = vpop.permute.xlu1 %1026 }
 0xd2e   :  { %v3422_v63 = vadd.f32 %v1027_v62, %v1019_v61 }
 0xd30   :  { %2753 = vtanh.f32 %v3422_v63 }
 0xd36   :  { %v2754_v0 = vpop.eup %2753 }
 0xd37   :  { %1032 = vrot.lane.b32.xlu0 %v2754_v0, %s2999_s0 }
 0xd44   :  { %v990_v3 = vpop.permute.xlu0 %989 }
 0xd45   :  { %v3427_v9 = vadd.f32 %v990_v3, %v982_v1 }
 0xd47   :  { %2755 = vtanh.f32 %v3427_v9 }
 0xd4d   :  { %v2756_v14 = vpop.eup %2755 }
 0xd4e   :  { %995 = vrot.lane.b32.xlu2 %v2756_v14, %s2999_s0  ;;  %v163_v14 = vadd.f32 %v3389_v5, %v3236_v36 }
 0xda8   :  { %v996_v22 = vpop.permute.xlu2 %995 }
 0xda9   :  { %v1033_v48 = vpop.permute.xlu0 %1032  ;;  %v998_v26 = vmul.f32 %v996_v22, %v979_v59 }
 0xdaa   :  { %v1035_v27 = vmul.f32 %v1033_v48, %v1016_v24 }
 0xdab   :  { %1037 = vrot.lane.b32.xlu1 %v998_v26, %s3000_s3 }
 0xdac   :  { %1042 = vrot.lane.b32.xlu2 %v1035_v27, %s2999_s0 }
 0xe06   :  { %v1043_v28 = vpop.permute.xlu2 %1042 }
 0xe07   :  { %1045 = vst.msk [vmem:[#allocation2 + $0x10] sm:$0xff] %vm372_vm10, %v1043_v28 }
 0xe1d   :  { %v1038_v25 = vpop.permute.xlu1 %1037 }
 0xe1e   :  { %1040 = vst.msk [vmem:[#allocation2 + $0x28] sm:$0xff] %vm365_vm9, %v1038_v25  ;;  %v1046_v31 = vsel %vm365_vm9, %v1038_v25, %v1043_v28 }
 0xe1f   :  { %2597 = vmatmul.msk.f32.vlgmr.msra.gmra.mxu0 %vm238_vm11, %v1046_v31  ;;  %2598 = vmatmul.msk.f32.vlgmr.msra.gmra.mxu1 %vm238_vm11, %v1046_v31 }
 0xe9c   :  { %v1067_v51 = vpop.f32.mrf.mxu0  ;;  %v1087_v29 = vpop.f32.mrf.mxu1 }
 0xe9d   :  { %v1091_v32 = vadd.f32 %v1067_v51, %v160_v54  ;;  %v1093_v34 = vadd.f32 %v1087_v29, %v3234_v35 }
 0xe9f   :  { %2757 = vtanh.f32 %v1091_v32  ;;  %v2599_v30 = vmul.f32 -1.442695, %v1091_v32  ;;  %v2600_v8 = vmul.f32 -1.442695, %v1093_v34 }
 0xea0   :  { %2759 = vtanh.f32 %v1093_v34 }
 0xea1   :  { %2761 = vpow2.f32 %v2599_v30 }
 0xea2   :  { %2763 = vpow2.f32 %v2600_v8 }
 0xea5   :  { %v2758_v37 = vpop.eup %2757 }
 0xea6   :  { %v2760_v38 = vpop.eup %2759  ;;  %1116 = vrot.lane.b32.xlu0 %v2758_v37, %s2999_s0 }
 0xea7   :  { %1153 = vrot.lane.b32.xlu1 %v2760_v38, %s2999_s0  ;;  %v2762_v39 = vpop.eup %2761 }
 0xea8   :  { %v2764_v43 = vpop.eup %2763  ;;  %v1097_v42 = vadd.f32 1.0, %v2762_v39 }
 0xea9   :  { %v1134_v2 = vadd.f32 1.0, %v2764_v43 }
 0xeaa   :  { %2765 = vrcp.f32 %v1097_v42  ;;  %v1109_v40 = vand.u32 2147483648, %v1097_v42  ;;  %vm1103_vm15 = vweird.f32 %v1097_v42  ;;  %v1107_v17 = vand.u32 2147483647, %v1097_v42 }
 0xeab   :  { %2767 = vrcp.f32 %v1134_v2  ;;  %v1146_v16 = vand.u32 2147483648, %v1134_v2  ;;  %vm1140_vm0 = vweird.f32 %v1134_v2  ;;  %v1144_v18 = vand.u32 2147483647, %v1134_v2 }
 0xeac   :  { %v1110_v44 = vor.u32 1.1754944e-38, %v1109_v40  ;;  %vm1108_vm3 = vcmp.eq.f32.partialorder %v1107_v17, 8.507059e+37 }
 0xead   :  { %v1147_v23 = vor.u32 1.1754944e-38, %v1146_v16  ;;  %vm1145_vm4 = vcmp.eq.f32.partialorder %v1144_v18, 8.507059e+37 }
 0xeb0   :  { %v2766_v4 = vpop.eup %2765 }
 0xeb1   :  { %v2768_v35 = vpop.eup %2767  ;;  %v1099_v6 = vmul.f32 %v2766_v4, %v1097_v42  ;;  %vm1104_vm13 = vweird.f32 %v2766_v4 }
 0xeb2   :  { %v1136_v7 = vmul.f32 %v2768_v35, %v1134_v2  ;;  %vm1141_vm14 = vweird.f32 %v2768_v35  ;;  %vm1105_vm1 = vmor %vm1103_vm15, %vm1104_vm13 }
 0xeb3   :  { %v1100_v10 = vsub.f32 1.0, %v1099_v6  ;;  %vm1142_vm2 = vmor %vm1140_vm0, %vm1141_vm14 }
 0xeb4   :  { %v1137_v11 = vsub.f32 1.0, %v1136_v7 }
 0xeb5   :  { %v1101_v41 = vmul.f32 %v2766_v4, %v1100_v10 }
 0xeb6   :  { %v1138_v12 = vmul.f32 %v2768_v35, %v1137_v11 }
 0xeb7   :  { %v1102_v13 = vadd.f32 %v2766_v4, %v1101_v41 }
 0xeb8   :  { %v1139_v15 = vadd.f32 %v2768_v35, %v1138_v12 }
 0xeb9   :  { %v1106_v19 = vsel %vm1105_vm1, %v2766_v4, %v1102_v13 }
 0xeba   :  { %v1143_v21 = vsel %vm1142_vm2, %v2768_v35, %v1139_v15  ;;  %v1111_v47 = vsel %vm1108_vm3, %v1110_v44, %v1106_v19 }
 0xebb   :  { %v1148_v46 = vsel %vm1145_vm4, %v1147_v23, %v1143_v21  ;;  %v1114_v49 = vmul.f32 %v1111_v47, %v3427_v9 }
 0xebc   :  { %v1151_v57 = vmul.f32 %v1148_v46, %v3422_v63 }
 0xf18   :  { %v1117_v24 = vpop.permute.xlu0 %1116 }
 0xf19   :  { %v1154_v45 = vpop.permute.xlu1 %1153  ;;  %v1119_v50 = vmul.f32 %v1117_v24, %v1111_v47 }
 0xf1a   :  { %v1156_v52 = vmul.f32 %v1154_v45, %v1148_v46 }
 0xf1b   :  { %1121 = vrot.lane.b32.xlu2 %v1119_v50, %s3000_s3  ;;  %v3475_v50 = vld [vmem:[#allocation10 + $0x60] sm:$0xff] }
 0xf1c   :  { %1158 = vrot.lane.b32.xlu0 %v1156_v52, %s3000_s3  ;;  %v1332_v52 = vld [vmem:[#allocation8 + $0x70] sm:$0xff] }
 0xf1d   :  { %1372 = vmatpush.msrb.mxu0 %v1332_v52 }
 0xf75   :  { %v1122_v53 = vpop.permute.xlu2 %1121 }
 0xf76   :  { %v3446_v55 = vadd.f32 %v1122_v53, %v1114_v49  ;;  %v1333_v49 = vld [vmem:[#allocation8 + $0x78] sm:$0xff]  ;;  %v1330_v53 = vld [vmem:[#allocation8 + $0x60] sm:$0xff] }
 0xf77   :  { %1413 = vmatpush.msrb.mxu1 %v1333_v49  ;;  %1373 = vmatpush.msrb.mxu0 %v1330_v53 }
 0xf78   :  { %2769 = vtanh.f32 %v3446_v55 }
 0xf7e   :  { %v2770_v56 = vpop.eup %2769 }
 0xf7f   :  { %1127 = vrot.lane.b32.xlu1 %v2770_v56, %s2999_s0  ;;  %v3478_v56 = vld [vmem:[#allocation10 + $0x50] sm:$0xff] }
 0xf8e   :  { %v1159_v58 = vpop.permute.xlu0 %1158 }
 0xf8f   :  { %v3451_v59 = vadd.f32 %v1159_v58, %v1151_v57  ;;  %v1328_v57 = vld [vmem:[#allocation8 + $0x50] sm:$0xff]  ;;  %v1329_v58 = vld [vmem:[#allocation8 + $0x58] sm:$0xff] }
 0xf90   :  { %1374 = vmatpush.msrb.mxu0 %v1328_v57 }
 0xf91   :  { %2771 = vtanh.f32 %v3451_v59 }
 0xf97   :  { %v2772_v60 = vpop.eup %2771 }
 0xf98   :  { %1164 = vrot.lane.b32.xlu2 %v2772_v60, %s2999_s0  ;;  %v1326_v60 = vld [vmem:[#allocation8 + $0x40] sm:$0xff] }
 0xf99   :  { %1375 = vmatpush.msrb.mxu0 %v1326_v60 }
 0xff1   :  { %v1128_v61 = vpop.permute.xlu1 %1127 }
 0xff2   :  { %v1165_v62 = vpop.permute.xlu2 %1164  ;;  %v1130_v0 = vmul.f32 %v1128_v61, %v1111_v47  ;;  %v1327_v61 = vld [vmem:[#allocation8 + $0x48] sm:$0xff] }
 0xff3   :  { %v1167_v1 = vmul.f32 %v1165_v62, %v1148_v46  ;;  %v3473_v46 = vld [vmem:[#allocation10 + $0x70] sm:$0xff] }
 0xff4   :  { %1169 = vrot.lane.b32.xlu0 %v1130_v0, %s3000_s3  ;;  %1486 = vmatpush.msra.mxu2 %v3473_v46  ;;  %v3484_v0 = vld [vmem:[#allocation10 + $0x30] sm:$0xff] }
 0xff5   :  { %1174 = vrot.lane.b32.xlu1 %v1167_v1, %s2999_s0 }
 0xff6   :  { %1487 = vmatpush.msra.mxu2 %v3475_v50 }
 0xff8   :  { %1488 = vmatpush.msra.mxu2 %v3478_v56 }
0x1066   :  { %v1170_v3 = vpop.permute.xlu0 %1169 }
0x1067   :  { %1172 = vst.msk [vmem:[#allocation2 + $0x30] sm:$0xff] %vm365_vm9, %v1170_v3  ;;  %v1175_v63 = vpop.permute.xlu1 %1174 }
0x1068   :  { %1177 = vst.msk [vmem:[#allocation2 + $0x8] sm:$0xff] %vm372_vm10, %v1175_v63  ;;  %v1178_v9 = vsel %vm365_vm9, %v1170_v3, %v1175_v63  ;;  %v3487_v3 = vld [vmem:[#allocation10 + $0x20] sm:$0xff] }
0x1069   :  { %2601 = vmatmul.msk.f32.vlgmr.msrb.gmra.mxu2 %vm238_vm11, %v1178_v9  ;;  %2602 = vmatmul.msk.f32.vlgmr.msrb.gmra.mxu3 %vm238_vm11, %v1178_v9 }
0x10ec   :  { %v1199_v22 = vpop.f32.mrf.mxu2  ;;  %v1219_v48 = vpop.f32.mrf.mxu3 }
0x10ed   :  { %v1223_v26 = vadd.f32 %v1199_v22, %v163_v14  ;;  %v1225_v27 = vadd.f32 %v1219_v48, %v3232_v33  ;;  %v1324_v14 = vld [vmem:[#allocation8 + $0x30] sm:$0xff]  ;;  %v1325_v22 = vld [vmem:[#allocation8 + $0x38] sm:$0xff] }
0x10ee   :  { %v3493_v48 = vld [vmem:[#allocation10 + $0x10] sm:$0xff]  ;;  %1376 = vmatpush.msrb.mxu0 %v1324_v14 }
0x10ef   :  { %2773 = vtanh.f32 %v1223_v26  ;;  %v2604_v31 = vmul.f32 -1.442695, %v1225_v27  ;;  %v2603_v36 = vmul.f32 -1.442695, %v1223_v26  ;;  %v1322_v26 = vld [vmem:[#allocation8 + $0x20] sm:$0xff] }
0x10f0   :  { %2775 = vtanh.f32 %v1225_v27  ;;  %v1323_v27 = vld [vmem:[#allocation8 + $0x28] sm:$0xff]  ;;  %1377 = vmatpush.msrb.mxu0 %v1322_v26 }
0x10f1   :  { %2777 = vpow2.f32 %v2604_v31  ;;  %v1321_v31 = vld [vmem:[#allocation8 + $0x18] sm:$0xff] }
0x10f5   :  { %v2774_v28 = vpop.eup %2773 }
0x10f6   :  { %v2776_v25 = vpop.eup %2775  ;;  %1248 = vrot.lane.b32.xlu1 %v2774_v28, %s2999_s0  ;;  %v3495_v28 = vld [vmem:[#allocation10] sm:$0xff] }
0x10f7   :  { %1285 = vrot.lane.b32.xlu2 %v2776_v25, %s2999_s0  ;;  %v2778_v54 = vpop.eup %2777  ;;  %v1320_v25 = vld [vmem:[#allocation8 + $0x10] sm:$0xff] }
0x10f8   :  { %v1266_v51 = vadd.f32 1.0, %v2778_v54  ;;  %v1318_v54 = vld [vmem:[#allocation8] sm:$0xff]  ;;  %1378 = vmatpush.msrb.mxu0 %v1320_v25 }
0x10fa   :  { %2779 = vrcp.f32 %v1266_v51  ;;  %v1278_v30 = vand.u32 2147483648, %v1266_v51  ;;  %vm1272_vm6 = vweird.f32 %v1266_v51  ;;  %v1276_v8 = vand.u32 2147483647, %v1266_v51  ;;  %1379 = vmatpush.msrb.mxu0 %v1318_v54 }
0x10fb   :  { %2781 = vpow2.f32 %v2603_v36 }
0x10fc   :  { %v1279_v43 = vor.u32 1.1754944e-38, %v1278_v30  ;;  %vm1277_vm8 = vcmp.eq.f32.partialorder %v1276_v8, 8.507059e+37  ;;  %2021 = vmatpush.msra.mxu0 %v3473_v46  ;;  %v3551_v30 = vld [vmem:[#allocation10 + $0x28] sm:$0xff] }
0x10fe   :  { %2022 = vmatpush.msra.mxu0 %v3475_v50 }
0x1100   :  { %v2780_v29 = vpop.eup %2779  ;;  %2023 = vmatpush.msra.mxu0 %v3478_v56 }
0x1101   :  { %v1268_v5 = vmul.f32 %v2780_v29, %v1266_v51  ;;  %v2782_v34 = vpop.eup %2781  ;;  %vm1273_vm5 = vweird.f32 %v2780_v29  ;;  %v1319_v51 = vld [vmem:[#allocation8 + $0x8] sm:$0xff] }
0x1102   :  { %v1229_v37 = vadd.f32 1.0, %v2782_v34  ;;  %vm1274_vm7 = vmor %vm1272_vm6, %vm1273_vm5  ;;  %v1311_v34 = vld [vmem:[#allocation2 + $0x8] sm:$0xff] }
0x1103   :  { %v1269_v32 = vsub.f32 1.0, %v1268_v5  ;;  %v3527_v5 = vld [vmem:[#allocation10 + $0x78] sm:$0xff] }
0x1104   :  { %2783 = vrcp.f32 %v1229_v37  ;;  %v1241_v41 = vand.u32 2147483648, %v1229_v37  ;;  %vm1235_vm13 = vweird.f32 %v1229_v37  ;;  %v1239_v12 = vand.u32 2147483647, %v1229_v37  ;;  %1506 = vmatpush.msra.mxu3 %v3527_v5 }
0x1105   :  { %v1270_v33 = vmul.f32 %v2780_v29, %v1269_v32  ;;  %v3529_v32 = vld [vmem:[#allocation10 + $0x68] sm:$0xff] }
0x1106   :  { %v1242_v15 = vor.u32 1.1754944e-38, %v1241_v41  ;;  %vm1240_vm15 = vcmp.eq.f32.partialorder %v1239_v12, 8.507059e+37  ;;  %1507 = vmatpush.msra.mxu3 %v3529_v32 }
0x1107   :  { %v1271_v38 = vadd.f32 %v2780_v29, %v1270_v33  ;;  %v3540_v33 = vld [vmem:[#allocation10 + $0x58] sm:$0xff] }
0x1108   :  { %1508 = vmatpush.msra.mxu3 %v3540_v33 }
0x1109   :  { %v1275_v39 = vsel %vm1274_vm7, %v2780_v29, %v1271_v38  ;;  %v3546_v38 = vld [vmem:[#allocation10 + $0x38] sm:$0xff] }
0x110a   :  { %v1280_v2 = vsel %vm1277_vm8, %v1279_v43, %v1275_v39  ;;  %v2784_v4 = vpop.eup %2783  ;;  %v1312_v39 = vld [vmem:[#allocation2 + $0x10] sm:$0xff]  ;;  %v3562_v43 = vld [vmem:[#allocation10 + $0x18] sm:$0xff] }
0x110b   :  { %v1231_v6 = vmul.f32 %v2784_v4, %v1229_v37  ;;  %vm1236_vm12 = vweird.f32 %v2784_v4  ;;  %v1283_v18 = vmul.f32 %v1280_v2, %v3451_v59  ;;  %v3481_v59 = vld [vmem:[#allocation10 + $0x40] sm:$0xff]  ;;  %v3542_v37 = vld [vmem:[#allocation10 + $0x48] sm:$0xff] }
0x110c   :  { %vm1237_vm14 = vmor %vm1235_vm13, %vm1236_vm12  ;;  %1489 = vmatpush.msra.mxu2 %v3481_v59  ;;  %2024 = vmatpush.msra.mxu0 %v3481_v59 }
0x110d   :  { %v1232_v7 = vsub.f32 1.0, %v1231_v6  ;;  %1509 = vmatpush.msra.mxu3 %v3542_v37 }
0x110e   :  { %1490 = vmatpush.msra.mxu2 %v3484_v0  ;;  %2025 = vmatpush.msra.mxu0 %v3484_v0 }
0x110f   :  { %v1233_v10 = vmul.f32 %v2784_v4, %v1232_v7  ;;  %1510 = vmatpush.msra.mxu3 %v3546_v38  ;;  %v1334_v7 = vld [vmem:[%s3866_s6] sm:$0x3] }
0x1110   :  { %1491 = vmatpush.msra.mxu2 %v3487_v3  ;;  %2026 = vmatpush.msra.mxu0 %v3487_v3 }
0x1111   :  { %v1234_v11 = vadd.f32 %v2784_v4, %v1233_v10  ;;  %1511 = vmatpush.msra.mxu3 %v3551_v30  ;;  %v3610_v10 = vperm.slane %v1334_v7, 0 }
0x1112   :  { %1492 = vmatpush.msra.mxu2 %v3493_v48  ;;  %2027 = vmatpush.msra.mxu0 %v3493_v48 }
0x1113   :  { %v1238_v13 = vsel %vm1237_vm14, %v2784_v4, %v1234_v11  ;;  %1512 = vmatpush.msra.mxu3 %v3562_v43  ;;  %v1315_v4 = vld [vmem:[#allocation2 + $0x28] sm:$0xff]  ;;  %v1337_v11 = vperm.slane %v1334_v7, 1 }
0x1114   :  { %v1243_v16 = vsel %vm1240_vm15, %v1242_v15, %v1238_v13  ;;  %1493 = vmatpush.msra.mxu2 %v3495_v28  ;;  %2028 = vmatpush.msra.mxu0 %v3495_v28 }
0x1115   :  { %v1246_v23 = vmul.f32 %v1243_v16, %v3446_v55  ;;  %v1331_v55 = vld [vmem:[#allocation8 + $0x68] sm:$0xff]  ;;  %1494 = vmatmul.f32.vlgmr.msra.gmra.mxu2 %v2998_v20 }
0x1116   :  { %1414 = vmatpush.msrb.mxu1 %v1331_v55  ;;  %1619 = vmatpush.msrb.mxu2 %v3473_v46 }
0x1118   :  { %1415 = vmatpush.msrb.mxu1 %v1329_v58  ;;  %1620 = vmatpush.msrb.mxu2 %v3475_v50 }
0x111a   :  { %1416 = vmatpush.msrb.mxu1 %v1327_v61  ;;  %1621 = vmatpush.msrb.mxu2 %v3478_v56 }
0x111c   :  { %1417 = vmatpush.msrb.mxu1 %v1325_v22  ;;  %1622 = vmatpush.msrb.mxu2 %v3481_v59 }
0x111e   :  { %1418 = vmatpush.msrb.mxu1 %v1323_v27  ;;  %1623 = vmatpush.msrb.mxu2 %v3484_v0 }
0x1120   :  { %1419 = vmatpush.msrb.mxu1 %v1321_v31  ;;  %1624 = vmatpush.msrb.mxu2 %v3487_v3 }
0x1122   :  { %1420 = vmatpush.msrb.mxu1 %v1319_v51  ;;  %1625 = vmatpush.msrb.mxu2 %v3493_v48 }
0x1124   :  { %1626 = vmatpush.msrb.mxu2 %v3495_v28  ;;  %2041 = vmatpush.msra.mxu1 %v3527_v5 }
0x1126   :  { %1753 = vmatpush.msra.mxu2 %v3473_v46  ;;  %2042 = vmatpush.msra.mxu1 %v3529_v32 }
0x1128   :  { %1754 = vmatpush.msra.mxu2 %v3475_v50  ;;  %2043 = vmatpush.msra.mxu1 %v3540_v33 }
0x112a   :  { %1755 = vmatpush.msra.mxu2 %v3478_v56  ;;  %2044 = vmatpush.msra.mxu1 %v3542_v37 }
0x112c   :  { %1756 = vmatpush.msra.mxu2 %v3481_v59  ;;  %2045 = vmatpush.msra.mxu1 %v3546_v38 }
0x112e   :  { %1757 = vmatpush.msra.mxu2 %v3484_v0  ;;  %2046 = vmatpush.msra.mxu1 %v3551_v30 }
0x1130   :  { %1758 = vmatpush.msra.mxu2 %v3487_v3  ;;  %2047 = vmatpush.msra.mxu1 %v3562_v43 }
0x1132   :  { %1759 = vmatpush.msra.mxu2 %v3493_v48 }
0x1134   :  { %1760 = vmatpush.msra.mxu2 %v3495_v28 }
0x1151   :  { %v1286_v42 = vpop.permute.xlu2 %1285 }
0x1152   :  { %v1288_v35 = vmul.f32 %v1286_v42, %v1280_v2  ;;  %v3564_v42 = vld [vmem:[#allocation10 + $0x8] sm:$0xff] }
0x1153   :  { %1513 = vmatpush.msra.mxu3 %v3564_v42  ;;  %2048 = vmatpush.msra.mxu1 %v3564_v42 }
0x1154   :  { %1290 = vrot.lane.b32.xlu0 %v1288_v35, %s3000_s3  ;;  %1514 = vmatmul.f32.vlgmr.msra.gmra.mxu3 %v2998_v20  ;;  %v1314_v20 = vld [vmem:[#allocation2 + $0x20] sm:$0xff]  ;;  %v1316_v35 = vld [vmem:[#allocation2 + $0x30] sm:$0xff] }
0x1155   :  { %1639 = vmatpush.msrb.mxu3 %v3527_v5 }
0x1157   :  { %1640 = vmatpush.msrb.mxu3 %v3529_v32 }
0x1159   :  { %1641 = vmatpush.msrb.mxu3 %v3540_v33 }
0x115b   :  { %1642 = vmatpush.msrb.mxu3 %v3542_v37 }
0x115d   :  { %1643 = vmatpush.msrb.mxu3 %v3546_v38 }
0x115f   :  { %1644 = vmatpush.msrb.mxu3 %v3551_v30 }
0x1161   :  { %1645 = vmatpush.msrb.mxu3 %v3562_v43 }
0x1163   :  { %1646 = vmatpush.msrb.mxu3 %v3564_v42 }
0x1165   :  { %1773 = vmatpush.msra.mxu3 %v3527_v5 }
0x1167   :  { %1774 = vmatpush.msra.mxu3 %v3529_v32 }
0x1168   :  { %v1249_v40 = vpop.permute.xlu1 %1248 }
0x1169   :  { %v1251_v17 = vmul.f32 %v1249_v40, %v1243_v16  ;;  %1775 = vmatpush.msra.mxu3 %v3540_v33 }
0x116b   :  { %1253 = vrot.lane.b32.xlu0 %v1251_v17, %s3000_s3  ;;  %1776 = vmatpush.msra.mxu3 %v3542_v37 }
0x116d   :  { %1777 = vmatpush.msra.mxu3 %v3546_v38 }
0x116f   :  { %1778 = vmatpush.msra.mxu3 %v3551_v30 }
0x1171   :  { %1779 = vmatpush.msra.mxu3 %v3562_v43 }
0x1173   :  { %1780 = vmatpush.msra.mxu3 %v3564_v42 }
0x1198   :  { %v1495_v41 = vpop.f32.mrf.mxu2 }
0x11c6   :  { %v1291_v19 = vpop.permute.xlu0 %1290 }
0x11c7   :  { %v1293_v21 = vadd.f32 %v1291_v19, %v1283_v18 }
0x11c9   :  { %2785 = vtanh.f32 %v1293_v21 }
0x11cf   :  { %v2786_v44 = vpop.eup %2785 }
0x11d0   :  { %1296 = vrot.lane.b32.xlu2 %v2786_v44, %s2999_s0 }
0x11d7   :  { %v1515_v22 = vpop.f32.mrf.mxu3 }
0x11dd   :  { %v1254_v24 = vpop.permute.xlu0 %1253 }
0x11de   :  { %v1256_v47 = vadd.f32 %v1254_v24, %v1246_v23 }
0x11e0   :  { %2787 = vtanh.f32 %v1256_v47 }
0x11e6   :  { %v2788_v45 = vpop.eup %2787 }
0x11e7   :  { %1259 = vrot.lane.b32.xlu2 %v2788_v45, %s2999_s0 }
0x122a   :  { %v1297_v62 = vpop.permute.xlu2 %1296 }
0x122b   :  { %v1299_v1 = vmul.f32 %v1297_v62, %v1280_v2  ;;  %v1313_v2 = vld [vmem:[#allocation2 + $0x18] sm:$0xff] }
0x122d   :  { %1306 = vrot.lane.b32.xlu1 %v1299_v1, %s2999_s0 }
0x1241   :  { %v1260_v63 = vpop.permute.xlu2 %1259 }
0x1242   :  { %v1262_v9 = vmul.f32 %v1260_v63, %v1243_v16 }
0x1244   :  { %1301 = vrot.lane.b32.xlu0 %v1262_v9, %s3000_s3 }
0x129f   :  { %v1307_v29 = vpop.permute.xlu1 %1306 }
0x12a0   :  { %1309 = vst.msk [vmem:[#allocation2] sm:$0xff] %vm372_vm10, %v1307_v29 }
0x12a7   :  { %v1310_v36 = vld [vmem:[#allocation2] sm:$0xff] }
0x12a8   :  { %2605 = vmatmul.msk.f32.vlgmr.msrb.gmra.mxu0 %vm238_vm11, %v1310_v36  ;;  %2613 = vmatmul.msk.f32.vlgmr.msrb.gmra.mxu1 %vm238_vm11, %v1310_v36 }
0x12a9   :  { %2285 = vmatpush.msrb.mxu0 %v3473_v46  ;;  %2305 = vmatpush.msrb.mxu1 %v3527_v5 }
0x12ab   :  { %2286 = vmatpush.msrb.mxu0 %v3475_v50  ;;  %2306 = vmatpush.msrb.mxu1 %v3529_v32 }
0x12ad   :  { %2287 = vmatpush.msrb.mxu0 %v3478_v56  ;;  %2307 = vmatpush.msrb.mxu1 %v3540_v33 }
0x12af   :  { %2288 = vmatpush.msrb.mxu0 %v3481_v59  ;;  %2308 = vmatpush.msrb.mxu1 %v3542_v37 }
0x12b0   :  { %2606 = vmatmul.msk.f32.gmra.mxu0 %vm238_vm11, %v1311_v34  ;;  %2614 = vmatmul.msk.f32.gmra.mxu1 %vm238_vm11, %v1311_v34 }
0x12b1   :  { %2289 = vmatpush.msrb.mxu0 %v3484_v0  ;;  %2309 = vmatpush.msrb.mxu1 %v3546_v38 }
0x12b3   :  { %2290 = vmatpush.msrb.mxu0 %v3487_v3  ;;  %2310 = vmatpush.msrb.mxu1 %v3551_v30 }
0x12b5   :  { %2291 = vmatpush.msrb.mxu0 %v3493_v48  ;;  %2311 = vmatpush.msrb.mxu1 %v3562_v43 }
0x12b6   :  { %v1302_v8 = vpop.permute.xlu0 %1301 }
0x12b7   :  { %1304 = vst.msk [vmem:[#allocation2 + $0x38] sm:$0xff] %vm365_vm9, %v1302_v8  ;;  %2292 = vmatpush.msrb.mxu0 %v3495_v28  ;;  %2312 = vmatpush.msrb.mxu1 %v3564_v42 }
0x12b8   :  { %2607 = vmatmul.msk.f32.gmra.mxu0 %vm238_vm11, %v1312_v39  ;;  %2615 = vmatmul.msk.f32.gmra.mxu1 %vm238_vm11, %v1312_v39 }
0x12be   :  { %v1317_v6 = vld [vmem:[#allocation2 + $0x38] sm:$0xff] }
0x12c0   :  { %2608 = vmatmul.msk.f32.gmra.mxu0 %vm238_vm11, %v1313_v2  ;;  %2616 = vmatmul.msk.f32.gmra.mxu1 %vm238_vm11, %v1313_v2 }
0x12c8   :  { %2609 = vmatmul.msk.f32.gmra.mxu0 %vm238_vm11, %v1314_v20  ;;  %2617 = vmatmul.msk.f32.gmra.mxu1 %vm238_vm11, %v1314_v20 }
0x12d0   :  { %2610 = vmatmul.msk.f32.gmra.mxu0 %vm238_vm11, %v1315_v4  ;;  %2618 = vmatmul.msk.f32.gmra.mxu1 %vm238_vm11, %v1315_v4 }
0x12d8   :  { %2611 = vmatmul.msk.f32.gmra.mxu0 %vm238_vm11, %v1316_v35  ;;  %2619 = vmatmul.msk.f32.gmra.mxu1 %vm238_vm11, %v1316_v35 }
0x12e0   :  { %2612 = vmatmul.msk.f32.gmra.mxu0 %vm238_vm11, %v1317_v6  ;;  %2620 = vmatmul.msk.f32.gmra.mxu1 %vm238_vm11, %v1317_v6 }
0x1325   :  { %v1381_v12 = vpop.f32.mrf.mxu0  ;;  %v1422_v13 = vpop.f32.mrf.mxu1 }
0x1326   :  { %v1382_v15 = vadd.f32 %v1381_v12, %v3610_v10  ;;  %v3613_v40 = vadd.f32 %v1422_v13, %v1337_v11 }
0x1328   :  { %v1519_v16 = vadd.f32 %v1495_v41, %v1382_v15 }
0x132a   :  { %2789 = vtanh.f32 %v1519_v16  ;;  %v2621_v31 = vmul.f32 -1.442695, %v1519_v16 }
0x132d   :  { %v3615_v17 = vpop.f32.mrf.mxu0  ;;  %v1425_v18 = vpop.f32.mrf.mxu1 }
0x132e   :  { %v3617_v19 = vadd.f32 %v1425_v18, %v1337_v11 }
0x1330   :  { %v2790_v21 = vpop.eup %2789 }
0x1331   :  { %1544 = vrot.lane.b32.xlu1 %v2790_v21, %s2999_s0 }
0x1335   :  { %v3620_v44 = vpop.f32.mrf.mxu0  ;;  %v1428_v23 = vpop.f32.mrf.mxu1 }
0x1336   :  { %v3622_v24 = vadd.f32 %v1428_v23, %v1337_v11 }
0x133d   :  { %v3624_v47 = vpop.f32.mrf.mxu0  ;;  %v1431_v45 = vpop.f32.mrf.mxu1 }
0x133e   :  { %v3626_v52 = vadd.f32 %v1431_v45, %v1337_v11 }
0x1345   :  { %v3628_v49 = vpop.f32.mrf.mxu0  ;;  %v1434_v53 = vpop.f32.mrf.mxu1 }
0x1346   :  { %v3630_v55 = vadd.f32 %v1434_v53, %v1337_v11 }
0x134d   :  { %v1396_v57 = vpop.f32.mrf.mxu0  ;;  %v1437_v58 = vpop.f32.mrf.mxu1 }
0x134e   :  { %v3633_v60 = vadd.f32 %v1396_v57, %v3610_v10  ;;  %v3635_v61 = vadd.f32 %v1437_v58, %v1337_v11 }
0x1355   :  { %v1399_v62 = vpop.f32.mrf.mxu0  ;;  %v1440_v1 = vpop.f32.mrf.mxu1 }
0x1356   :  { %v3638_v63 = vadd.f32 %v1399_v62, %v3610_v10  ;;  %v3640_v9 = vadd.f32 %v1440_v1, %v1337_v11 }
0x135d   :  { %v1443_v14 = vpop.f32.mrf.mxu1 }
0x135e   :  { %v1444_v26 = vadd.f32 %v1443_v14, %v1337_v11 }
0x1360   :  { %v1521_v27 = vadd.f32 %v1515_v22, %v1444_v26 }
0x1362   :  { %2791 = vtanh.f32 %v1521_v27  ;;  %v2622_v8 = vmul.f32 -1.442695, %v1521_v27 }
0x1363   :  { %2793 = vpow2.f32 %v2621_v31 }
0x1368   :  { %v2792_v25 = vpop.eup %2791 }
0x1369   :  { %1581 = vrot.lane.b32.xlu2 %v2792_v25, %s2999_s0  ;;  %v2794_v54 = vpop.eup %2793 }
0x136a   :  { %v1525_v51 = vadd.f32 1.0, %v2794_v54 }
0x136c   :  { %2795 = vrcp.f32 %v1525_v51  ;;  %v1537_v20 = vand.u32 2147483648, %v1525_v51  ;;  %vm1531_vm1 = vweird.f32 %v1525_v51  ;;  %v1535_v4 = vand.u32 2147483647, %v1525_v51 }
0x136d   :  { %2797 = vpow2.f32 %v2622_v8 }
0x136e   :  { %v1538_v7 = vor.u32 1.1754944e-38, %v1537_v20  ;;  %vm1536_vm3 = vcmp.eq.f32.partialorder %v1535_v4, 8.507059e+37 }
0x1372   :  { %v2796_v29 = vpop.eup %2795 }
0x1373   :  { %v1527_v36 = vmul.f32 %v2796_v29, %v1525_v51  ;;  %vm1532_vm0 = vweird.f32 %v2796_v29  ;;  %v2798_v35 = vpop.eup %2797 }
0x1374   :  { %vm1533_vm2 = vmor %vm1531_vm1, %vm1532_vm0  ;;  %v1562_v11 = vadd.f32 1.0, %v2798_v35  ;;  %v1385_v35 = vadd.f32 %v3615_v17, %v3610_v10 }
0x1375   :  { %v1528_v34 = vsub.f32 1.0, %v1527_v36 }
0x1376   :  { %2799 = vrcp.f32 %v1562_v11  ;;  %v1574_v45 = vand.u32 2147483648, %v1562_v11  ;;  %vm1568_vm5 = vweird.f32 %v1562_v11  ;;  %v1572_v53 = vand.u32 2147483647, %v1562_v11 }
0x1377   :  { %v1529_v39 = vmul.f32 %v2796_v29, %v1528_v34 }
0x1378   :  { %v1575_v58 = vor.u32 1.1754944e-38, %v1574_v45  ;;  %vm1573_vm7 = vcmp.eq.f32.partialorder %v1572_v53, 8.507059e+37 }
0x1379   :  { %v1530_v2 = vadd.f32 %v2796_v29, %v1529_v39 }
0x137b   :  { %v1534_v6 = vsel %vm1533_vm2, %v2796_v29, %v1530_v2 }
0x137c   :  { %v1539_v12 = vsel %vm1536_vm3, %v1538_v7, %v1534_v6  ;;  %v2800_v15 = vpop.eup %2799 }
0x137d   :  { %v1564_v16 = vmul.f32 %v2800_v15, %v1562_v11  ;;  %vm1569_vm4 = vweird.f32 %v2800_v15  ;;  %v1542_v22 = vmul.f32 0.0, %v1539_v12 }
0x137e   :  { %vm1570_vm6 = vmor %vm1568_vm5, %vm1569_vm4 }
0x137f   :  { %v1565_v18 = vsub.f32 1.0, %v1564_v16 }
0x1381   :  { %v1566_v21 = vmul.f32 %v2800_v15, %v1565_v18 }
0x1383   :  { %v1567_v23 = vadd.f32 %v2800_v15, %v1566_v21 }
0x1385   :  { %v1571_v57 = vsel %vm1570_vm6, %v2800_v15, %v1567_v23 }
0x1386   :  { %v1576_v1 = vsel %vm1573_vm7, %v1575_v58, %v1571_v57 }
0x1387   :  { %v1579_v31 = vmul.f32 0.0, %v1576_v1 }
0x13a3   :  { %v1545_v41 = vpop.permute.xlu1 %1544 }
0x13a4   :  { %v1547_v13 = vmul.f32 %v1545_v41, %v1539_v12 }
0x13a6   :  { %1549 = vrot.lane.b32.xlu0 %v1547_v13, %s3000_s3 }
0x13c3   :  { %v1582_v62 = vpop.permute.xlu2 %1581 }
0x13c4   :  { %v1584_v14 = vmul.f32 %v1582_v62, %v1576_v1 }
0x13c6   :  { %1586 = vrot.lane.b32.xlu1 %v1584_v14, %s3000_s3 }
0x1418   :  { %v1550_v26 = vpop.permute.xlu0 %1549 }
0x1419   :  { %v3645_v27 = vadd.f32 %v1550_v26, %v1542_v22 }
0x141b   :  { %2801 = vtanh.f32 %v3645_v27 }
0x1421   :  { %v2802_v25 = vpop.eup %2801 }
0x1422   :  { %1555 = vrot.lane.b32.xlu2 %v2802_v25, %s2999_s0 }
0x1438   :  { %v1587_v54 = vpop.permute.xlu1 %1586 }
0x1439   :  { %v3649_v51 = vadd.f32 %v1587_v54, %v1579_v31 }
0x143b   :  { %2803 = vtanh.f32 %v3649_v51 }
0x1441   :  { %v2804_v29 = vpop.eup %2803 }
0x1442   :  { %1592 = vrot.lane.b32.xlu0 %v2804_v29, %s2999_s0 }
0x147c   :  { %v1556_v36 = vpop.permute.xlu2 %1555 }
0x147d   :  { %v1558_v34 = vmul.f32 %v1556_v36, %v1539_v12 }
0x147f   :  { %1597 = vrot.lane.b32.xlu1 %v1558_v34, %s3000_s3 }
0x14b4   :  { %v1593_v8 = vpop.permute.xlu0 %1592 }
0x14b5   :  { %v1595_v39 = vmul.f32 %v1593_v8, %v1576_v1 }
0x14b7   :  { %1602 = vrot.lane.b32.xlu2 %v1595_v39, %s2999_s0 }
0x14f1   :  { %v1598_v2 = vpop.permute.xlu1 %1597 }
0x1511   :  { %v1603_v20 = vpop.permute.xlu2 %1602 }
0x1512   :  { %1606 = vst.msk [vmem:[#allocation3 + $0x38] sm:$0xff] %vm372_vm10, %v1603_v20  ;;  %v1607_v4 = vsel %vm365_vm9, %v1598_v2, %v1603_v20 }
0x1513   :  { %2623 = vmatmul.msk.f32.vlgmr.msrb.gmra.mxu2 %vm238_vm11, %v1607_v4  ;;  %2624 = vmatmul.msk.f32.vlgmr.msrb.gmra.mxu3 %vm238_vm11, %v1607_v4 }
0x1514   :  { %1887 = vmatpush.msrb.mxu2 %v3473_v46  ;;  %1907 = vmatpush.msrb.mxu3 %v3527_v5 }
0x1516   :  { %1888 = vmatpush.msrb.mxu2 %v3475_v50  ;;  %1908 = vmatpush.msrb.mxu3 %v3529_v32 }
0x1518   :  { %1889 = vmatpush.msrb.mxu2 %v3478_v56  ;;  %1909 = vmatpush.msrb.mxu3 %v3540_v33 }
0x151a   :  { %1890 = vmatpush.msrb.mxu2 %v3481_v59  ;;  %1910 = vmatpush.msrb.mxu3 %v3542_v37 }
0x151c   :  { %1891 = vmatpush.msrb.mxu2 %v3484_v0  ;;  %1911 = vmatpush.msrb.mxu3 %v3546_v38 }
0x151e   :  { %1892 = vmatpush.msrb.mxu2 %v3487_v3  ;;  %1912 = vmatpush.msrb.mxu3 %v3551_v30 }
0x1520   :  { %1893 = vmatpush.msrb.mxu2 %v3493_v48  ;;  %1913 = vmatpush.msrb.mxu3 %v3562_v43 }
0x1522   :  { %1894 = vmatpush.msrb.mxu2 %v3495_v28  ;;  %1914 = vmatpush.msrb.mxu3 %v3564_v42 }
0x1596   :  { %v1628_v6 = vpop.f32.mrf.mxu2  ;;  %v1648_v7 = vpop.f32.mrf.mxu3 }
0x1597   :  { %v1652_v11 = vadd.f32 %v1628_v6, %v1385_v35  ;;  %v1654_v41 = vadd.f32 %v1648_v7, %v3640_v9 }
0x1599   :  { %2805 = vtanh.f32 %v1652_v11  ;;  %v2625_v15 = vmul.f32 -1.442695, %v1652_v11  ;;  %v2626_v16 = vmul.f32 -1.442695, %v1654_v41 }
0x159a   :  { %2807 = vtanh.f32 %v1654_v41 }
0x159b   :  { %2809 = vpow2.f32 %v2625_v15 }
0x159c   :  { %2811 = vpow2.f32 %v2626_v16 }
0x159f   :  { %v2806_v12 = vpop.eup %2805 }
0x15a0   :  { %v2808_v13 = vpop.eup %2807  ;;  %1677 = vrot.lane.b32.xlu0 %v2806_v12, %s2999_s0 }
0x15a1   :  { %1714 = vrot.lane.b32.xlu1 %v2808_v13, %s2999_s0  ;;  %v2810_v18 = vpop.eup %2809 }
0x15a2   :  { %v2812_v21 = vpop.eup %2811  ;;  %v1658_v17 = vadd.f32 1.0, %v2810_v18 }
0x15a3   :  { %v1695_v23 = vadd.f32 1.0, %v2812_v21 }
0x15a4   :  { %2813 = vrcp.f32 %v1658_v17  ;;  %v1670_v25 = vand.u32 2147483648, %v1658_v17  ;;  %vm1664_vm12 = vweird.f32 %v1658_v17  ;;  %v1668_v54 = vand.u32 2147483647, %v1658_v17 }
0x15a5   :  { %2815 = vrcp.f32 %v1695_v23  ;;  %v1707_v31 = vand.u32 2147483648, %v1695_v23  ;;  %vm1701_vm13 = vweird.f32 %v1695_v23  ;;  %v1705_v29 = vand.u32 2147483647, %v1695_v23 }
0x15a6   :  { %v1671_v8 = vor.u32 1.1754944e-38, %v1670_v25  ;;  %vm1669_vm0 = vcmp.eq.f32.partialorder %v1668_v54, 8.507059e+37 }
0x15a7   :  { %v1708_v39 = vor.u32 1.1754944e-38, %v1707_v31  ;;  %vm1706_vm1 = vcmp.eq.f32.partialorder %v1705_v29, 8.507059e+37 }
0x15aa   :  { %v2814_v45 = vpop.eup %2813 }
0x15ab   :  { %v2816_v9 = vpop.eup %2815  ;;  %v1660_v53 = vmul.f32 %v2814_v45, %v1658_v17  ;;  %vm1665_vm10 = vweird.f32 %v2814_v45 }
0x15ac   :  { %v1697_v57 = vmul.f32 %v2816_v9, %v1695_v23  ;;  %vm1702_vm8 = vweird.f32 %v2816_v9  ;;  %vm1666_vm14 = vmor %vm1664_vm12, %vm1665_vm10 }
0x15ad   :  { %v1661_v58 = vsub.f32 1.0, %v1660_v53  ;;  %vm1703_vm15 = vmor %vm1701_vm13, %vm1702_vm8 }
0x15ae   :  { %v1698_v62 = vsub.f32 1.0, %v1697_v57  ;;  %v1388_v57 = vadd.f32 %v3620_v44, %v3610_v10 }
0x15af   :  { %v1662_v1 = vmul.f32 %v2814_v45, %v1661_v58 }
0x15b0   :  { %v1699_v14 = vmul.f32 %v2816_v9, %v1698_v62 }
0x15b1   :  { %v1663_v22 = vadd.f32 %v2814_v45, %v1662_v1 }
0x15b2   :  { %v1700_v26 = vadd.f32 %v2816_v9, %v1699_v14 }
0x15b3   :  { %v1667_v36 = vsel %vm1666_vm14, %v2814_v45, %v1663_v22 }
0x15b4   :  { %v1704_v34 = vsel %vm1703_vm15, %v2816_v9, %v1700_v26  ;;  %v1672_v20 = vsel %vm1669_vm0, %v1671_v8, %v1667_v36 }
0x15b5   :  { %v1709_v35 = vsel %vm1706_vm1, %v1708_v39, %v1704_v34  ;;  %v1675_v11 = vmul.f32 %v1672_v20, %v3645_v27 }
0x15b6   :  { %v1712_v15 = vmul.f32 %v1709_v35, %v3649_v51 }
0x1612   :  { %v1678_v2 = vpop.permute.xlu0 %1677 }
0x1613   :  { %v1715_v4 = vpop.permute.xlu1 %1714  ;;  %v1680_v6 = vmul.f32 %v1678_v2, %v1672_v20 }
0x1614   :  { %v1717_v7 = vmul.f32 %v1715_v4, %v1709_v35 }
0x1615   :  { %1682 = vrot.lane.b32.xlu2 %v1680_v6, %s3000_s3 }
0x1616   :  { %1719 = vrot.lane.b32.xlu0 %v1717_v7, %s3000_s3 }
0x166f   :  { %v1683_v41 = vpop.permute.xlu2 %1682 }
0x1670   :  { %v3683_v12 = vadd.f32 %v1683_v41, %v1675_v11 }
0x1672   :  { %2817 = vtanh.f32 %v3683_v12 }
0x1678   :  { %v2818_v13 = vpop.eup %2817 }
0x1679   :  { %1688 = vrot.lane.b32.xlu1 %v2818_v13, %s2999_s0 }
0x1688   :  { %v1720_v16 = vpop.permute.xlu0 %1719 }
0x1689   :  { %v3688_v18 = vadd.f32 %v1720_v16, %v1712_v15 }
0x168b   :  { %2819 = vtanh.f32 %v3688_v18 }
0x1691   :  { %v2820_v21 = vpop.eup %2819 }
0x1692   :  { %1725 = vrot.lane.b32.xlu2 %v2820_v21, %s2999_s0 }
0x16eb   :  { %v1689_v17 = vpop.permute.xlu1 %1688 }
0x16ec   :  { %v1726_v27 = vpop.permute.xlu2 %1725  ;;  %v1691_v23 = vmul.f32 %v1689_v17, %v1672_v20 }
0x16ed   :  { %v1728_v45 = vmul.f32 %v1726_v27, %v1709_v35 }
0x16ee   :  { %1730 = vrot.lane.b32.xlu0 %v1691_v23, %s3000_s3 }
0x16ef   :  { %1736 = vrot.lane.b32.xlu1 %v1728_v45, %s2999_s0 }
0x1760   :  { %v1731_v9 = vpop.permute.xlu0 %1730 }
0x1761   :  { %v1737_v53 = vpop.permute.xlu1 %1736 }
0x1762   :  { %v1741_v51 = vsel %vm365_vm9, %v1731_v9, %v1737_v53 }
0x1763   :  { %2627 = vmatmul.msk.f32.vlgmr.msra.gmra.mxu2 %vm238_vm11, %v1741_v51  ;;  %2628 = vmatmul.msk.f32.vlgmr.msra.gmra.mxu3 %vm238_vm11, %v1741_v51 }
0x1764   :  { %2153 = vmatpush.msra.mxu2 %v3473_v46  ;;  %2173 = vmatpush.msra.mxu3 %v3527_v5 }
0x1766   :  { %2154 = vmatpush.msra.mxu2 %v3475_v50  ;;  %2174 = vmatpush.msra.mxu3 %v3529_v32 }
0x1768   :  { %2155 = vmatpush.msra.mxu2 %v3478_v56  ;;  %2175 = vmatpush.msra.mxu3 %v3540_v33 }
0x176a   :  { %2156 = vmatpush.msra.mxu2 %v3481_v59  ;;  %2176 = vmatpush.msra.mxu3 %v3542_v37 }
0x176c   :  { %2157 = vmatpush.msra.mxu2 %v3484_v0  ;;  %2177 = vmatpush.msra.mxu3 %v3546_v38 }
0x176e   :  { %2158 = vmatpush.msra.mxu2 %v3487_v3  ;;  %2178 = vmatpush.msra.mxu3 %v3551_v30 }
0x1770   :  { %2159 = vmatpush.msra.mxu2 %v3493_v48  ;;  %2179 = vmatpush.msra.mxu3 %v3562_v43 }
0x1772   :  { %2160 = vmatpush.msra.mxu2 %v3495_v28  ;;  %2180 = vmatpush.msra.mxu3 %v3564_v42 }
0x17e6   :  { %v1762_v58 = vpop.f32.mrf.mxu2  ;;  %v1782_v62 = vpop.f32.mrf.mxu3 }
0x17e7   :  { %v1786_v1 = vadd.f32 %v1762_v58, %v1388_v57  ;;  %v1788_v14 = vadd.f32 %v1782_v62, %v3635_v61 }
0x17e9   :  { %2821 = vtanh.f32 %v1786_v1  ;;  %v2629_v25 = vmul.f32 -1.442695, %v1786_v1  ;;  %v2630_v44 = vmul.f32 -1.442695, %v1788_v14 }
0x17ea   :  { %2823 = vtanh.f32 %v1788_v14 }
0x17eb   :  { %2825 = vpow2.f32 %v2629_v25 }
0x17ef   :  { %v2822_v22 = vpop.eup %2821 }
0x17f0   :  { %v2824_v26 = vpop.eup %2823  ;;  %1811 = vrot.lane.b32.xlu2 %v2822_v22, %s2999_s0 }
0x17f1   :  { %1848 = vrot.lane.b32.xlu0 %v2824_v26, %s2999_s0  ;;  %v2826_v31 = vpop.eup %2825 }
0x17f2   :  { %v1792_v54 = vadd.f32 1.0, %v2826_v31 }
0x17f4   :  { %2827 = vrcp.f32 %v1792_v54  ;;  %v1804_v20 = vand.u32 2147483648, %v1792_v54  ;;  %vm1798_vm3 = vweird.f32 %v1792_v54  ;;  %v1802_v4 = vand.u32 2147483647, %v1792_v54 }
0x17f5   :  { %2829 = vpow2.f32 %v2630_v44 }
0x17f6   :  { %v1805_v6 = vor.u32 1.1754944e-38, %v1804_v20  ;;  %vm1803_vm5 = vcmp.eq.f32.partialorder %v1802_v4, 8.507059e+37 }
0x17fa   :  { %v2828_v29 = vpop.eup %2827 }
0x17fb   :  { %v1794_v36 = vmul.f32 %v2828_v29, %v1792_v54  ;;  %v2830_v61 = vpop.eup %2829  ;;  %vm1799_vm2 = vweird.f32 %v2828_v29 }
0x17fc   :  { %v1829_v39 = vadd.f32 1.0, %v2830_v61  ;;  %vm1800_vm4 = vmor %vm1798_vm3, %vm1799_vm2 }
0x17fd   :  { %v1795_v34 = vsub.f32 1.0, %v1794_v36 }
0x17fe   :  { %2831 = vrcp.f32 %v1829_v39  ;;  %v1841_v27 = vand.u32 2147483648, %v1829_v39  ;;  %vm1835_vm7 = vweird.f32 %v1829_v39  ;;  %v1839_v23 = vand.u32 2147483647, %v1829_v39 }
0x17ff   :  { %v1796_v8 = vmul.f32 %v2828_v29, %v1795_v34 }
0x1800   :  { %v1842_v9 = vor.u32 1.1754944e-38, %v1841_v27  ;;  %vm1840_vm8 = vcmp.eq.f32.partialorder %v1839_v23, 8.507059e+37 }
0x1801   :  { %v1797_v2 = vadd.f32 %v2828_v29, %v1796_v8 }
0x1803   :  { %v1801_v35 = vsel %vm1800_vm4, %v2828_v29, %v1797_v2 }
0x1804   :  { %v1806_v11 = vsel %vm1803_vm5, %v1805_v6, %v1801_v35  ;;  %v2832_v13 = vpop.eup %2831 }
0x1805   :  { %v1831_v15 = vmul.f32 %v2832_v13, %v1829_v39  ;;  %vm1836_vm6 = vweird.f32 %v2832_v13  ;;  %v1809_v58 = vmul.f32 %v1806_v11, %v3683_v12 }
0x1806   :  { %vm1837_vm10 = vmor %vm1835_vm7, %vm1836_vm6 }
0x1807   :  { %v1832_v16 = vsub.f32 1.0, %v1831_v15 }
0x1809   :  { %v1833_v21 = vmul.f32 %v2832_v13, %v1832_v16 }
0x180b   :  { %v1834_v17 = vadd.f32 %v2832_v13, %v1833_v21 }
0x180d   :  { %v1838_v45 = vsel %vm1837_vm10, %v2832_v13, %v1834_v17 }
0x180e   :  { %v1843_v51 = vsel %vm1840_vm8, %v1842_v9, %v1838_v45 }
0x180f   :  { %v1846_v62 = vmul.f32 %v1843_v51, %v3688_v18 }
0x184a   :  { %v1812_v7 = vpop.permute.xlu2 %1811 }
0x184b   :  { %v1814_v41 = vmul.f32 %v1812_v7, %v1806_v11 }
0x184d   :  { %1816 = vrot.lane.b32.xlu1 %v1814_v41, %s3000_s3 }
0x1863   :  { %v1849_v53 = vpop.permute.xlu0 %1848 }
0x1864   :  { %v1851_v57 = vmul.f32 %v1849_v53, %v1843_v51 }
0x1866   :  { %1853 = vrot.lane.b32.xlu2 %v1851_v57, %s3000_s3 }
0x18bf   :  { %v1817_v1 = vpop.permute.xlu1 %1816 }
0x18c0   :  { %v1854_v14 = vpop.permute.xlu2 %1853  ;;  %v3722_v22 = vadd.f32 %v1817_v1, %v1809_v58 }
0x18c1   :  { %v3724_v26 = vadd.f32 %v1854_v14, %v1846_v62 }
0x18c2   :  { %2833 = vtanh.f32 %v3722_v22 }
0x18c3   :  { %2835 = vtanh.f32 %v3724_v26 }
0x18c8   :  { %v2834_v25 = vpop.eup %2833 }
0x18c9   :  { %v2836_v31 = vpop.eup %2835  ;;  %1822 = vrot.lane.b32.xlu0 %v2834_v25, %s2999_s0 }
0x18ca   :  { %1859 = vrot.lane.b32.xlu1 %v2836_v31, %s2999_s0 }
0x193b   :  { %v1823_v54 = vpop.permute.xlu0 %1822 }
0x193c   :  { %v1860_v12 = vpop.permute.xlu1 %1859  ;;  %v1825_v29 = vmul.f32 %v1823_v54, %v1806_v11 }
0x193d   :  { %v1862_v18 = vmul.f32 %v1860_v12, %v1843_v51 }
0x193e   :  { %1864 = vrot.lane.b32.xlu2 %v1825_v29, %s3000_s3 }
0x193f   :  { %1870 = vrot.lane.b32.xlu0 %v1862_v18, %s2999_s0  ;;  %v3773_v18 = vpop.f32.mrf.mxu0 }
0x1998   :  { %v1865_v44 = vpop.permute.xlu2 %1864 }
0x19b1   :  { %v1871_v36 = vpop.permute.xlu0 %1870 }
0x19b2   :  { %v1875_v34 = vsel %vm365_vm9, %v1865_v44, %v1871_v36  ;;  %v1394_v44 = vadd.f32 %v3628_v49, %v3610_v10 }
0x19b3   :  { %2631 = vmatmul.msk.f32.vlgmr.msrb.gmra.mxu2 %vm238_vm11, %v1875_v34  ;;  %2632 = vmatmul.msk.f32.vlgmr.msrb.gmra.mxu3 %vm238_vm11, %v1875_v34 }
0x19b4   :  { %2417 = vmatpush.msrb.mxu2 %v3473_v46  ;;  %2437 = vmatpush.msrb.mxu3 %v3527_v5  ;;  %v1391_v46 = vadd.f32 %v3624_v47, %v3610_v10 }
0x19b6   :  { %2418 = vmatpush.msrb.mxu2 %v3475_v50  ;;  %2438 = vmatpush.msrb.mxu3 %v3529_v32 }
0x19b8   :  { %2419 = vmatpush.msrb.mxu2 %v3478_v56  ;;  %2439 = vmatpush.msrb.mxu3 %v3540_v33 }
0x19ba   :  { %2420 = vmatpush.msrb.mxu2 %v3481_v59  ;;  %2440 = vmatpush.msrb.mxu3 %v3542_v37 }
0x19bc   :  { %2421 = vmatpush.msrb.mxu2 %v3484_v0  ;;  %2441 = vmatpush.msrb.mxu3 %v3546_v38 }
0x19be   :  { %2422 = vmatpush.msrb.mxu2 %v3487_v3  ;;  %2442 = vmatpush.msrb.mxu3 %v3551_v30 }
0x19c0   :  { %2423 = vmatpush.msrb.mxu2 %v3493_v48  ;;  %2443 = vmatpush.msrb.mxu3 %v3562_v43 }
0x19c2   :  { %2424 = vmatpush.msrb.mxu2 %v3495_v28  ;;  %2444 = vmatpush.msrb.mxu3 %v3564_v42 }
0x1a36   :  { %v1896_v50 = vpop.f32.mrf.mxu2  ;;  %v1916_v56 = vpop.f32.mrf.mxu3 }
0x1a37   :  { %v1920_v59 = vadd.f32 %v1896_v50, %v1391_v46  ;;  %v1922_v0 = vadd.f32 %v1916_v56, %v3630_v55 }
0x1a39   :  { %2837 = vtanh.f32 %v1920_v59  ;;  %v2634_v48 = vmul.f32 -1.442695, %v1922_v0  ;;  %v2633_v37 = vmul.f32 -1.442695, %v1920_v59 }
0x1a3a   :  { %2839 = vtanh.f32 %v1922_v0 }
0x1a3b   :  { %2841 = vpow2.f32 %v2634_v48 }
0x1a3f   :  { %v2838_v3 = vpop.eup %2837 }
0x1a40   :  { %v2840_v5 = vpop.eup %2839  ;;  %1945 = vrot.lane.b32.xlu1 %v2838_v3, %s2999_s0 }
0x1a41   :  { %1982 = vrot.lane.b32.xlu2 %v2840_v5, %s2999_s0  ;;  %v2842_v28 = vpop.eup %2841 }
0x1a42   :  { %v1963_v32 = vadd.f32 1.0, %v2842_v28 }
0x1a44   :  { %2843 = vrcp.f32 %v1963_v32  ;;  %v1975_v8 = vand.u32 2147483648, %v1963_v32  ;;  %vm1969_vm13 = vweird.f32 %v1963_v32  ;;  %v1973_v61 = vand.u32 2147483647, %v1963_v32 }
0x1a45   :  { %2845 = vpow2.f32 %v2633_v37 }
0x1a46   :  { %v1976_v2 = vor.u32 1.1754944e-38, %v1975_v8  ;;  %vm1974_vm15 = vcmp.eq.f32.partialorder %v1973_v61, 8.507059e+37 }
0x1a4a   :  { %v2844_v33 = vpop.eup %2843 }
0x1a4b   :  { %v1965_v38 = vmul.f32 %v2844_v33, %v1963_v32  ;;  %v2846_v43 = vpop.eup %2845  ;;  %vm1970_vm12 = vweird.f32 %v2844_v33 }
0x1a4c   :  { %v1926_v47 = vadd.f32 1.0, %v2846_v43  ;;  %vm1971_vm14 = vmor %vm1969_vm13, %vm1970_vm12 }
0x1a4d   :  { %v1966_v30 = vsub.f32 1.0, %v1965_v38 }
0x1a4e   :  { %2847 = vrcp.f32 %v1926_v47  ;;  %v1938_v15 = vand.u32 2147483648, %v1926_v47  ;;  %vm1932_vm1 = vweird.f32 %v1926_v47  ;;  %v1936_v16 = vand.u32 2147483647, %v1926_v47 }
0x1a4f   :  { %v1967_v42 = vmul.f32 %v2844_v33, %v1966_v30 }
0x1a50   :  { %v1939_v17 = vor.u32 1.1754944e-38, %v1938_v15  ;;  %vm1937_vm3 = vcmp.eq.f32.partialorder %v1936_v16, 8.507059e+37 }
0x1a51   :  { %v1968_v55 = vadd.f32 %v2844_v33, %v1967_v42 }
0x1a53   :  { %v1972_v39 = vsel %vm1971_vm14, %v2844_v33, %v1968_v55 }
0x1a54   :  { %v1977_v4 = vsel %vm1974_vm15, %v1976_v2, %v1972_v39  ;;  %v2848_v35 = vpop.eup %2847 }
0x1a55   :  { %v1928_v7 = vmul.f32 %v2848_v35, %v1926_v47  ;;  %vm1933_vm0 = vweird.f32 %v2848_v35  ;;  %v1980_v9 = vmul.f32 %v1977_v4, %v3724_v26 }
0x1a56   :  { %vm1934_vm2 = vmor %vm1932_vm1, %vm1933_vm0 }
0x1a57   :  { %v1929_v11 = vsub.f32 1.0, %v1928_v7 }
0x1a59   :  { %v1930_v41 = vmul.f32 %v2848_v35, %v1929_v11 }
0x1a5b   :  { %v1931_v13 = vadd.f32 %v2848_v35, %v1930_v41 }
0x1a5d   :  { %v1935_v21 = vsel %vm1934_vm2, %v2848_v35, %v1931_v13 }
0x1a5e   :  { %v1940_v23 = vsel %vm1937_vm3, %v1939_v17, %v1935_v21 }
0x1a5f   :  { %v1943_v58 = vmul.f32 %v1940_v23, %v3722_v22 }
0x1a9b   :  { %v1983_v20 = vpop.permute.xlu2 %1982 }
0x1a9c   :  { %v1985_v6 = vmul.f32 %v1983_v20, %v1977_v4 }
0x1a9e   :  { %1987 = vrot.lane.b32.xlu1 %v1985_v6, %s3000_s3 }
0x1ab2   :  { %v1946_v27 = vpop.permute.xlu1 %1945 }
0x1ab3   :  { %v1948_v45 = vmul.f32 %v1946_v27, %v1940_v23 }
0x1ab5   :  { %1950 = vrot.lane.b32.xlu0 %v1948_v45, %s3000_s3 }
0x1b10   :  { %v1988_v53 = vpop.permute.xlu1 %1987 }
0x1b11   :  { %v3759_v51 = vadd.f32 %v1988_v53, %v1980_v9 }
0x1b13   :  { %2849 = vtanh.f32 %v3759_v51 }
0x1b19   :  { %v2850_v57 = vpop.eup %2849 }
0x1b1a   :  { %1993 = vrot.lane.b32.xlu0 %v2850_v57, %s2999_s0 }
0x1b27   :  { %v1951_v62 = vpop.permute.xlu0 %1950 }
0x1b28   :  { %v3764_v1 = vadd.f32 %v1951_v62, %v1943_v58 }
0x1b2a   :  { %2851 = vtanh.f32 %v3764_v1 }
0x1b30   :  { %v2852_v14 = vpop.eup %2851 }
0x1b31   :  { %1956 = vrot.lane.b32.xlu2 %v2852_v14, %s2999_s0 }
0x1b8b   :  { %v1957_v25 = vpop.permute.xlu2 %1956 }
0x1b8c   :  { %v1994_v26 = vpop.permute.xlu0 %1993  ;;  %v1959_v31 = vmul.f32 %v1957_v25, %v1940_v23 }
0x1b8d   :  { %v1996_v54 = vmul.f32 %v1994_v26, %v1977_v4 }
0x1b8e   :  { %1998 = vrot.lane.b32.xlu1 %v1959_v31, %s3000_s3 }
0x1b8f   :  { %2004 = vrot.lane.b32.xlu2 %v1996_v54, %s2999_s0 }
0x1be9   :  { %v2005_v12 = vpop.permute.xlu2 %2004 }
0x1c00   :  { %v1999_v29 = vpop.permute.xlu1 %1998 }
0x1c01   :  { %v2009_v22 = vsel %vm365_vm9, %v1999_v29, %v2005_v12 }
0x1c02   :  { %2635 = vmatmul.msk.f32.vlgmr.msra.gmra.mxu0 %vm238_vm11, %v2009_v22  ;;  %2636 = vmatmul.msk.f32.vlgmr.msra.gmra.mxu1 %vm238_vm11, %v2009_v22 }
0x1c7f   :  { %v2030_v36 = vpop.f32.mrf.mxu0  ;;  %v2050_v34 = vpop.f32.mrf.mxu1 }
0x1c80   :  { %v2054_v46 = vadd.f32 %v2030_v36, %v1394_v44  ;;  %v2056_v50 = vadd.f32 %v2050_v34, %v3626_v52 }
0x1c82   :  { %2853 = vtanh.f32 %v2054_v46  ;;  %v2637_v0 = vmul.f32 -1.442695, %v2054_v46  ;;  %v2638_v3 = vmul.f32 -1.442695, %v2056_v50 }
0x1c83   :  { %2855 = vtanh.f32 %v2056_v50 }
0x1c84   :  { %2857 = vpow2.f32 %v2637_v0 }
0x1c85   :  { %2859 = vpow2.f32 %v2638_v3 }
0x1c88   :  { %v2854_v56 = vpop.eup %2853 }
0x1c89   :  { %v2856_v59 = vpop.eup %2855  ;;  %2079 = vrot.lane.b32.xlu0 %v2854_v56, %s2999_s0 }
0x1c8a   :  { %2116 = vrot.lane.b32.xlu1 %v2856_v59, %s2999_s0  ;;  %v2858_v5 = vpop.eup %2857 }
0x1c8b   :  { %v2860_v48 = vpop.eup %2859  ;;  %v2060_v49 = vadd.f32 1.0, %v2858_v5 }
0x1c8c   :  { %v2097_v28 = vadd.f32 1.0, %v2860_v48 }
0x1c8d   :  { %2861 = vrcp.f32 %v2060_v49  ;;  %v2072_v8 = vand.u32 2147483648, %v2060_v49  ;;  %vm2066_vm6 = vweird.f32 %v2060_v49  ;;  %v2070_v39 = vand.u32 2147483647, %v2060_v49 }
0x1c8e   :  { %2863 = vrcp.f32 %v2097_v28  ;;  %v2109_v61 = vand.u32 2147483648, %v2097_v28  ;;  %vm2103_vm7 = vweird.f32 %v2097_v28  ;;  %v2107_v2 = vand.u32 2147483647, %v2097_v28 }
0x1c8f   :  { %v2073_v35 = vor.u32 1.1754944e-38, %v2072_v8  ;;  %vm2071_vm12 = vcmp.eq.f32.partialorder %v2070_v39, 8.507059e+37 }
0x1c90   :  { %v2110_v6 = vor.u32 1.1754944e-38, %v2109_v61  ;;  %vm2108_vm13 = vcmp.eq.f32.partialorder %v2107_v2, 8.507059e+37 }
0x1c93   :  { %v2862_v32 = vpop.eup %2861 }
0x1c94   :  { %v2864_v52 = vpop.eup %2863  ;;  %v2062_v33 = vmul.f32 %v2862_v32, %v2060_v49  ;;  %vm2067_vm4 = vweird.f32 %v2862_v32 }
0x1c95   :  { %v2099_v37 = vmul.f32 %v2864_v52, %v2097_v28  ;;  %vm2104_vm5 = vweird.f32 %v2864_v52  ;;  %vm2068_vm10 = vmor %vm2066_vm6, %vm2067_vm4 }
0x1c96   :  { %v2063_v38 = vsub.f32 1.0, %v2062_v33  ;;  %vm2105_vm8 = vmor %vm2103_vm7, %vm2104_vm5 }
0x1c97   :  { %v2100_v30 = vsub.f32 1.0, %v2099_v37 }
0x1c98   :  { %v2064_v43 = vmul.f32 %v2862_v32, %v2063_v38 }
0x1c99   :  { %v2101_v42 = vmul.f32 %v2864_v52, %v2100_v30 }
0x1c9a   :  { %v2065_v47 = vadd.f32 %v2862_v32, %v2064_v43 }
0x1c9b   :  { %v2102_v55 = vadd.f32 %v2864_v52, %v2101_v42 }
0x1c9c   :  { %v2069_v20 = vsel %vm2068_vm10, %v2862_v32, %v2065_v47 }
0x1c9d   :  { %v2106_v4 = vsel %vm2105_vm8, %v2864_v52, %v2102_v55  ;;  %v2074_v11 = vsel %vm2071_vm12, %v2073_v35, %v2069_v20 }
0x1c9e   :  { %v2111_v13 = vsel %vm2108_vm13, %v2110_v6, %v2106_v4  ;;  %v2077_v21 = vmul.f32 %v2074_v11, %v3764_v1 }
0x1c9f   :  { %v2114_v45 = vmul.f32 %v2111_v13, %v3759_v51 }
0x1cfb   :  { %v2080_v7 = vpop.permute.xlu0 %2079 }
0x1cfc   :  { %v2117_v41 = vpop.permute.xlu1 %2116  ;;  %v2082_v15 = vmul.f32 %v2080_v7, %v2074_v11 }
0x1cfd   :  { %v2119_v16 = vmul.f32 %v2117_v41, %v2111_v13 }
0x1cfe   :  { %2084 = vrot.lane.b32.xlu2 %v2082_v15, %s3000_s3 }
0x1cff   :  { %2121 = vrot.lane.b32.xlu0 %v2119_v16, %s3000_s3 }
0x1d58   :  { %v2085_v17 = vpop.permute.xlu2 %2084 }
0x1d59   :  { %v3783_v27 = vadd.f32 %v2085_v17, %v2077_v21 }
0x1d5b   :  { %2865 = vtanh.f32 %v3783_v27 }
0x1d61   :  { %v2866_v23 = vpop.eup %2865 }
0x1d62   :  { %2090 = vrot.lane.b32.xlu1 %v2866_v23, %s2999_s0 }
0x1d71   :  { %v2122_v9 = vpop.permute.xlu0 %2121 }
0x1d72   :  { %v3788_v53 = vadd.f32 %v2122_v9, %v2114_v45 }
0x1d74   :  { %2867 = vtanh.f32 %v3788_v53 }
0x1d7a   :  { %v2868_v57 = vpop.eup %2867 }
0x1d7b   :  { %2127 = vrot.lane.b32.xlu2 %v2868_v57, %s2999_s0 }
0x1dd4   :  { %v2091_v58 = vpop.permute.xlu1 %2090 }
0x1dd5   :  { %v2128_v62 = vpop.permute.xlu2 %2127  ;;  %v2093_v1 = vmul.f32 %v2091_v58, %v2074_v11 }
0x1dd6   :  { %v2130_v14 = vmul.f32 %v2128_v62, %v2111_v13 }
0x1dd7   :  { %2132 = vrot.lane.b32.xlu0 %v2093_v1, %s3000_s3 }
0x1dd8   :  { %2137 = vrot.lane.b32.xlu1 %v2130_v14, %s2999_s0 }
0x1e49   :  { %v2133_v25 = vpop.permute.xlu0 %2132 }
0x1e4a   :  { %v2138_v26 = vpop.permute.xlu1 %2137 }
0x1e4b   :  { %v2141_v51 = vsel %vm365_vm9, %v2133_v25, %v2138_v26 }
0x1e4c   :  { %2639 = vmatmul.msk.f32.vlgmr.msra.gmra.mxu2 %vm238_vm11, %v2141_v51  ;;  %2640 = vmatmul.msk.f32.vlgmr.msra.gmra.mxu3 %vm238_vm11, %v2141_v51 }
0x1ecf   :  { %v2162_v31 = vpop.f32.mrf.mxu2  ;;  %v2182_v54 = vpop.f32.mrf.mxu3 }
0x1ed0   :  { %v2186_v12 = vadd.f32 %v2162_v31, %v3633_v60  ;;  %v2188_v29 = vadd.f32 %v2182_v54, %v3622_v24 }
0x1ed2   :  { %2869 = vtanh.f32 %v2186_v12  ;;  %v2641_v36 = vmul.f32 -1.442695, %v2186_v12  ;;  %v2642_v56 = vmul.f32 -1.442695, %v2188_v29 }
0x1ed3   :  { %2871 = vtanh.f32 %v2188_v29 }
0x1ed4   :  { %2873 = vpow2.f32 %v2641_v36 }
0x1ed8   :  { %v2870_v22 = vpop.eup %2869 }
0x1ed9   :  { %v2872_v44 = vpop.eup %2871  ;;  %2211 = vrot.lane.b32.xlu2 %v2870_v22, %s2999_s0 }
0x1eda   :  { %2248 = vrot.lane.b32.xlu0 %v2872_v44, %s2999_s0  ;;  %v2874_v34 = vpop.eup %2873 }
0x1edb   :  { %v2192_v46 = vadd.f32 1.0, %v2874_v34 }
0x1edd   :  { %2875 = vrcp.f32 %v2192_v46  ;;  %v2204_v48 = vand.u32 2147483648, %v2192_v46  ;;  %vm2198_vm15 = vweird.f32 %v2192_v46  ;;  %v2202_v49 = vand.u32 2147483647, %v2192_v46 }
0x1ede   :  { %2877 = vpow2.f32 %v2642_v56 }
0x1edf   :  { %v2205_v32 = vor.u32 1.1754944e-38, %v2204_v48  ;;  %vm2203_vm1 = vcmp.eq.f32.partialorder %v2202_v49, 8.507059e+37 }
0x1ee3   :  { %v2876_v50 = vpop.eup %2875 }
0x1ee4   :  { %v2194_v59 = vmul.f32 %v2876_v50, %v2192_v46  ;;  %v2878_v24 = vpop.eup %2877  ;;  %vm2199_vm14 = vweird.f32 %v2876_v50 }
0x1ee5   :  { %v2229_v3 = vadd.f32 1.0, %v2878_v24  ;;  %vm2200_vm0 = vmor %vm2198_vm15, %vm2199_vm14 }
0x1ee6   :  { %v2195_v60 = vsub.f32 1.0, %v2194_v59 }
0x1ee7   :  { %2879 = vrcp.f32 %v2229_v3  ;;  %v2241_v55 = vand.u32 2147483648, %v2229_v3  ;;  %vm2235_vm3 = vweird.f32 %v2229_v3  ;;  %v2239_v8 = vand.u32 2147483647, %v2229_v3 }
0x1ee8   :  { %v2196_v0 = vmul.f32 %v2876_v50, %v2195_v60 }
0x1ee9   :  { %v2242_v39 = vor.u32 1.1754944e-38, %v2241_v55  ;;  %vm2240_vm5 = vcmp.eq.f32.partialorder %v2239_v8, 8.507059e+37 }
0x1eea   :  { %v2197_v5 = vadd.f32 %v2876_v50, %v2196_v0 }
0x1eec   :  { %v2201_v28 = vsel %vm2200_vm0, %v2876_v50, %v2197_v5 }
0x1eed   :  { %v2206_v33 = vsel %vm2203_vm1, %v2205_v32, %v2201_v28  ;;  %v2880_v38 = vpop.eup %2879 }
0x1eee   :  { %v2231_v30 = vmul.f32 %v2880_v38, %v2229_v3  ;;  %vm2236_vm2 = vweird.f32 %v2880_v38  ;;  %v2209_v35 = vmul.f32 %v2206_v33, %v3783_v27 }
0x1eef   :  { %vm2237_vm4 = vmor %vm2235_vm3, %vm2236_vm2 }
0x1ef0   :  { %v2232_v43 = vsub.f32 1.0, %v2231_v30 }
0x1ef2   :  { %v2233_v42 = vmul.f32 %v2880_v38, %v2232_v43 }
0x1ef4   :  { %v2234_v47 = vadd.f32 %v2880_v38, %v2233_v42 }
0x1ef6   :  { %v2238_v61 = vsel %vm2237_vm4, %v2880_v38, %v2234_v47 }
0x1ef7   :  { %v2243_v20 = vsel %vm2240_vm5, %v2242_v39, %v2238_v61 }
0x1ef8   :  { %v2246_v6 = vmul.f32 %v2243_v20, %v3788_v53 }
0x1f33   :  { %v2212_v52 = vpop.permute.xlu2 %2211 }
0x1f34   :  { %v2214_v37 = vmul.f32 %v2212_v52, %v2206_v33 }
0x1f36   :  { %2216 = vrot.lane.b32.xlu1 %v2214_v37, %s3000_s3 }
0x1f4c   :  { %v2249_v2 = vpop.permute.xlu0 %2248 }
0x1f4d   :  { %v2251_v4 = vmul.f32 %v2249_v2, %v2243_v20 }
0x1f4f   :  { %2253 = vrot.lane.b32.xlu2 %v2251_v4, %s3000_s3 }
0x1fa8   :  { %v2217_v7 = vpop.permute.xlu1 %2216 }
0x1fa9   :  { %v2254_v11 = vpop.permute.xlu2 %2253  ;;  %v3805_v41 = vadd.f32 %v2217_v7, %v2209_v35 }
0x1faa   :  { %v3807_v13 = vadd.f32 %v2254_v11, %v2246_v6 }
0x1fab   :  { %2881 = vtanh.f32 %v3805_v41 }
0x1fac   :  { %2883 = vtanh.f32 %v3807_v13 }
0x1fb1   :  { %v2882_v15 = vpop.eup %2881 }
0x1fb2   :  { %v2884_v16 = vpop.eup %2883  ;;  %2222 = vrot.lane.b32.xlu0 %v2882_v15, %s2999_s0 }
0x1fb3   :  { %2259 = vrot.lane.b32.xlu1 %v2884_v16, %s2999_s0 }
0x2024   :  { %v2223_v21 = vpop.permute.xlu0 %2222 }
0x2025   :  { %v2260_v17 = vpop.permute.xlu1 %2259  ;;  %v2225_v27 = vmul.f32 %v2223_v21, %v2206_v33 }
0x2026   :  { %v2262_v23 = vmul.f32 %v2260_v17, %v2243_v20 }
0x2027   :  { %2264 = vrot.lane.b32.xlu2 %v2225_v27, %s3000_s3 }
0x2028   :  { %2269 = vrot.lane.b32.xlu0 %v2262_v23, %s2999_s0 }
0x2081   :  { %v2265_v45 = vpop.permute.xlu2 %2264 }
0x209a   :  { %v2270_v9 = vpop.permute.xlu0 %2269 }
0x209b   :  { %v2273_v53 = vsel %vm365_vm9, %v2265_v45, %v2270_v9 }
0x209c   :  { %2643 = vmatmul.msk.f32.vlgmr.msrb.gmra.mxu0 %vm238_vm11, %v2273_v53  ;;  %2644 = vmatmul.msk.f32.vlgmr.msrb.gmra.mxu1 %vm238_vm11, %v2273_v53 }
0x2119   :  { %v2294_v57 = vpop.f32.mrf.mxu0  ;;  %v2314_v58 = vpop.f32.mrf.mxu1 }
0x211a   :  { %v2318_v62 = vadd.f32 %v2294_v57, %v3638_v63  ;;  %v2320_v1 = vadd.f32 %v2314_v58, %v3617_v19 }
0x211c   :  { %2885 = vtanh.f32 %v2318_v62  ;;  %v2646_v26 = vmul.f32 -1.442695, %v2320_v1  ;;  %v2645_v12 = vmul.f32 -1.442695, %v2318_v62 }
0x211d   :  { %2887 = vtanh.f32 %v2320_v1 }
0x211e   :  { %2889 = vpow2.f32 %v2646_v26 }
0x2122   :  { %v2886_v14 = vpop.eup %2885 }
0x2123   :  { %v2888_v25 = vpop.eup %2887  ;;  %2343 = vrot.lane.b32.xlu1 %v2886_v14, %s2999_s0 }
0x2124   :  { %2380 = vrot.lane.b32.xlu2 %v2888_v25, %s2999_s0  ;;  %v2890_v51 = vpop.eup %2889 }
0x2125   :  { %v2361_v31 = vadd.f32 1.0, %v2890_v51 }
0x2127   :  { %2891 = vrcp.f32 %v2361_v31  ;;  %v2373_v34 = vand.u32 2147483648, %v2361_v31  ;;  %vm2367_vm7 = vweird.f32 %v2361_v31  ;;  %v2371_v46 = vand.u32 2147483647, %v2361_v31 }
0x2128   :  { %2893 = vpow2.f32 %v2645_v12 }
0x2129   :  { %v2374_v56 = vor.u32 1.1754944e-38, %v2373_v34  ;;  %vm2372_vm8 = vcmp.eq.f32.partialorder %v2371_v46, 8.507059e+37 }
0x212d   :  { %v2892_v54 = vpop.eup %2891 }
0x212e   :  { %v2363_v29 = vmul.f32 %v2892_v54, %v2361_v31  ;;  %v2894_v22 = vpop.eup %2893  ;;  %vm2368_vm6 = vweird.f32 %v2892_v54 }
0x212f   :  { %v2324_v44 = vadd.f32 1.0, %v2894_v22  ;;  %vm2369_vm10 = vmor %vm2367_vm7, %vm2368_vm6 }
0x2130   :  { %v2364_v63 = vsub.f32 1.0, %v2363_v29 }
0x2131   :  { %2895 = vrcp.f32 %v2324_v44  ;;  %v2336_v28 = vand.u32 2147483648, %v2324_v44  ;;  %vm2330_vm13 = vweird.f32 %v2324_v44  ;;  %v2334_v32 = vand.u32 2147483647, %v2324_v44 }
0x2132   :  { %v2365_v19 = vmul.f32 %v2892_v54, %v2364_v63 }
0x2133   :  { %v2337_v33 = vor.u32 1.1754944e-38, %v2336_v28  ;;  %vm2335_vm15 = vcmp.eq.f32.partialorder %v2334_v32, 8.507059e+37 }
0x2134   :  { %v2366_v36 = vadd.f32 %v2892_v54, %v2365_v19 }
0x2136   :  { %v2370_v50 = vsel %vm2369_vm10, %v2892_v54, %v2366_v36  ;;  %vm2551_vm10 = vcmask 7168  }
0x2137   :  { %v2375_v60 = vsel %vm2372_vm8, %v2374_v56, %v2370_v50  ;;  %v2896_v0 = vpop.eup %2895 }
0x2138   :  { %v2326_v3 = vmul.f32 %v2896_v0, %v2324_v44  ;;  %vm2331_vm12 = vweird.f32 %v2896_v0  ;;  %v2378_v43 = vmul.f32 %v2375_v60, %v3807_v13  ;;  %v1403_v13 = vadd.f32 %v3773_v18, %v3610_v10 }
0x2139   :  { %vm2332_vm14 = vmor %vm2330_vm13, %vm2331_vm12 }
0x213a   :  { %v2327_v5 = vsub.f32 1.0, %v2326_v3 }
0x213c   :  { %v2328_v48 = vmul.f32 %v2896_v0, %v2327_v5 }
0x213e   :  { %v2329_v49 = vadd.f32 %v2896_v0, %v2328_v48 }
0x2140   :  { %v2333_v52 = vsel %vm2332_vm14, %v2896_v0, %v2329_v49 }
0x2141   :  { %v2338_v38 = vsel %vm2335_vm15, %v2337_v33, %v2333_v52 }
0x2142   :  { %v2341_v8 = vmul.f32 %v2338_v38, %v3805_v41 }
0x217e   :  { %v2381_v59 = vpop.permute.xlu2 %2380 }
0x217f   :  { %v2383_v24 = vmul.f32 %v2381_v59, %v2375_v60 }
0x2181   :  { %2385 = vrot.lane.b32.xlu1 %v2383_v24, %s3000_s3 }
0x2195   :  { %v2344_v37 = vpop.permute.xlu1 %2343 }
0x2196   :  { %v2346_v30 = vmul.f32 %v2344_v37, %v2338_v38 }
0x2198   :  { %2348 = vrot.lane.b32.xlu0 %v2346_v30, %s3000_s3 }
0x21f3   :  { %v2386_v42 = vpop.permute.xlu1 %2385 }
0x21f4   :  { %v3825_v47 = vadd.f32 %v2386_v42, %v2378_v43  ;;  %v2659_v42 = vld [vmem:[%s3867_s7] ss:$0 sm:$0xff] }
0x21f6   :  { %2897 = vtanh.f32 %v3825_v47 }
0x21fc   :  { %v2898_v55 = vpop.eup %2897 }
0x21fd   :  { %2391 = vrot.lane.b32.xlu0 %v2898_v55, %s2999_s0 }
0x220a   :  { %v2349_v61 = vpop.permute.xlu0 %2348 }
0x220b   :  { %v3830_v39 = vadd.f32 %v2349_v61, %v2341_v8 }
0x220d   :  { %2899 = vtanh.f32 %v3830_v39 }
0x2213   :  { %v2900_v2 = vpop.eup %2899 }
0x2214   :  { %2354 = vrot.lane.b32.xlu2 %v2900_v2, %s2999_s0 }
0x226e   :  { %v2355_v20 = vpop.permute.xlu2 %2354 }
0x226f   :  { %v2392_v4 = vpop.permute.xlu0 %2391  ;;  %v2357_v35 = vmul.f32 %v2355_v20, %v2338_v38 }
0x2270   :  { %v2394_v6 = vmul.f32 %v2392_v4, %v2375_v60 }
0x2271   :  { %2396 = vrot.lane.b32.xlu1 %v2357_v35, %s3000_s3 }
0x2272   :  { %2401 = vrot.lane.b32.xlu2 %v2394_v6, %s2999_s0 }
0x22cc   :  { %v2402_v7 = vpop.permute.xlu2 %2401 }
0x22e3   :  { %v2397_v11 = vpop.permute.xlu1 %2396 }
0x22e4   :  { %v2405_v41 = vsel %vm365_vm9, %v2397_v11, %v2402_v7 }
0x22e5   :  { %2647 = vmatmul.msk.f32.vlgmr.msrb.gmra.mxu2 %vm238_vm11, %v2405_v41  ;;  %2648 = vmatmul.msk.f32.vlgmr.msrb.gmra.mxu3 %vm238_vm11, %v2405_v41 }
0x2368   :  { %v2426_v15 = vpop.f32.mrf.mxu2  ;;  %v2446_v16 = vpop.f32.mrf.mxu3 }
0x2369   :  { %v2450_v21 = vadd.f32 %v2426_v15, %v1403_v13  ;;  %v2452_v17 = vadd.f32 %v2446_v16, %v3613_v40 }
0x236b   :  { %2901 = vtanh.f32 %v2450_v21  ;;  %v2649_v45 = vmul.f32 -1.442695, %v2450_v21  ;;  %v2650_v9 = vmul.f32 -1.442695, %v2452_v17 }
0x236c   :  { %2903 = vtanh.f32 %v2452_v17 }
0x236d   :  { %2905 = vpow2.f32 %v2649_v45 }
0x236e   :  { %2907 = vpow2.f32 %v2650_v9 }
0x2371   :  { %v2902_v27 = vpop.eup %2901 }
0x2372   :  { %v2904_v23 = vpop.eup %2903  ;;  %2475 = vrot.lane.b32.xlu0 %v2902_v27, %s2999_s0 }
0x2373   :  { %2512 = vrot.lane.b32.xlu2 %v2904_v23, %s2999_s0  ;;  %v2906_v53 = vpop.eup %2905 }
0x2374   :  { %v2456_v57 = vadd.f32 1.0, %v2906_v53  ;;  %v2908_v10 = vpop.eup %2907 }
0x2375   :  { %v2493_v18 = vadd.f32 1.0, %v2908_v10 }
0x2376   :  { %2909 = vrcp.f32 %v2456_v57  ;;  %v2468_v31 = vand.u32 2147483648, %v2456_v57  ;;  %vm2462_vm1 = vweird.f32 %v2456_v57  ;;  %v2466_v54 = vand.u32 2147483647, %v2456_v57 }
0x2377   :  { %2911 = vrcp.f32 %v2493_v18  ;;  %v2505_v34 = vand.u32 2147483648, %v2493_v18  ;;  %vm2499_vm5 = vweird.f32 %v2493_v18  ;;  %v2503_v46 = vand.u32 2147483647, %v2493_v18 }
0x2378   :  { %v2469_v63 = vor.u32 1.1754944e-38, %v2468_v31  ;;  %vm2467_vm3 = vcmp.eq.f32.partialorder %v2466_v54, 8.507059e+37 }
0x2379   :  { %v2506_v59 = vor.u32 1.1754944e-38, %v2505_v34  ;;  %vm2504_vm7 = vcmp.eq.f32.partialorder %v2503_v46, 8.507059e+37 }
0x237c   :  { %v2910_v58 = vpop.eup %2909 }
0x237d   :  { %v2458_v40 = vmul.f32 %v2910_v58, %v2456_v57  ;;  %v2912_v1 = vpop.eup %2911  ;;  %vm2463_vm0 = vweird.f32 %v2910_v58 }
0x237e   :  { %v2495_v14 = vmul.f32 %v2912_v1, %v2493_v18  ;;  %vm2464_vm2 = vmor %vm2462_vm1, %vm2463_vm0  ;;  %vm2500_vm4 = vweird.f32 %v2912_v1 }
0x237f   :  { %v2459_v62 = vsub.f32 1.0, %v2458_v40  ;;  %vm2501_vm6 = vmor %vm2499_vm5, %vm2500_vm4 }
0x2380   :  { %v2496_v26 = vsub.f32 1.0, %v2495_v14 }
0x2381   :  { %v2460_v25 = vmul.f32 %v2910_v58, %v2459_v62 }
0x2382   :  { %v2497_v12 = vmul.f32 %v2912_v1, %v2496_v26 }
0x2383   :  { %v2461_v51 = vadd.f32 %v2910_v58, %v2460_v25 }
0x2384   :  { %v2498_v44 = vadd.f32 %v2912_v1, %v2497_v12 }
0x2385   :  { %v2465_v29 = vsel %vm2464_vm2, %v2910_v58, %v2461_v51 }
0x2386   :  { %v2470_v19 = vsel %vm2467_vm3, %v2469_v63, %v2465_v29  ;;  %v2502_v50 = vsel %vm2501_vm6, %v2912_v1, %v2498_v44 }
0x2387   :  { %v2507_v60 = vsel %vm2504_vm7, %v2506_v59, %v2502_v50  ;;  %v2473_v24 = vmul.f32 %v2470_v19, %v3830_v39  ;;  %v2660_v39 = vld [vmem:[#allocation5] ss:$0 sm:$0xff] }
0x2388   :  { %v2510_v48 = vmul.f32 %v2507_v60, %v3825_v47 }
0x23cd   :  { %v2513_v56 = vpop.permute.xlu2 %2512 }
0x23ce   :  { %v2515_v0 = vmul.f32 %v2513_v56, %v2507_v60 }
0x23e4   :  { %v2476_v22 = vpop.permute.xlu0 %2475 }
0x23e5   :  { %v2478_v36 = vmul.f32 %v2476_v22, %v2470_v19 }
0x23e7   :  { %2480 = vrot.lane.b32.xlu1 %v2478_v36, %s3000_s3 }
0x23ef   :  { %2517 = vrot.lane.b32.xlu1 %v2515_v0, %s3000_s3 }
0x2459   :  { %v2481_v3 = vpop.permute.xlu1 %2480 }
0x245a   :  { %v2483_v5 = vadd.f32 %v2481_v3, %v2473_v24 }
0x245c   :  { %2913 = vtanh.f32 %v2483_v5 }
0x2461   :  { %v2518_v49 = vpop.permute.xlu1 %2517 }
0x2462   :  { %v2914_v28 = vpop.eup %2913  ;;  %v2520_v32 = vadd.f32 %v2518_v49, %v2510_v48 }
0x2463   :  { %2486 = vrot.lane.b32.xlu0 %v2914_v28, %s2999_s0 }
0x2464   :  { %2915 = vtanh.f32 %v2520_v32 }
0x246a   :  { %v2916_v52 = vpop.eup %2915 }
0x246b   :  { %2523 = vrot.lane.b32.xlu0 %v2916_v52, %s2999_s0 }
0x24d5   :  { %v2487_v33 = vpop.permute.xlu0 %2486 }
0x24d6   :  { %v2489_v37 = vmul.f32 %v2487_v33, %v2470_v19 }
0x24d8   :  { %2528 = vrot.lane.b32.xlu2 %v2489_v37, %s3000_s3 }
0x24dd   :  { %v2524_v38 = vpop.permute.xlu0 %2523 }
0x24de   :  { %v2526_v30 = vmul.f32 %v2524_v38, %v2507_v60 }
0x24e0   :  { %2533 = vrot.lane.b32.xlu2 %v2526_v30, %s2999_s0 }
0x2532   :  { %v2529_v43 = vpop.permute.xlu2 %2528 }
0x2533   :  { %2531 = vst.msk [vmem:[#allocation3 + $0x38] sm:$0xff] %vm365_vm9, %v2529_v43 }
0x253a   :  { %v2534_v47 = vpop.permute.xlu2 %2533  ;;  %v2537_v55 = vld [vmem:[#allocation3 + $0x38] sm:$0xff] }
0x253b   :  { %v2542_v8 = vmul.f32 %v2659_v42, %v2537_v55 }
0x253d   :  { %v2543_v61 = vsel %vm238_vm11, %v2542_v8, 0.0 }
0x253e   :  { %2544 = vadd.xlane.f32.xlu1 %v2543_v61 }
0x25b1   :  { %v2545_v2 = vpop.xlane.xlu1 %2544 }
0x25b2   :  { %v2550_v20 = vadd.f32 %v2660_v39, %v2545_v2 }
0x25b4   :  { %2552 = vst.msk [vmem:[%s3869_s9] sm:$0xff] %vm2551_vm10, %v2550_v20 }
0x25b5   :  { %2557 = vsyncpa [#allocation7], 1 }
0x25b6   :  { %2558 = vsyncpa [#allocation9], 1 }

</bundles_post_ra>
